<compile_context>
chip_gen: v7x
topology: tpu7x:2x2x1
jax: 0.10.0
libtpu: 0.0.40
codegen_flags: <defaults>
</compile_context>

<pallas_src>
import functools

import jax
import jax.numpy as jnp
from jax import lax
from jax.experimental import pallas as pl
from jax.experimental.pallas import tpu as pltpu
import numpy as np

# Matmul operand dtype.  jnp.bfloat16 gives ~3x MXU throughput on v6e/v7x and
# halves weight VMEM (review opt #3), at the cost of loosening the strict 1e-4
# tolerance against the f32 reference; kept at float32 here for correctness.
MATMUL_DTYPE = jnp.float32

# Chunk working-set budget and explicit scoped-VMEM limit: safe on v7x's
# 64 MiB physical VMEM while large enough to amortise grid-step overhead on
# v5e/v6e (review opts #5/#6).
_CHUNK_VMEM_BUDGET = 24 * 1024 * 1024
_VMEM_LIMIT_BYTES = 48 * 1024 * 1024


# ----------------------------------------------------------------------------
# Fused bidirectional LSTM layer kernel (seq-output or pooled+FC variant).
# ----------------------------------------------------------------------------
def _bilstm_kernel(*args, chunk, n_in, pool, h_dim, inv_t):
    H = h_dim
    G = 4 * H
    idx = 0
    in_f = args[idx:idx + n_in]; idx += n_in          # fwd-ordered input blocks
    in_r = args[idx:idx + n_in]; idx += n_in          # rev-ordered input blocks
    wih_f = args[idx:idx + n_in]; idx += n_in         # (D_i, 4H) per stream, fwd dir
    wih_b = args[idx:idx + n_in]; idx += n_in         # (D_i, 4H) per stream, bwd dir
    whh_f_ref, whh_b_ref, bias_f_ref, bias_b_ref = args[idx:idx + 4]; idx += 4
    if pool:
        wfc_ref, bfc_ref = args[idx:idx + 2]; idx += 2
        out_ref = args[idx]; idx += 1
        (h_f_ref, c_f_ref, h_b_ref, c_b_ref,
         gin_f_ref, gin_b_ref, acc_f_ref, acc_b_ref) = args[idx:]
    else:
        out_f_ref, out_b_ref = args[idx:idx + 2]; idx += 2
        (h_f_ref, c_f_ref, h_b_ref, c_b_ref,
         gin_f_ref, gin_b_ref) = args[idx:]

    B = h_f_ref.shape[0]
    c_idx = pl.program_id(0)

    @pl.when(c_idx == 0)
    def _():
        h_f_ref[...] = jnp.zeros_like(h_f_ref)
        c_f_ref[...] = jnp.zeros_like(c_f_ref)
        h_b_ref[...] = jnp.zeros_like(h_b_ref)
        c_b_ref[...] = jnp.zeros_like(c_b_ref)
        if pool:
            acc_f_ref[...] = jnp.zeros_like(acc_f_ref)
            acc_b_ref[...] = jnp.zeros_like(acc_b_ref)

    # -- Chunk-parallel input projection: one large (chunk*B, D)@(D, 4H) matmul
    #    per direction; result lives only in VMEM scratch (no HBM round-trip).
    def proj(x_refs, w_refs, bias_ref, gin_ref):
        acc = None
        for x_ref, w_ref in zip(x_refs, w_refs):
            d = x_ref.shape[-1]
            x2 = x_ref[...].reshape(chunk * B, d).astype(MATMUL_DTYPE)
            y = jnp.dot(x2, w_ref[...].astype(MATMUL_DTYPE),
                        preferred_element_type=jnp.float32)
            acc = y if acc is None else acc + y
        gin_ref[...] = (acc + bias_ref[...]).reshape(chunk, B, G)

    proj(in_f, wih_f, bias_f_ref, gin_f_ref)
    proj(in_r, wih_b, bias_b_ref, gin_b_ref)

    whh_f = whh_f_ref[...].astype(MATMUL_DTYPE)
    whh_b = whh_b_ref[...].astype(MATMUL_DTYPE)

    def cell(gin_ref, s, whh, h, c):
        # Single packed recurrent matmul; gates sliced off the 4H lane axis.
        g = gin_ref[s] + jnp.dot(h.astype(MATMUL_DTYPE), whh,
                                 preferred_element_type=jnp.float32)
        gi = jax.nn.sigmoid(g[:, 0 * H:1 * H])
        gf = jax.nn.sigmoid(g[:, 1 * H:2 * H])
        gg = jnp.tanh(g[:, 2 * H:3 * H])
        go = jax.nn.sigmoid(g[:, 3 * H:4 * H])
        c_new = gf * c + gi * gg
        h_new = go * jnp.tanh(c_new)
        return h_new, c_new

    def body(s, carry):
        if pool:
            h_f, c_f, h_b, c_b, a_f, a_b = carry
        else:
            h_f, c_f, h_b, c_b = carry
        h_f, c_f = cell(gin_f_ref, s, whh_f, h_f, c_f)
        sl = chunk - 1 - s          # backward direction walks its chunk reversed
        h_b, c_b = cell(gin_b_ref, sl, whh_b, h_b, c_b)
        if pool:
            return (h_f, c_f, h_b, c_b, a_f + h_f, a_b + h_b)
        out_f_ref[s] = h_f.astype(out_f_ref.dtype)
        out_b_ref[sl] = h_b.astype(out_b_ref.dtype)
        return (h_f, c_f, h_b, c_b)

    carry0 = (h_f_ref[...], c_f_ref[...], h_b_ref[...], c_b_ref[...])
    if pool:
        carry0 = carry0 + (acc_f_ref[...], acc_b_ref[...])
    # Moderate unroll (review opt #9): keeps LLO visibility without vreg spills.
    final = lax.fori_loop(0, chunk, body, carry0, unroll=min(8, chunk))

    h_f_ref[...] = final[0]
    c_f_ref[...] = final[1]
    h_b_ref[...] = final[2]
    c_b_ref[...] = final[3]
    if pool:
        acc_f_ref[...] = final[4]
        acc_b_ref[...] = final[5]

        @pl.when(c_idx == pl.num_programs(0) - 1)
        def _():
            # Fused temporal mean + final Linear (review opt #11).
            mf = (final[4] * inv_t).astype(MATMUL_DTYPE)
            mb = (final[5] * inv_t).astype(MATMUL_DTYPE)
            y = (jnp.dot(mf, wfc_ref[0].astype(MATMUL_DTYPE),
                         preferred_element_type=jnp.float32)
                 + jnp.dot(mb, wfc_ref[1].astype(MATMUL_DTYPE),
                           preferred_element_type=jnp.float32))
            out_ref[...] = (y + bfc_ref[...]).astype(out_ref.dtype)


def _pick_chunk(T, B, dins, H, budget_bytes=_CHUNK_VMEM_BUDGET):
    """Largest divisor of T whose per-grid-step VMEM working set fits the
    budget; accounts for double-buffered input/output blocks, the gin scratch,
    double-buffered weights and the h/c/acc carries (review opt #5)."""
    f32 = 4
    d_sum = sum(dins)
    per_chunk_step = (2 * 2 * B * d_sum        # input blocks: 2 dirs x 2 buffers
                      + 2 * B * 4 * H          # gin scratch (single buffered)
                      + 2 * 2 * B * H) * f32   # seq out blocks: 2 dirs x 2 bufs
    fixed = (2 * 2 * (d_sum * 4 * H + H * 4 * H + 4 * H)   # wih+whh+bias dbl-buf
             + 8 * B * H) * f32                            # h/c/acc carries
    cap = max(1, (budget_bytes - fixed) // per_chunk_step)
    cap = int(min(cap, T))
    best = 1
    for d in range(1, cap + 1):
        if T % d == 0:
            best = d
    # TODO(synk): for prime/awkward T this degrades toward chunk=1; padding T to
    # a multiple of a good chunk and masking padded recurrent steps would fix it.
    return best


def _const_spec(arr):
    nd = arr.ndim
    return pl.BlockSpec(arr.shape, lambda c, _nd=nd: (0,) * _nd)


def bilstm_layer(inputs, fwd_p, bwd_p, *, pool=False, fc=None, inv_t=None):
    """One fused bidirectional LSTM layer.

    inputs: tuple of time-major (T, B, D_i) arrays — (x,) for layer 0, or the
            previous layer's (seq_fwd, seq_bwd); the (.., 2H) concatenation is
            never materialised (the input-projection weight is split instead).
    Returns (seq_fwd, seq_bwd), each (T, B, H), if pool=False; otherwise the
    fused temporal-mean + Linear output (B, output_dim).
    """
    T, B = inputs[0].shape[:2]
    dins = [a.shape[-1] for a in inputs]
    H = fwd_p["whh"].shape[0]
    n_in = len(inputs)

    chunk = _pick_chunk(T, B, dins, H)
    nchunks = T // chunk

    in_specs, args = [], []
    for a, d in zip(inputs, dins):                         # forward chunk order
        in_specs.append(pl.BlockSpec((chunk, B, d), lambda c: (c, 0, 0)))
        args.append(a)
    for a, d in zip(inputs, dins):                         # reverse chunk order
        in_specs.append(pl.BlockSpec((chunk, B, d),
                                     lambda c: (nchunks - 1 - c, 0, 0)))
        args.append(a)
    # Grid-invariant packed weights / biases.
    # TODO(synk): pipeline_mode=pl.Buffered(1) (or a one-time copy into scratch)
    # would drop their redundant second buffer (review opt #8).
    for w in (*fwd_p["wih_parts"], *bwd_p["wih_parts"],
              fwd_p["whh"], bwd_p["whh"], fwd_p["bias"], bwd_p["bias"]):
        in_specs.append(_const_spec(w))
        args.append(w)
    if pool:
        for w in (fc["w"], fc["b"]):
            in_specs.append(_const_spec(w))
            args.append(w)

    scratch = [pltpu.VMEM((B, H), jnp.float32) for _ in range(4)]        # h/c
    scratch += [pltpu.VMEM((chunk, B, 4 * H), jnp.float32) for _ in range(2)]  # gin
    if pool:
        scratch += [pltpu.VMEM((B, H), jnp.float32) for _ in range(2)]   # mean acc
        O = fc["w"].shape[-1]
        out_shape = jax.ShapeDtypeStruct((B, O), jnp.float32)
        out_specs = pl.BlockSpec((B, O), lambda c: (0, 0))
    else:
        out_shape = [jax.ShapeDtypeStruct((T, B, H), jnp.float32),
                     jax.ShapeDtypeStruct((T, B, H), jnp.float32)]
        out_specs = [pl.BlockSpec((chunk, B, H), lambda c: (c, 0, 0)),
                     pl.BlockSpec((chunk, B, H),
                                  lambda c: (nchunks - 1 - c, 0, 0))]

    kernel = functools.partial(_bilstm_kernel, chunk=chunk, n_in=n_in,
                               pool=pool, h_dim=H,
                               inv_t=inv_t if pool else None)

    # TODO(synk): on v7x (2 TensorCores) split fwd/bwd across cores with a
    # leading "parallel" direction axis for ~2x on the serial recurrence; the
    # fused single-core form below is the right choice on v5e/v6e (1 TC).
    return pl.pallas_call(
        kernel,
        out_shape=out_shape,
        grid_spec=pltpu.PrefetchScalarGridSpec(
            num_scalar_prefetch=0,
            grid=(nchunks,),
            in_specs=in_specs,
            out_specs=out_specs,
            scratch_shapes=scratch,
        ),
        compiler_params=pltpu.CompilerParams(
            dimension_semantics=("arbitrary",),     # recurrence is sequential
            vmem_limit_bytes=_VMEM_LIMIT_BYTES),
    )(*args)


# ----------------------------------------------------------------------------
# Model parameters (kernel-ready: gate-packed, pre-transposed, bias-combined).
# ----------------------------------------------------------------------------
def init_params(key, input_dim, hidden_dim, output_dim, num_layers):
    """PyTorch-style uniform(-1/sqrt(H), 1/sqrt(H)) init."""
    H = hidden_dim
    bound = 1.0 / np.sqrt(H)
    params = {"lstm": [], "fc": None}
    for layer in range(num_layers):
        d_in = input_dim if layer == 0 else 2 * H
        dirs = []
        for _direction in range(2):               # forward, reverse
            key, k1, k2, k3, k4 = jax.random.split(key, 5)
            w_ih = jax.random.uniform(k1, (4 * H, d_in), jnp.float32, -bound, bound)
            w_hh = jax.random.uniform(k2, (4 * H, H), jnp.float32, -bound, bound)
            b_ih = jax.random.uniform(k3, (4 * H,), jnp.float32, -bound, bound)
            b_hh = jax.random.uniform(k4, (4 * H,), jnp.float32, -bound, bound)
            wih = w_ih.T                                        # (d_in, 4H) packed [i|f|g|o]
            wih_parts = (wih,) if layer == 0 else (wih[:H], wih[H:])
            dirs.append({
                "wih_parts": wih_parts,
                "whh": w_hh.T,                                  # (H, 4H)
                "bias": (b_ih + b_hh).reshape(1, 4 * H),
            })
        params["lstm"].append(dirs)
    key, k1, k2 = jax.random.split(key, 3)
    fc_bound = 1.0 / np.sqrt(2 * H)
    w_fc = jax.random.uniform(k1, (output_dim, 2 * H), jnp.float32, -fc_bound, fc_bound)
    b_fc = jax.random.uniform(k2, (output_dim,), jnp.float32, -fc_bound, fc_bound)
    params["fc"] = {
        "w": jnp.stack([w_fc[:, :H].T, w_fc[:, H:].T], axis=0),  # (2, H, O)
        "b": b_fc.reshape(1, output_dim),
    }
    return params


def lstm_model_forward(params, x):
    """x: (B, T, input_dim) batch_first, as in the PyTorch module.
    Returns (B, output_dim).  Dropout between layers is an inference no-op."""
    B, T = x.shape[0], x.shape[1]
    x_tm = jnp.transpose(x, (1, 0, 2)).astype(jnp.float32)   # time-major (T, B, D)
    Bp = ((B + 7) // 8) * 8          # sublane-align the batch (review opt #10)
    if Bp != B:
        x_tm = jnp.pad(x_tm, ((0, 0), (0, Bp - B), (0, 0)))

    n_layers = len(params["lstm"])
    layer_in = (x_tm,)
    out = None
    for li, (fwd_p, bwd_p) in enumerate(params["lstm"]):
        if li == n_layers - 1:
            out = bilstm_layer(layer_in, fwd_p, bwd_p, pool=True,
                               fc=params["fc"], inv_t=1.0 / T)
        else:
            seq_f, seq_b = bilstm_layer(layer_in, fwd_p, bwd_p, pool=False)
            layer_in = (seq_f, seq_b)
    return out[:B]


# ----------------------------------------------------------------------------
# Pure-JAX reference (correctness check against the same parameters).
# ----------------------------------------------------------------------------
def _ref_direction(x_tm, p):
    T, B, _ = x_tm.shape
    H = p["whh"].shape[0]
    wih = jnp.concatenate(p["wih_parts"], axis=0)
    h = jnp.zeros((B, H), jnp.float32)
    c = jnp.zeros((B, H), jnp.float32)
    outs = []
    for t in range(T):
        g = x_tm[t] @ wih + h @ p["whh"] + p["bias"][0]
        gi = jax.nn.sigmoid(g[:, :H])
        gf = jax.nn.sigmoid(g[:, H:2 * H])
        gg = jnp.tanh(g[:, 2 * H:3 * H])
        go = jax.nn.sigmoid(g[:, 3 * H:])
        c = gf * c + gi * gg
        h = go * jnp.tanh(c)
        outs.append(h)
    return jnp.stack(outs)


def reference_forward(params, x):
    y = jnp.transpose(x, (1, 0, 2)).astype(jnp.float32)
    for fwd_p, bwd_p in params["lstm"]:
        out_f = _ref_direction(y, fwd_p)
        out_b = jnp.flip(_ref_direction(jnp.flip(y, axis=0), bwd_p), axis=0)
        y = jnp.concatenate([out_f, out_b], axis=-1)
    m = jnp.mean(y, axis=0)
    H = m.shape[-1] // 2
    return (m[:, :H] @ params["fc"]["w"][0]
            + m[:, H:] @ params["fc"]["w"][1] + params["fc"]["b"][0])


if __name__ == "__main__":
    # Small shapes consistent with the module's forward.
    B, T = 2, 8
    input_dim, hidden_dim, output_dim = 16, 32, 4
    num_layers, dropout_prob = 2, 0.1   # dropout inactive at inference

    key = jax.random.PRNGKey(0)
    key, pkey, xkey = jax.random.split(key, 3)
    params = init_params(pkey, input_dim, hidden_dim, output_dim, num_layers)
    x = jax.random.normal(xkey, (B, T, input_dim), jnp.float32)

    fwd = jax.jit(lstm_model_forward)
    out = jax.block_until_ready(fwd(params, x))
    assert out.shape == (B, output_dim)

    ref = jax.block_until_ready(reference_forward(params, x))
    np.testing.assert_allclose(np.asarray(out), np.asarray(ref),
                               rtol=1e-4, atol=1e-4)
    print("KERNEL_OK")
</pallas_src>

<mosaic_0001>
module attributes {stable_mosaic.version = 11 : i64} {
  func.func @_bilstm_kernel(%arg0: i32, %arg1: memref<8x8x16xf32, #tpu.memory_space<vmem>>, %arg2: memref<8x8x16xf32, #tpu.memory_space<vmem>>, %arg3: memref<16x128xf32, #tpu.memory_space<vmem>>, %arg4: memref<16x128xf32, #tpu.memory_space<vmem>>, %arg5: memref<32x128xf32, #tpu.memory_space<vmem>>, %arg6: memref<32x128xf32, #tpu.memory_space<vmem>>, %arg7: memref<1x128xf32, #tpu.memory_space<vmem>>, %arg8: memref<1x128xf32, #tpu.memory_space<vmem>>, %arg9: memref<8x8x32xf32, #tpu.memory_space<vmem>>, %arg10: memref<8x8x32xf32, #tpu.memory_space<vmem>>, %arg11: memref<8x32xf32, #tpu.memory_space<vmem>>, %arg12: memref<8x32xf32, #tpu.memory_space<vmem>>, %arg13: memref<8x32xf32, #tpu.memory_space<vmem>>, %arg14: memref<8x32xf32, #tpu.memory_space<vmem>>, %arg15: memref<8x8x128xf32, #tpu.memory_space<vmem>>, %arg16: memref<8x8x128xf32, #tpu.memory_space<vmem>>) attributes {dimension_semantics = [#tpu.dimension_semantics<arbitrary>], iteration_bounds = array<i64: 1>, scalar_prefetch = 0 : i64, scratch_operands = 6 : i64, tpu.core_type = #tpu.core_type<tc>, window_params = [{transform_indices = @transform_0, window_bounds = array<i64: 8, 8, 16>}, {transform_indices = @transform_1, window_bounds = array<i64: 8, 8, 16>}, {pipeline_mode = #tpu.pipeline_mode<synchronous>, transform_indices = @transform_2, window_bounds = array<i64: 16, 128>}, {pipeline_mode = #tpu.pipeline_mode<synchronous>, transform_indices = @transform_3, window_bounds = array<i64: 16, 128>}, {pipeline_mode = #tpu.pipeline_mode<synchronous>, transform_indices = @transform_4, window_bounds = array<i64: 32, 128>}, {pipeline_mode = #tpu.pipeline_mode<synchronous>, transform_indices = @transform_5, window_bounds = array<i64: 32, 128>}, {pipeline_mode = #tpu.pipeline_mode<synchronous>, transform_indices = @transform_6, window_bounds = array<i64: 1, 128>}, {pipeline_mode = #tpu.pipeline_mode<synchronous>, transform_indices = @transform_7, window_bounds = array<i64: 1, 128>}, {transform_indices = @transform_8, window_bounds = array<i64: 8, 8, 32>}, {transform_indices = @transform_9, window_bounds = array<i64: 8, 8, 32>}]} {
    %c0_i32 = arith.constant 0 : i32
    %0 = arith.cmpi eq, %arg0, %c0_i32 : i32
    %1 = arith.extui %0 : i1 to i32
    %c0_i32_0 = arith.constant 0 : i32
    %2 = arith.cmpi ne, %1, %c0_i32_0 : i32
    scf.if %2 {
      %cst_178 = arith.constant 0.000000e+00 : f32
      %583 = vector.broadcast %cst_178 : f32 to vector<8x32xf32>
      %c0_179 = arith.constant 0 : index
      %c0_180 = arith.constant 0 : index
      %584 = vector.load %arg11[%c0_179, %c0_180] : memref<8x32xf32, #tpu.memory_space<vmem>>, vector<8x32xf32>
      tpu.vector_store %arg11[%c0_179, %c0_180], %583 {strides = array<i32>} : memref<8x32xf32, #tpu.memory_space<vmem>>, vector<8x32xf32>,
      %cst_181 = arith.constant 0.000000e+00 : f32
      %585 = vector.broadcast %cst_181 : f32 to vector<8x32xf32>
      %c0_182 = arith.constant 0 : index
      %c0_183 = arith.constant 0 : index
      %586 = vector.load %arg12[%c0_182, %c0_183] : memref<8x32xf32, #tpu.memory_space<vmem>>, vector<8x32xf32>
      tpu.vector_store %arg12[%c0_182, %c0_183], %585 {strides = array<i32>} : memref<8x32xf32, #tpu.memory_space<vmem>>, vector<8x32xf32>,
      %cst_184 = arith.constant 0.000000e+00 : f32
      %587 = vector.broadcast %cst_184 : f32 to vector<8x32xf32>
      %c0_185 = arith.constant 0 : index
      %c0_186 = arith.constant 0 : index
      %588 = vector.load %arg13[%c0_185, %c0_186] : memref<8x32xf32, #tpu.memory_space<vmem>>, vector<8x32xf32>
      tpu.vector_store %arg13[%c0_185, %c0_186], %587 {strides = array<i32>} : memref<8x32xf32, #tpu.memory_space<vmem>>, vector<8x32xf32>,
      %cst_187 = arith.constant 0.000000e+00 : f32
      %589 = vector.broadcast %cst_187 : f32 to vector<8x32xf32>
      %c0_188 = arith.constant 0 : index
      %c0_189 = arith.constant 0 : index
      %590 = vector.load %arg14[%c0_188, %c0_189] : memref<8x32xf32, #tpu.memory_space<vmem>>, vector<8x32xf32>
      tpu.vector_store %arg14[%c0_188, %c0_189], %589 {strides = array<i32>} : memref<8x32xf32, #tpu.memory_space<vmem>>, vector<8x32xf32>,
    } else {
    }
    %c0 = arith.constant 0 : index
    %c0_1 = arith.constant 0 : index
    %c0_2 = arith.constant 0 : index
    %3 = vector.load %arg1[%c0, %c0_1, %c0_2] : memref<8x8x16xf32, #tpu.memory_space<vmem>>, vector<8x8x16xf32>
    %4 = vector.shape_cast %3 : vector<8x8x16xf32> to vector<64x16xf32>
    %c0_3 = arith.constant 0 : index
    %c0_4 = arith.constant 0 : index
    %5 = vector.load %arg3[%c0_3, %c0_4] : memref<16x128xf32, #tpu.memory_space<vmem>>, vector<16x128xf32>
    %cst = arith.constant dense<0.000000e+00> : vector<64x128xf32>
    %6 = tpu.matmul %4, %5, %cst {dimension_numbers = #tpu.dot_dimension_numbers<[1], [0], [0], [1], [0, 0, 1, 1], [], []>} : vector<64x16xf32>, vector<16x128xf32>, vector<64x128xf32> -> vector<64x128xf32>
    %c0_5 = arith.constant 0 : index
    %c0_6 = arith.constant 0 : index
    %7 = vector.load %arg7[%c0_5, %c0_6] : memref<1x128xf32, #tpu.memory_space<vmem>>, vector<1x128xf32>
    %8 = vector.broadcast %7 : vector<1x128xf32> to vector<64x128xf32>
    %9 = arith.addf %6, %8 : vector<64x128xf32>
    %10 = vector.shape_cast %9 : vector<64x128xf32> to vector<8x8x128xf32>
    %c0_7 = arith.constant 0 : index
    %c0_8 = arith.constant 0 : index
    %c0_9 = arith.constant 0 : index
    %11 = vector.load %arg15[%c0_7, %c0_8, %c0_9] : memref<8x8x128xf32, #tpu.memory_space<vmem>>, vector<8x8x128xf32>
    tpu.vector_store %arg15[%c0_7, %c0_8, %c0_9], %10 {strides = array<i32>} : memref<8x8x128xf32, #tpu.memory_space<vmem>>, vector<8x8x128xf32>,
    %c0_10 = arith.constant 0 : index
    %c0_11 = arith.constant 0 : index
    %c0_12 = arith.constant 0 : index
    %12 = vector.load %arg2[%c0_10, %c0_11, %c0_12] : memref<8x8x16xf32, #tpu.memory_space<vmem>>, vector<8x8x16xf32>
    %13 = vector.shape_cast %12 : vector<8x8x16xf32> to vector<64x16xf32>
    %c0_13 = arith.constant 0 : index
    %c0_14 = arith.constant 0 : index
    %14 = vector.load %arg4[%c0_13, %c0_14] : memref<16x128xf32, #tpu.memory_space<vmem>>, vector<16x128xf32>
    %cst_15 = arith.constant dense<0.000000e+00> : vector<64x128xf32>
    %15 = tpu.matmul %13, %14, %cst_15 {dimension_numbers = #tpu.dot_dimension_numbers<[1], [0], [0], [1], [0, 0, 1, 1], [], []>} : vector<64x16xf32>, vector<16x128xf32>, vector<64x128xf32> -> vector<64x128xf32>
    %c0_16 = arith.constant 0 : index
    %c0_17 = arith.constant 0 : index
    %16 = vector.load %arg8[%c0_16, %c0_17] : memref<1x128xf32, #tpu.memory_space<vmem>>, vector<1x128xf32>
    %17 = vector.broadcast %16 : vector<1x128xf32> to vector<64x128xf32>
    %18 = arith.addf %15, %17 : vector<64x128xf32>
    %19 = vector.shape_cast %18 : vector<64x128xf32> to vector<8x8x128xf32>
    %c0_18 = arith.constant 0 : index
    %c0_19 = arith.constant 0 : index
    %c0_20 = arith.constant 0 : index
    %20 = vector.load %arg16[%c0_18, %c0_19, %c0_20] : memref<8x8x128xf32, #tpu.memory_space<vmem>>, vector<8x8x128xf32>
    tpu.vector_store %arg16[%c0_18, %c0_19, %c0_20], %19 {strides = array<i32>} : memref<8x8x128xf32, #tpu.memory_space<vmem>>, vector<8x8x128xf32>,
    %c0_21 = arith.constant 0 : index
    %c0_22 = arith.constant 0 : index
    %21 = vector.load %arg5[%c0_21, %c0_22] : memref<32x128xf32, #tpu.memory_space<vmem>>, vector<32x128xf32>
    %c0_23 = arith.constant 0 : index
    %c0_24 = arith.constant 0 : index
    %22 = vector.load %arg6[%c0_23, %c0_24] : memref<32x128xf32, #tpu.memory_space<vmem>>, vector<32x128xf32>
    %c0_25 = arith.constant 0 : index
    %c0_26 = arith.constant 0 : index
    %23 = vector.load %arg11[%c0_25, %c0_26] : memref<8x32xf32, #tpu.memory_space<vmem>>, vector<8x32xf32>
    %c0_27 = arith.constant 0 : index
    %c0_28 = arith.constant 0 : index
    %24 = vector.load %arg12[%c0_27, %c0_28] : memref<8x32xf32, #tpu.memory_space<vmem>>, vector<8x32xf32>
    %c0_29 = arith.constant 0 : index
    %c0_30 = arith.constant 0 : index
    %25 = vector.load %arg13[%c0_29, %c0_30] : memref<8x32xf32, #tpu.memory_space<vmem>>, vector<8x32xf32>
    %c0_31 = arith.constant 0 : index
    %c0_32 = arith.constant 0 : index
    %26 = vector.load %arg14[%c0_31, %c0_32] : memref<8x32xf32, #tpu.memory_space<vmem>>, vector<8x32xf32>
    %c0_i32_33 = arith.constant 0 : i32
    %27 = arith.index_cast %c0_i32_33 : i32 to index
    %c0_34 = arith.constant 0 : index
    %c0_35 = arith.constant 0 : index
    %28 = vector.load %arg15[%27, %c0_34, %c0_35] : memref<8x8x128xf32, #tpu.memory_space<vmem>>, vector<1x8x128xf32>
    %29 = vector.shape_cast %28 : vector<1x8x128xf32> to vector<8x128xf32>
    %cst_36 = arith.constant dense<0.000000e+00> : vector<8x128xf32>
    %30 = tpu.matmul %23, %21, %cst_36 {dimension_numbers = #tpu.dot_dimension_numbers<[1], [0], [0], [1], [0, 0, 1, 1], [], []>} : vector<8x32xf32>, vector<32x128xf32>, vector<8x128xf32> -> vector<8x128xf32>
    %31 = arith.addf %29, %30 : vector<8x128xf32>
    %32 = vector.extract_strided_slice %31 {offsets = [0, 0], sizes = [8, 32], strides = [1, 1]} : vector<8x128xf32> to vector<8x32xf32>
    %33 = arith.negf %32 : vector<8x32xf32>
    %34 = math.exp %33 : vector<8x32xf32>
    %cst_37 = arith.constant 1.000000e+00 : f32
    %35 = vector.broadcast %cst_37 : f32 to vector<8x32xf32>
    %36 = arith.addf %35, %34 : vector<8x32xf32>
    %37 = arith.divf %35, %36 : vector<8x32xf32>
    %38 = vector.extract_strided_slice %31 {offsets = [0, 32], sizes = [8, 32], strides = [1, 1]} : vector<8x128xf32> to vector<8x32xf32>
    %39 = arith.negf %38 : vector<8x32xf32>
    %40 = math.exp %39 : vector<8x32xf32>
    %cst_38 = arith.constant 1.000000e+00 : f32
    %41 = vector.broadcast %cst_38 : f32 to vector<8x32xf32>
    %42 = arith.addf %41, %40 : vector<8x32xf32>
    %43 = arith.divf %41, %42 : vector<8x32xf32>
    %44 = vector.extract_strided_slice %31 {offsets = [0, 64], sizes = [8, 32], strides = [1, 1]} : vector<8x128xf32> to vector<8x32xf32>
    %45 = math.tanh %44 : vector<8x32xf32>
    %46 = vector.extract_strided_slice %31 {offsets = [0, 96], sizes = [8, 32], strides = [1, 1]} : vector<8x128xf32> to vector<8x32xf32>
    %47 = arith.negf %46 : vector<8x32xf32>
    %48 = math.exp %47 : vector<8x32xf32>
    %cst_39 = arith.constant 1.000000e+00 : f32
    %49 = vector.broadcast %cst_39 : f32 to vector<8x32xf32>
    %50 = arith.addf %49, %48 : vector<8x32xf32>
    %51 = arith.divf %49, %50 : vector<8x32xf32>
    %52 = arith.mulf %43, %24 : vector<8x32xf32>
    %53 = arith.mulf %37, %45 : vector<8x32xf32>
    %54 = arith.addf %52, %53 : vector<8x32xf32>
    %55 = math.tanh %54 : vector<8x32xf32>
    %56 = arith.mulf %51, %55 : vector<8x32xf32>
    %c7_i32 = arith.constant 7 : i32
    %57 = arith.subi %c7_i32, %c0_i32_33 : i32
    %58 = arith.index_cast %57 : i32 to index
    %c0_40 = arith.constant 0 : index
    %c0_41 = arith.constant 0 : index
    %59 = vector.load %arg16[%58, %c0_40, %c0_41] : memref<8x8x128xf32, #tpu.memory_space<vmem>>, vector<1x8x128xf32>
    %60 = vector.shape_cast %59 : vector<1x8x128xf32> to vector<8x128xf32>
    %cst_42 = arith.constant dense<0.000000e+00> : vector<8x128xf32>
    %61 = tpu.matmul %25, %22, %cst_42 {dimension_numbers = #tpu.dot_dimension_numbers<[1], [0], [0], [1], [0, 0, 1, 1], [], []>} : vector<8x32xf32>, vector<32x128xf32>, vector<8x128xf32> -> vector<8x128xf32>
    %62 = arith.addf %60, %61 : vector<8x128xf32>
    %63 = vector.extract_strided_slice %62 {offsets = [0, 0], sizes = [8, 32], strides = [1, 1]} : vector<8x128xf32> to vector<8x32xf32>
    %64 = arith.negf %63 : vector<8x32xf32>
    %65 = math.exp %64 : vector<8x32xf32>
    %cst_43 = arith.constant 1.000000e+00 : f32
    %66 = vector.broadcast %cst_43 : f32 to vector<8x32xf32>
    %67 = arith.addf %66, %65 : vector<8x32xf32>
    %68 = arith.divf %66, %67 : vector<8x32xf32>
    %69 = vector.extract_strided_slice %62 {offsets = [0, 32], sizes = [8, 32], strides = [1, 1]} : vector<8x128xf32> to vector<8x32xf32>
    %70 = arith.negf %69 : vector<8x32xf32>
    %71 = math.exp %70 : vector<8x32xf32>
    %cst_44 = arith.constant 1.000000e+00 : f32
    %72 = vector.broadcast %cst_44 : f32 to vector<8x32xf32>
    %73 = arith.addf %72, %71 : vector<8x32xf32>
    %74 = arith.divf %72, %73 : vector<8x32xf32>
    %75 = vector.extract_strided_slice %62 {offsets = [0, 64], sizes = [8, 32], strides = [1, 1]} : vector<8x128xf32> to vector<8x32xf32>
    %76 = math.tanh %75 : vector<8x32xf32>
    %77 = vector.extract_strided_slice %62 {offsets = [0, 96], sizes = [8, 32], strides = [1, 1]} : vector<8x128xf32> to vector<8x32xf32>
    %78 = arith.negf %77 : vector<8x32xf32>
    %79 = math.exp %78 : vector<8x32xf32>
    %cst_45 = arith.constant 1.000000e+00 : f32
    %80 = vector.broadcast %cst_45 : f32 to vector<8x32xf32>
    %81 = arith.addf %80, %79 : vector<8x32xf32>
    %82 = arith.divf %80, %81 : vector<8x32xf32>
    %83 = arith.mulf %74, %26 : vector<8x32xf32>
    %84 = arith.mulf %68, %76 : vector<8x32xf32>
    %85 = arith.addf %83, %84 : vector<8x32xf32>
    %86 = math.tanh %85 : vector<8x32xf32>
    %87 = arith.mulf %82, %86 : vector<8x32xf32>
    %88 = arith.index_cast %c0_i32_33 : i32 to index
    %c0_46 = arith.constant 0 : index
    %c0_47 = arith.constant 0 : index
    %89 = vector.load %arg9[%88, %c0_46, %c0_47] : memref<8x8x32xf32, #tpu.memory_space<vmem>>, vector<1x8x32xf32>
    %90 = vector.shape_cast %89 : vector<1x8x32xf32> to vector<8x32xf32>
    %91 = vector.shape_cast %56 : vector<8x32xf32> to vector<1x8x32xf32>
    tpu.vector_store %arg9[%88, %c0_46, %c0_47], %91 {strides = array<i32>} : memref<8x8x32xf32, #tpu.memory_space<vmem>>, vector<1x8x32xf32>,
    %92 = arith.index_cast %57 : i32 to index
    %c0_48 = arith.constant 0 : index
    %c0_49 = arith.constant 0 : index
    %93 = vector.load %arg10[%92, %c0_48, %c0_49] : memref<8x8x32xf32, #tpu.memory_space<vmem>>, vector<1x8x32xf32>
    %94 = vector.shape_cast %93 : vector<1x8x32xf32> to vector<8x32xf32>
    %95 = vector.shape_cast %87 : vector<8x32xf32> to vector<1x8x32xf32>
    tpu.vector_store %arg10[%92, %c0_48, %c0_49], %95 {strides = array<i32>} : memref<8x8x32xf32, #tpu.memory_space<vmem>>, vector<1x8x32xf32>,
    %c1_i32 = arith.constant 1 : i32
    %96 = arith.index_cast %c1_i32 : i32 to index
    %c0_50 = arith.constant 0 : index
    %c0_51 = arith.constant 0 : index
    %97 = vector.load %arg15[%96, %c0_50, %c0_51] : memref<8x8x128xf32, #tpu.memory_space<vmem>>, vector<1x8x128xf32>
    %98 = vector.shape_cast %97 : vector<1x8x128xf32> to vector<8x128xf32>
    %cst_52 = arith.constant dense<0.000000e+00> : vector<8x128xf32>
    %99 = tpu.matmul %56, %21, %cst_52 {dimension_numbers = #tpu.dot_dimension_numbers<[1], [0], [0], [1], [0, 0, 1, 1], [], []>} : vector<8x32xf32>, vector<32x128xf32>, vector<8x128xf32> -> vector<8x128xf32>
    %100 = arith.addf %98, %99 : vector<8x128xf32>
    %101 = vector.extract_strided_slice %100 {offsets = [0, 0], sizes = [8, 32], strides = [1, 1]} : vector<8x128xf32> to vector<8x32xf32>
    %102 = arith.negf %101 : vector<8x32xf32>
    %103 = math.exp %102 : vector<8x32xf32>
    %cst_53 = arith.constant 1.000000e+00 : f32
    %104 = vector.broadcast %cst_53 : f32 to vector<8x32xf32>
    %105 = arith.addf %104, %103 : vector<8x32xf32>
    %106 = arith.divf %104, %105 : vector<8x32xf32>
    %107 = vector.extract_strided_slice %100 {offsets = [0, 32], sizes = [8, 32], strides = [1, 1]} : vector<8x128xf32> to vector<8x32xf32>
    %108 = arith.negf %107 : vector<8x32xf32>
    %109 = math.exp %108 : vector<8x32xf32>
    %cst_54 = arith.constant 1.000000e+00 : f32
    %110 = vector.broadcast %cst_54 : f32 to vector<8x32xf32>
    %111 = arith.addf %110, %109 : vector<8x32xf32>
    %112 = arith.divf %110, %111 : vector<8x32xf32>
    %113 = vector.extract_strided_slice %100 {offsets = [0, 64], sizes = [8, 32], strides = [1, 1]} : vector<8x128xf32> to vector<8x32xf32>
    %114 = math.tanh %113 : vector<8x32xf32>
    %115 = vector.extract_strided_slice %100 {offsets = [0, 96], sizes = [8, 32], strides = [1, 1]} : vector<8x128xf32> to vector<8x32xf32>
    %116 = arith.negf %115 : vector<8x32xf32>
    %117 = math.exp %116 : vector<8x32xf32>
    %cst_55 = arith.constant 1.000000e+00 : f32
    %118 = vector.broadcast %cst_55 : f32 to vector<8x32xf32>
    %119 = arith.addf %118, %117 : vector<8x32xf32>
    %120 = arith.divf %118, %119 : vector<8x32xf32>
    %121 = arith.mulf %112, %54 : vector<8x32xf32>
    %122 = arith.mulf %106, %114 : vector<8x32xf32>
    %123 = arith.addf %121, %122 : vector<8x32xf32>
    %124 = math.tanh %123 : vector<8x32xf32>
    %125 = arith.mulf %120, %124 : vector<8x32xf32>
    %c7_i32_56 = arith.constant 7 : i32
    %126 = arith.subi %c7_i32_56, %c1_i32 : i32
    %127 = arith.index_cast %126 : i32 to index
    %c0_57 = arith.constant 0 : index
    %c0_58 = arith.constant 0 : index
    %128 = vector.load %arg16[%127, %c0_57, %c0_58] : memref<8x8x128xf32, #tpu.memory_space<vmem>>, vector<1x8x128xf32>
    %129 = vector.shape_cast %128 : vector<1x8x128xf32> to vector<8x128xf32>
    %cst_59 = arith.constant dense<0.000000e+00> : vector<8x128xf32>
    %130 = tpu.matmul %87, %22, %cst_59 {dimension_numbers = #tpu.dot_dimension_numbers<[1], [0], [0], [1], [0, 0, 1, 1], [], []>} : vector<8x32xf32>, vector<32x128xf32>, vector<8x128xf32> -> vector<8x128xf32>
    %131 = arith.addf %129, %130 : vector<8x128xf32>
    %132 = vector.extract_strided_slice %131 {offsets = [0, 0], sizes = [8, 32], strides = [1, 1]} : vector<8x128xf32> to vector<8x32xf32>
    %133 = arith.negf %132 : vector<8x32xf32>
    %134 = math.exp %133 : vector<8x32xf32>
    %cst_60 = arith.constant 1.000000e+00 : f32
    %135 = vector.broadcast %cst_60 : f32 to vector<8x32xf32>
    %136 = arith.addf %135, %134 : vector<8x32xf32>
    %137 = arith.divf %135, %136 : vector<8x32xf32>
    %138 = vector.extract_strided_slice %131 {offsets = [0, 32], sizes = [8, 32], strides = [1, 1]} : vector<8x128xf32> to vector<8x32xf32>
    %139 = arith.negf %138 : vector<8x32xf32>
    %140 = math.exp %139 : vector<8x32xf32>
    %cst_61 = arith.constant 1.000000e+00 : f32
    %141 = vector.broadcast %cst_61 : f32 to vector<8x32xf32>
    %142 = arith.addf %141, %140 : vector<8x32xf32>
    %143 = arith.divf %141, %142 : vector<8x32xf32>
    %144 = vector.extract_strided_slice %131 {offsets = [0, 64], sizes = [8, 32], strides = [1, 1]} : vector<8x128xf32> to vector<8x32xf32>
    %145 = math.tanh %144 : vector<8x32xf32>
    %146 = vector.extract_strided_slice %131 {offsets = [0, 96], sizes = [8, 32], strides = [1, 1]} : vector<8x128xf32> to vector<8x32xf32>
    %147 = arith.negf %146 : vector<8x32xf32>
    %148 = math.exp %147 : vector<8x32xf32>
    %cst_62 = arith.constant 1.000000e+00 : f32
    %149 = vector.broadcast %cst_62 : f32 to vector<8x32xf32>
    %150 = arith.addf %149, %148 : vector<8x32xf32>
    %151 = arith.divf %149, %150 : vector<8x32xf32>
    %152 = arith.mulf %143, %85 : vector<8x32xf32>
    %153 = arith.mulf %137, %145 : vector<8x32xf32>
    %154 = arith.addf %152, %153 : vector<8x32xf32>
    %155 = math.tanh %154 : vector<8x32xf32>
    %156 = arith.mulf %151, %155 : vector<8x32xf32>
    %157 = arith.index_cast %c1_i32 : i32 to index
    %c0_63 = arith.constant 0 : index
    %c0_64 = arith.constant 0 : index
    %158 = vector.load %arg9[%157, %c0_63, %c0_64] : memref<8x8x32xf32, #tpu.memory_space<vmem>>, vector<1x8x32xf32>
    %159 = vector.shape_cast %158 : vector<1x8x32xf32> to vector<8x32xf32>
    %160 = vector.shape_cast %125 : vector<8x32xf32> to vector<1x8x32xf32>
    tpu.vector_store %arg9[%157, %c0_63, %c0_64], %160 {strides = array<i32>} : memref<8x8x32xf32, #tpu.memory_space<vmem>>, vector<1x8x32xf32>,
    %161 = arith.index_cast %126 : i32 to index
    %c0_65 = arith.constant 0 : index
    %c0_66 = arith.constant 0 : index
    %162 = vector.load %arg10[%161, %c0_65, %c0_66] : memref<8x8x32xf32, #tpu.memory_space<vmem>>, vector<1x8x32xf32>
    %163 = vector.shape_cast %162 : vector<1x8x32xf32> to vector<8x32xf32>
    %164 = vector.shape_cast %156 : vector<8x32xf32> to vector<1x8x32xf32>
    tpu.vector_store %arg10[%161, %c0_65, %c0_66], %164 {strides = array<i32>} : memref<8x8x32xf32, #tpu.memory_space<vmem>>, vector<1x8x32xf32>,
    %c2_i32 = arith.constant 2 : i32
    %165 = arith.index_cast %c2_i32 : i32 to index
    %c0_67 = arith.constant 0 : index
    %c0_68 = arith.constant 0 : index
    %166 = vector.load %arg15[%165, %c0_67, %c0_68] : memref<8x8x128xf32, #tpu.memory_space<vmem>>, vector<1x8x128xf32>
    %167 = vector.shape_cast %166 : vector<1x8x128xf32> to vector<8x128xf32>
    %cst_69 = arith.constant dense<0.000000e+00> : vector<8x128xf32>
    %168 = tpu.matmul %125, %21, %cst_69 {dimension_numbers = #tpu.dot_dimension_numbers<[1], [0], [0], [1], [0, 0, 1, 1], [], []>} : vector<8x32xf32>, vector<32x128xf32>, vector<8x128xf32> -> vector<8x128xf32>
    %169 = arith.addf %167, %168 : vector<8x128xf32>
    %170 = vector.extract_strided_slice %169 {offsets = [0, 0], sizes = [8, 32], strides = [1, 1]} : vector<8x128xf32> to vector<8x32xf32>
    %171 = arith.negf %170 : vector<8x32xf32>
    %172 = math.exp %171 : vector<8x32xf32>
    %cst_70 = arith.constant 1.000000e+00 : f32
    %173 = vector.broadcast %cst_70 : f32 to vector<8x32xf32>
    %174 = arith.addf %173, %172 : vector<8x32xf32>
    %175 = arith.divf %173, %174 : vector<8x32xf32>
    %176 = vector.extract_strided_slice %169 {offsets = [0, 32], sizes = [8, 32], strides = [1, 1]} : vector<8x128xf32> to vector<8x32xf32>
    %177 = arith.negf %176 : vector<8x32xf32>
    %178 = math.exp %177 : vector<8x32xf32>
    %cst_71 = arith.constant 1.000000e+00 : f32
    %179 = vector.broadcast %cst_71 : f32 to vector<8x32xf32>
    %180 = arith.addf %179, %178 : vector<8x32xf32>
    %181 = arith.divf %179, %180 : vector<8x32xf32>
    %182 = vector.extract_strided_slice %169 {offsets = [0, 64], sizes = [8, 32], strides = [1, 1]} : vector<8x128xf32> to vector<8x32xf32>
    %183 = math.tanh %182 : vector<8x32xf32>
    %184 = vector.extract_strided_slice %169 {offsets = [0, 96], sizes = [8, 32], strides = [1, 1]} : vector<8x128xf32> to vector<8x32xf32>
    %185 = arith.negf %184 : vector<8x32xf32>
    %186 = math.exp %185 : vector<8x32xf32>
    %cst_72 = arith.constant 1.000000e+00 : f32
    %187 = vector.broadcast %cst_72 : f32 to vector<8x32xf32>
    %188 = arith.addf %187, %186 : vector<8x32xf32>
    %189 = arith.divf %187, %188 : vector<8x32xf32>
    %190 = arith.mulf %181, %123 : vector<8x32xf32>
    %191 = arith.mulf %175, %183 : vector<8x32xf32>
    %192 = arith.addf %190, %191 : vector<8x32xf32>
    %193 = math.tanh %192 : vector<8x32xf32>
    %194 = arith.mulf %189, %193 : vector<8x32xf32>
    %c7_i32_73 = arith.constant 7 : i32
    %195 = arith.subi %c7_i32_73, %c2_i32 : i32
    %196 = arith.index_cast %195 : i32 to index
    %c0_74 = arith.constant 0 : index
    %c0_75 = arith.constant 0 : index
    %197 = vector.load %arg16[%196, %c0_74, %c0_75] : memref<8x8x128xf32, #tpu.memory_space<vmem>>, vector<1x8x128xf32>
    %198 = vector.shape_cast %197 : vector<1x8x128xf32> to vector<8x128xf32>
    %cst_76 = arith.constant dense<0.000000e+00> : vector<8x128xf32>
    %199 = tpu.matmul %156, %22, %cst_76 {dimension_numbers = #tpu.dot_dimension_numbers<[1], [0], [0], [1], [0, 0, 1, 1], [], []>} : vector<8x32xf32>, vector<32x128xf32>, vector<8x128xf32> -> vector<8x128xf32>
    %200 = arith.addf %198, %199 : vector<8x128xf32>
    %201 = vector.extract_strided_slice %200 {offsets = [0, 0], sizes = [8, 32], strides = [1, 1]} : vector<8x128xf32> to vector<8x32xf32>
    %202 = arith.negf %201 : vector<8x32xf32>
    %203 = math.exp %202 : vector<8x32xf32>
    %cst_77 = arith.constant 1.000000e+00 : f32
    %204 = vector.broadcast %cst_77 : f32 to vector<8x32xf32>
    %205 = arith.addf %204, %203 : vector<8x32xf32>
    %206 = arith.divf %204, %205 : vector<8x32xf32>
    %207 = vector.extract_strided_slice %200 {offsets = [0, 32], sizes = [8, 32], strides = [1, 1]} : vector<8x128xf32> to vector<8x32xf32>
    %208 = arith.negf %207 : vector<8x32xf32>
    %209 = math.exp %208 : vector<8x32xf32>
    %cst_78 = arith.constant 1.000000e+00 : f32
    %210 = vector.broadcast %cst_78 : f32 to vector<8x32xf32>
    %211 = arith.addf %210, %209 : vector<8x32xf32>
    %212 = arith.divf %210, %211 : vector<8x32xf32>
    %213 = vector.extract_strided_slice %200 {offsets = [0, 64], sizes = [8, 32], strides = [1, 1]} : vector<8x128xf32> to vector<8x32xf32>
    %214 = math.tanh %213 : vector<8x32xf32>
    %215 = vector.extract_strided_slice %200 {offsets = [0, 96], sizes = [8, 32], strides = [1, 1]} : vector<8x128xf32> to vector<8x32xf32>
    %216 = arith.negf %215 : vector<8x32xf32>
    %217 = math.exp %216 : vector<8x32xf32>
    %cst_79 = arith.constant 1.000000e+00 : f32
    %218 = vector.broadcast %cst_79 : f32 to vector<8x32xf32>
    %219 = arith.addf %218, %217 : vector<8x32xf32>
    %220 = arith.divf %218, %219 : vector<8x32xf32>
    %221 = arith.mulf %212, %154 : vector<8x32xf32>
    %222 = arith.mulf %206, %214 : vector<8x32xf32>
    %223 = arith.addf %221, %222 : vector<8x32xf32>
    %224 = math.tanh %223 : vector<8x32xf32>
    %225 = arith.mulf %220, %224 : vector<8x32xf32>
    %226 = arith.index_cast %c2_i32 : i32 to index
    %c0_80 = arith.constant 0 : index
    %c0_81 = arith.constant 0 : index
    %227 = vector.load %arg9[%226, %c0_80, %c0_81] : memref<8x8x32xf32, #tpu.memory_space<vmem>>, vector<1x8x32xf32>
    %228 = vector.shape_cast %227 : vector<1x8x32xf32> to vector<8x32xf32>
    %229 = vector.shape_cast %194 : vector<8x32xf32> to vector<1x8x32xf32>
    tpu.vector_store %arg9[%226, %c0_80, %c0_81], %229 {strides = array<i32>} : memref<8x8x32xf32, #tpu.memory_space<vmem>>, vector<1x8x32xf32>,
    %230 = arith.index_cast %195 : i32 to index
    %c0_82 = arith.constant 0 : index
    %c0_83 = arith.constant 0 : index
    %231 = vector.load %arg10[%230, %c0_82, %c0_83] : memref<8x8x32xf32, #tpu.memory_space<vmem>>, vector<1x8x32xf32>
    %232 = vector.shape_cast %231 : vector<1x8x32xf32> to vector<8x32xf32>
    %233 = vector.shape_cast %225 : vector<8x32xf32> to vector<1x8x32xf32>
    tpu.vector_store %arg10[%230, %c0_82, %c0_83], %233 {strides = array<i32>} : memref<8x8x32xf32, #tpu.memory_space<vmem>>, vector<1x8x32xf32>,
    %c3_i32 = arith.constant 3 : i32
    %234 = arith.index_cast %c3_i32 : i32 to index
    %c0_84 = arith.constant 0 : index
    %c0_85 = arith.constant 0 : index
    %235 = vector.load %arg15[%234, %c0_84, %c0_85] : memref<8x8x128xf32, #tpu.memory_space<vmem>>, vector<1x8x128xf32>
    %236 = vector.shape_cast %235 : vector<1x8x128xf32> to vector<8x128xf32>
    %cst_86 = arith.constant dense<0.000000e+00> : vector<8x128xf32>
    %237 = tpu.matmul %194, %21, %cst_86 {dimension_numbers = #tpu.dot_dimension_numbers<[1], [0], [0], [1], [0, 0, 1, 1], [], []>} : vector<8x32xf32>, vector<32x128xf32>, vector<8x128xf32> -> vector<8x128xf32>
    %238 = arith.addf %236, %237 : vector<8x128xf32>
    %239 = vector.extract_strided_slice %238 {offsets = [0, 0], sizes = [8, 32], strides = [1, 1]} : vector<8x128xf32> to vector<8x32xf32>
    %240 = arith.negf %239 : vector<8x32xf32>
    %241 = math.exp %240 : vector<8x32xf32>
    %cst_87 = arith.constant 1.000000e+00 : f32
    %242 = vector.broadcast %cst_87 : f32 to vector<8x32xf32>
    %243 = arith.addf %242, %241 : vector<8x32xf32>
    %244 = arith.divf %242, %243 : vector<8x32xf32>
    %245 = vector.extract_strided_slice %238 {offsets = [0, 32], sizes = [8, 32], strides = [1, 1]} : vector<8x128xf32> to vector<8x32xf32>
    %246 = arith.negf %245 : vector<8x32xf32>
    %247 = math.exp %246 : vector<8x32xf32>
    %cst_88 = arith.constant 1.000000e+00 : f32
    %248 = vector.broadcast %cst_88 : f32 to vector<8x32xf32>
    %249 = arith.addf %248, %247 : vector<8x32xf32>
    %250 = arith.divf %248, %249 : vector<8x32xf32>
    %251 = vector.extract_strided_slice %238 {offsets = [0, 64], sizes = [8, 32], strides = [1, 1]} : vector<8x128xf32> to vector<8x32xf32>
    %252 = math.tanh %251 : vector<8x32xf32>
    %253 = vector.extract_strided_slice %238 {offsets = [0, 96], sizes = [8, 32], strides = [1, 1]} : vector<8x128xf32> to vector<8x32xf32>
    %254 = arith.negf %253 : vector<8x32xf32>
    %255 = math.exp %254 : vector<8x32xf32>
    %cst_89 = arith.constant 1.000000e+00 : f32
    %256 = vector.broadcast %cst_89 : f32 to vector<8x32xf32>
    %257 = arith.addf %256, %255 : vector<8x32xf32>
    %258 = arith.divf %256, %257 : vector<8x32xf32>
    %259 = arith.mulf %250, %192 : vector<8x32xf32>
    %260 = arith.mulf %244, %252 : vector<8x32xf32>
    %261 = arith.addf %259, %260 : vector<8x32xf32>
    %262 = math.tanh %261 : vector<8x32xf32>
    %263 = arith.mulf %258, %262 : vector<8x32xf32>
    %c7_i32_90 = arith.constant 7 : i32
    %264 = arith.subi %c7_i32_90, %c3_i32 : i32
    %265 = arith.index_cast %264 : i32 to index
    %c0_91 = arith.constant 0 : index
    %c0_92 = arith.constant 0 : index
    %266 = vector.load %arg16[%265, %c0_91, %c0_92] : memref<8x8x128xf32, #tpu.memory_space<vmem>>, vector<1x8x128xf32>
    %267 = vector.shape_cast %266 : vector<1x8x128xf32> to vector<8x128xf32>
    %cst_93 = arith.constant dense<0.000000e+00> : vector<8x128xf32>
    %268 = tpu.matmul %225, %22, %cst_93 {dimension_numbers = #tpu.dot_dimension_numbers<[1], [0], [0], [1], [0, 0, 1, 1], [], []>} : vector<8x32xf32>, vector<32x128xf32>, vector<8x128xf32> -> vector<8x128xf32>
    %269 = arith.addf %267, %268 : vector<8x128xf32>
    %270 = vector.extract_strided_slice %269 {offsets = [0, 0], sizes = [8, 32], strides = [1, 1]} : vector<8x128xf32> to vector<8x32xf32>
    %271 = arith.negf %270 : vector<8x32xf32>
    %272 = math.exp %271 : vector<8x32xf32>
    %cst_94 = arith.constant 1.000000e+00 : f32
    %273 = vector.broadcast %cst_94 : f32 to vector<8x32xf32>
    %274 = arith.addf %273, %272 : vector<8x32xf32>
    %275 = arith.divf %273, %274 : vector<8x32xf32>
    %276 = vector.extract_strided_slice %269 {offsets = [0, 32], sizes = [8, 32], strides = [1, 1]} : vector<8x128xf32> to vector<8x32xf32>
    %277 = arith.negf %276 : vector<8x32xf32>
    %278 = math.exp %277 : vector<8x32xf32>
    %cst_95 = arith.constant 1.000000e+00 : f32
    %279 = vector.broadcast %cst_95 : f32 to vector<8x32xf32>
    %280 = arith.addf %279, %278 : vector<8x32xf32>
    %281 = arith.divf %279, %280 : vector<8x32xf32>
    %282 = vector.extract_strided_slice %269 {offsets = [0, 64], sizes = [8, 32], strides = [1, 1]} : vector<8x128xf32> to vector<8x32xf32>
    %283 = math.tanh %282 : vector<8x32xf32>
    %284 = vector.extract_strided_slice %269 {offsets = [0, 96], sizes = [8, 32], strides = [1, 1]} : vector<8x128xf32> to vector<8x32xf32>
    %285 = arith.negf %284 : vector<8x32xf32>
    %286 = math.exp %285 : vector<8x32xf32>
    %cst_96 = arith.constant 1.000000e+00 : f32
    %287 = vector.broadcast %cst_96 : f32 to vector<8x32xf32>
    %288 = arith.addf %287, %286 : vector<8x32xf32>
    %289 = arith.divf %287, %288 : vector<8x32xf32>
    %290 = arith.mulf %281, %223 : vector<8x32xf32>
    %291 = arith.mulf %275, %283 : vector<8x32xf32>
    %292 = arith.addf %290, %291 : vector<8x32xf32>
    %293 = math.tanh %292 : vector<8x32xf32>
    %294 = arith.mulf %289, %293 : vector<8x32xf32>
    %295 = arith.index_cast %c3_i32 : i32 to index
    %c0_97 = arith.constant 0 : index
    %c0_98 = arith.constant 0 : index
    %296 = vector.load %arg9[%295, %c0_97, %c0_98] : memref<8x8x32xf32, #tpu.memory_space<vmem>>, vector<1x8x32xf32>
    %297 = vector.shape_cast %296 : vector<1x8x32xf32> to vector<8x32xf32>
    %298 = vector.shape_cast %263 : vector<8x32xf32> to vector<1x8x32xf32>
    tpu.vector_store %arg9[%295, %c0_97, %c0_98], %298 {strides = array<i32>} : memref<8x8x32xf32, #tpu.memory_space<vmem>>, vector<1x8x32xf32>,
    %299 = arith.index_cast %264 : i32 to index
    %c0_99 = arith.constant 0 : index
    %c0_100 = arith.constant 0 : index
    %300 = vector.load %arg10[%299, %c0_99, %c0_100] : memref<8x8x32xf32, #tpu.memory_space<vmem>>, vector<1x8x32xf32>
    %301 = vector.shape_cast %300 : vector<1x8x32xf32> to vector<8x32xf32>
    %302 = vector.shape_cast %294 : vector<8x32xf32> to vector<1x8x32xf32>
    tpu.vector_store %arg10[%299, %c0_99, %c0_100], %302 {strides = array<i32>} : memref<8x8x32xf32, #tpu.memory_space<vmem>>, vector<1x8x32xf32>,
    %c4_i32 = arith.constant 4 : i32
    %303 = arith.index_cast %c4_i32 : i32 to index
    %c0_101 = arith.constant 0 : index
    %c0_102 = arith.constant 0 : index
    %304 = vector.load %arg15[%303, %c0_101, %c0_102] : memref<8x8x128xf32, #tpu.memory_space<vmem>>, vector<1x8x128xf32>
    %305 = vector.shape_cast %304 : vector<1x8x128xf32> to vector<8x128xf32>
    %cst_103 = arith.constant dense<0.000000e+00> : vector<8x128xf32>
    %306 = tpu.matmul %263, %21, %cst_103 {dimension_numbers = #tpu.dot_dimension_numbers<[1], [0], [0], [1], [0, 0, 1, 1], [], []>} : vector<8x32xf32>, vector<32x128xf32>, vector<8x128xf32> -> vector<8x128xf32>
    %307 = arith.addf %305, %306 : vector<8x128xf32>
    %308 = vector.extract_strided_slice %307 {offsets = [0, 0], sizes = [8, 32], strides = [1, 1]} : vector<8x128xf32> to vector<8x32xf32>
    %309 = arith.negf %308 : vector<8x32xf32>
    %310 = math.exp %309 : vector<8x32xf32>
    %cst_104 = arith.constant 1.000000e+00 : f32
    %311 = vector.broadcast %cst_104 : f32 to vector<8x32xf32>
    %312 = arith.addf %311, %310 : vector<8x32xf32>
    %313 = arith.divf %311, %312 : vector<8x32xf32>
    %314 = vector.extract_strided_slice %307 {offsets = [0, 32], sizes = [8, 32], strides = [1, 1]} : vector<8x128xf32> to vector<8x32xf32>
    %315 = arith.negf %314 : vector<8x32xf32>
    %316 = math.exp %315 : vector<8x32xf32>
    %cst_105 = arith.constant 1.000000e+00 : f32
    %317 = vector.broadcast %cst_105 : f32 to vector<8x32xf32>
    %318 = arith.addf %317, %316 : vector<8x32xf32>
    %319 = arith.divf %317, %318 : vector<8x32xf32>
    %320 = vector.extract_strided_slice %307 {offsets = [0, 64], sizes = [8, 32], strides = [1, 1]} : vector<8x128xf32> to vector<8x32xf32>
    %321 = math.tanh %320 : vector<8x32xf32>
    %322 = vector.extract_strided_slice %307 {offsets = [0, 96], sizes = [8, 32], strides = [1, 1]} : vector<8x128xf32> to vector<8x32xf32>
    %323 = arith.negf %322 : vector<8x32xf32>
    %324 = math.exp %323 : vector<8x32xf32>
    %cst_106 = arith.constant 1.000000e+00 : f32
    %325 = vector.broadcast %cst_106 : f32 to vector<8x32xf32>
    %326 = arith.addf %325, %324 : vector<8x32xf32>
    %327 = arith.divf %325, %326 : vector<8x32xf32>
    %328 = arith.mulf %319, %261 : vector<8x32xf32>
    %329 = arith.mulf %313, %321 : vector<8x32xf32>
    %330 = arith.addf %328, %329 : vector<8x32xf32>
    %331 = math.tanh %330 : vector<8x32xf32>
    %332 = arith.mulf %327, %331 : vector<8x32xf32>
    %c7_i32_107 = arith.constant 7 : i32
    %333 = arith.subi %c7_i32_107, %c4_i32 : i32
    %334 = arith.index_cast %333 : i32 to index
    %c0_108 = arith.constant 0 : index
    %c0_109 = arith.constant 0 : index
    %335 = vector.load %arg16[%334, %c0_108, %c0_109] : memref<8x8x128xf32, #tpu.memory_space<vmem>>, vector<1x8x128xf32>
    %336 = vector.shape_cast %335 : vector<1x8x128xf32> to vector<8x128xf32>
    %cst_110 = arith.constant dense<0.000000e+00> : vector<8x128xf32>
    %337 = tpu.matmul %294, %22, %cst_110 {dimension_numbers = #tpu.dot_dimension_numbers<[1], [0], [0], [1], [0, 0, 1, 1], [], []>} : vector<8x32xf32>, vector<32x128xf32>, vector<8x128xf32> -> vector<8x128xf32>
    %338 = arith.addf %336, %337 : vector<8x128xf32>
    %339 = vector.extract_strided_slice %338 {offsets = [0, 0], sizes = [8, 32], strides = [1, 1]} : vector<8x128xf32> to vector<8x32xf32>
    %340 = arith.negf %339 : vector<8x32xf32>
    %341 = math.exp %340 : vector<8x32xf32>
    %cst_111 = arith.constant 1.000000e+00 : f32
    %342 = vector.broadcast %cst_111 : f32 to vector<8x32xf32>
    %343 = arith.addf %342, %341 : vector<8x32xf32>
    %344 = arith.divf %342, %343 : vector<8x32xf32>
    %345 = vector.extract_strided_slice %338 {offsets = [0, 32], sizes = [8, 32], strides = [1, 1]} : vector<8x128xf32> to vector<8x32xf32>
    %346 = arith.negf %345 : vector<8x32xf32>
    %347 = math.exp %346 : vector<8x32xf32>
    %cst_112 = arith.constant 1.000000e+00 : f32
    %348 = vector.broadcast %cst_112 : f32 to vector<8x32xf32>
    %349 = arith.addf %348, %347 : vector<8x32xf32>
    %350 = arith.divf %348, %349 : vector<8x32xf32>
    %351 = vector.extract_strided_slice %338 {offsets = [0, 64], sizes = [8, 32], strides = [1, 1]} : vector<8x128xf32> to vector<8x32xf32>
    %352 = math.tanh %351 : vector<8x32xf32>
    %353 = vector.extract_strided_slice %338 {offsets = [0, 96], sizes = [8, 32], strides = [1, 1]} : vector<8x128xf32> to vector<8x32xf32>
    %354 = arith.negf %353 : vector<8x32xf32>
    %355 = math.exp %354 : vector<8x32xf32>
    %cst_113 = arith.constant 1.000000e+00 : f32
    %356 = vector.broadcast %cst_113 : f32 to vector<8x32xf32>
    %357 = arith.addf %356, %355 : vector<8x32xf32>
    %358 = arith.divf %356, %357 : vector<8x32xf32>
    %359 = arith.mulf %350, %292 : vector<8x32xf32>
    %360 = arith.mulf %344, %352 : vector<8x32xf32>
    %361 = arith.addf %359, %360 : vector<8x32xf32>
    %362 = math.tanh %361 : vector<8x32xf32>
    %363 = arith.mulf %358, %362 : vector<8x32xf32>
    %364 = arith.index_cast %c4_i32 : i32 to index
    %c0_114 = arith.constant 0 : index
    %c0_115 = arith.constant 0 : index
    %365 = vector.load %arg9[%364, %c0_114, %c0_115] : memref<8x8x32xf32, #tpu.memory_space<vmem>>, vector<1x8x32xf32>
    %366 = vector.shape_cast %365 : vector<1x8x32xf32> to vector<8x32xf32>
    %367 = vector.shape_cast %332 : vector<8x32xf32> to vector<1x8x32xf32>
    tpu.vector_store %arg9[%364, %c0_114, %c0_115], %367 {strides = array<i32>} : memref<8x8x32xf32, #tpu.memory_space<vmem>>, vector<1x8x32xf32>,
    %368 = arith.index_cast %333 : i32 to index
    %c0_116 = arith.constant 0 : index
    %c0_117 = arith.constant 0 : index
    %369 = vector.load %arg10[%368, %c0_116, %c0_117] : memref<8x8x32xf32, #tpu.memory_space<vmem>>, vector<1x8x32xf32>
    %370 = vector.shape_cast %369 : vector<1x8x32xf32> to vector<8x32xf32>
    %371 = vector.shape_cast %363 : vector<8x32xf32> to vector<1x8x32xf32>
    tpu.vector_store %arg10[%368, %c0_116, %c0_117], %371 {strides = array<i32>} : memref<8x8x32xf32, #tpu.memory_space<vmem>>, vector<1x8x32xf32>,
    %c5_i32 = arith.constant 5 : i32
    %372 = arith.index_cast %c5_i32 : i32 to index
    %c0_118 = arith.constant 0 : index
    %c0_119 = arith.constant 0 : index
    %373 = vector.load %arg15[%372, %c0_118, %c0_119] : memref<8x8x128xf32, #tpu.memory_space<vmem>>, vector<1x8x128xf32>
    %374 = vector.shape_cast %373 : vector<1x8x128xf32> to vector<8x128xf32>
    %cst_120 = arith.constant dense<0.000000e+00> : vector<8x128xf32>
    %375 = tpu.matmul %332, %21, %cst_120 {dimension_numbers = #tpu.dot_dimension_numbers<[1], [0], [0], [1], [0, 0, 1, 1], [], []>} : vector<8x32xf32>, vector<32x128xf32>, vector<8x128xf32> -> vector<8x128xf32>
    %376 = arith.addf %374, %375 : vector<8x128xf32>
    %377 = vector.extract_strided_slice %376 {offsets = [0, 0], sizes = [8, 32], strides = [1, 1]} : vector<8x128xf32> to vector<8x32xf32>
    %378 = arith.negf %377 : vector<8x32xf32>
    %379 = math.exp %378 : vector<8x32xf32>
    %cst_121 = arith.constant 1.000000e+00 : f32
    %380 = vector.broadcast %cst_121 : f32 to vector<8x32xf32>
    %381 = arith.addf %380, %379 : vector<8x32xf32>
    %382 = arith.divf %380, %381 : vector<8x32xf32>
    %383 = vector.extract_strided_slice %376 {offsets = [0, 32], sizes = [8, 32], strides = [1, 1]} : vector<8x128xf32> to vector<8x32xf32>
    %384 = arith.negf %383 : vector<8x32xf32>
    %385 = math.exp %384 : vector<8x32xf32>
    %cst_122 = arith.constant 1.000000e+00 : f32
    %386 = vector.broadcast %cst_122 : f32 to vector<8x32xf32>
    %387 = arith.addf %386, %385 : vector<8x32xf32>
    %388 = arith.divf %386, %387 : vector<8x32xf32>
    %389 = vector.extract_strided_slice %376 {offsets = [0, 64], sizes = [8, 32], strides = [1, 1]} : vector<8x128xf32> to vector<8x32xf32>
    %390 = math.tanh %389 : vector<8x32xf32>
    %391 = vector.extract_strided_slice %376 {offsets = [0, 96], sizes = [8, 32], strides = [1, 1]} : vector<8x128xf32> to vector<8x32xf32>
    %392 = arith.negf %391 : vector<8x32xf32>
    %393 = math.exp %392 : vector<8x32xf32>
    %cst_123 = arith.constant 1.000000e+00 : f32
    %394 = vector.broadcast %cst_123 : f32 to vector<8x32xf32>
    %395 = arith.addf %394, %393 : vector<8x32xf32>
    %396 = arith.divf %394, %395 : vector<8x32xf32>
    %397 = arith.mulf %388, %330 : vector<8x32xf32>
    %398 = arith.mulf %382, %390 : vector<8x32xf32>
    %399 = arith.addf %397, %398 : vector<8x32xf32>
    %400 = math.tanh %399 : vector<8x32xf32>
    %401 = arith.mulf %396, %400 : vector<8x32xf32>
    %c7_i32_124 = arith.constant 7 : i32
    %402 = arith.subi %c7_i32_124, %c5_i32 : i32
    %403 = arith.index_cast %402 : i32 to index
    %c0_125 = arith.constant 0 : index
    %c0_126 = arith.constant 0 : index
    %404 = vector.load %arg16[%403, %c0_125, %c0_126] : memref<8x8x128xf32, #tpu.memory_space<vmem>>, vector<1x8x128xf32>
    %405 = vector.shape_cast %404 : vector<1x8x128xf32> to vector<8x128xf32>
    %cst_127 = arith.constant dense<0.000000e+00> : vector<8x128xf32>
    %406 = tpu.matmul %363, %22, %cst_127 {dimension_numbers = #tpu.dot_dimension_numbers<[1], [0], [0], [1], [0, 0, 1, 1], [], []>} : vector<8x32xf32>, vector<32x128xf32>, vector<8x128xf32> -> vector<8x128xf32>
    %407 = arith.addf %405, %406 : vector<8x128xf32>
    %408 = vector.extract_strided_slice %407 {offsets = [0, 0], sizes = [8, 32], strides = [1, 1]} : vector<8x128xf32> to vector<8x32xf32>
    %409 = arith.negf %408 : vector<8x32xf32>
    %410 = math.exp %409 : vector<8x32xf32>
    %cst_128 = arith.constant 1.000000e+00 : f32
    %411 = vector.broadcast %cst_128 : f32 to vector<8x32xf32>
    %412 = arith.addf %411, %410 : vector<8x32xf32>
    %413 = arith.divf %411, %412 : vector<8x32xf32>
    %414 = vector.extract_strided_slice %407 {offsets = [0, 32], sizes = [8, 32], strides = [1, 1]} : vector<8x128xf32> to vector<8x32xf32>
    %415 = arith.negf %414 : vector<8x32xf32>
    %416 = math.exp %415 : vector<8x32xf32>
    %cst_129 = arith.constant 1.000000e+00 : f32
    %417 = vector.broadcast %cst_129 : f32 to vector<8x32xf32>
    %418 = arith.addf %417, %416 : vector<8x32xf32>
    %419 = arith.divf %417, %418 : vector<8x32xf32>
    %420 = vector.extract_strided_slice %407 {offsets = [0, 64], sizes = [8, 32], strides = [1, 1]} : vector<8x128xf32> to vector<8x32xf32>
    %421 = math.tanh %420 : vector<8x32xf32>
    %422 = vector.extract_strided_slice %407 {offsets = [0, 96], sizes = [8, 32], strides = [1, 1]} : vector<8x128xf32> to vector<8x32xf32>
    %423 = arith.negf %422 : vector<8x32xf32>
    %424 = math.exp %423 : vector<8x32xf32>
    %cst_130 = arith.constant 1.000000e+00 : f32
    %425 = vector.broadcast %cst_130 : f32 to vector<8x32xf32>
    %426 = arith.addf %425, %424 : vector<8x32xf32>
    %427 = arith.divf %425, %426 : vector<8x32xf32>
    %428 = arith.mulf %419, %361 : vector<8x32xf32>
    %429 = arith.mulf %413, %421 : vector<8x32xf32>
    %430 = arith.addf %428, %429 : vector<8x32xf32>
    %431 = math.tanh %430 : vector<8x32xf32>
    %432 = arith.mulf %427, %431 : vector<8x32xf32>
    %433 = arith.index_cast %c5_i32 : i32 to index
    %c0_131 = arith.constant 0 : index
    %c0_132 = arith.constant 0 : index
    %434 = vector.load %arg9[%433, %c0_131, %c0_132] : memref<8x8x32xf32, #tpu.memory_space<vmem>>, vector<1x8x32xf32>
    %435 = vector.shape_cast %434 : vector<1x8x32xf32> to vector<8x32xf32>
    %436 = vector.shape_cast %401 : vector<8x32xf32> to vector<1x8x32xf32>
    tpu.vector_store %arg9[%433, %c0_131, %c0_132], %436 {strides = array<i32>} : memref<8x8x32xf32, #tpu.memory_space<vmem>>, vector<1x8x32xf32>,
    %437 = arith.index_cast %402 : i32 to index
    %c0_133 = arith.constant 0 : index
    %c0_134 = arith.constant 0 : index
    %438 = vector.load %arg10[%437, %c0_133, %c0_134] : memref<8x8x32xf32, #tpu.memory_space<vmem>>, vector<1x8x32xf32>
    %439 = vector.shape_cast %438 : vector<1x8x32xf32> to vector<8x32xf32>
    %440 = vector.shape_cast %432 : vector<8x32xf32> to vector<1x8x32xf32>
    tpu.vector_store %arg10[%437, %c0_133, %c0_134], %440 {strides = array<i32>} : memref<8x8x32xf32, #tpu.memory_space<vmem>>, vector<1x8x32xf32>,
    %c6_i32 = arith.constant 6 : i32
    %441 = arith.index_cast %c6_i32 : i32 to index
    %c0_135 = arith.constant 0 : index
    %c0_136 = arith.constant 0 : index
    %442 = vector.load %arg15[%441, %c0_135, %c0_136] : memref<8x8x128xf32, #tpu.memory_space<vmem>>, vector<1x8x128xf32>
    %443 = vector.shape_cast %442 : vector<1x8x128xf32> to vector<8x128xf32>
    %cst_137 = arith.constant dense<0.000000e+00> : vector<8x128xf32>
    %444 = tpu.matmul %401, %21, %cst_137 {dimension_numbers = #tpu.dot_dimension_numbers<[1], [0], [0], [1], [0, 0, 1, 1], [], []>} : vector<8x32xf32>, vector<32x128xf32>, vector<8x128xf32> -> vector<8x128xf32>
    %445 = arith.addf %443, %444 : vector<8x128xf32>
    %446 = vector.extract_strided_slice %445 {offsets = [0, 0], sizes = [8, 32], strides = [1, 1]} : vector<8x128xf32> to vector<8x32xf32>
    %447 = arith.negf %446 : vector<8x32xf32>
    %448 = math.exp %447 : vector<8x32xf32>
    %cst_138 = arith.constant 1.000000e+00 : f32
    %449 = vector.broadcast %cst_138 : f32 to vector<8x32xf32>
    %450 = arith.addf %449, %448 : vector<8x32xf32>
    %451 = arith.divf %449, %450 : vector<8x32xf32>
    %452 = vector.extract_strided_slice %445 {offsets = [0, 32], sizes = [8, 32], strides = [1, 1]} : vector<8x128xf32> to vector<8x32xf32>
    %453 = arith.negf %452 : vector<8x32xf32>
    %454 = math.exp %453 : vector<8x32xf32>
    %cst_139 = arith.constant 1.000000e+00 : f32
    %455 = vector.broadcast %cst_139 : f32 to vector<8x32xf32>
    %456 = arith.addf %455, %454 : vector<8x32xf32>
    %457 = arith.divf %455, %456 : vector<8x32xf32>
    %458 = vector.extract_strided_slice %445 {offsets = [0, 64], sizes = [8, 32], strides = [1, 1]} : vector<8x128xf32> to vector<8x32xf32>
    %459 = math.tanh %458 : vector<8x32xf32>
    %460 = vector.extract_strided_slice %445 {offsets = [0, 96], sizes = [8, 32], strides = [1, 1]} : vector<8x128xf32> to vector<8x32xf32>
    %461 = arith.negf %460 : vector<8x32xf32>
    %462 = math.exp %461 : vector<8x32xf32>
    %cst_140 = arith.constant 1.000000e+00 : f32
    %463 = vector.broadcast %cst_140 : f32 to vector<8x32xf32>
    %464 = arith.addf %463, %462 : vector<8x32xf32>
    %465 = arith.divf %463, %464 : vector<8x32xf32>
    %466 = arith.mulf %457, %399 : vector<8x32xf32>
    %467 = arith.mulf %451, %459 : vector<8x32xf32>
    %468 = arith.addf %466, %467 : vector<8x32xf32>
    %469 = math.tanh %468 : vector<8x32xf32>
    %470 = arith.mulf %465, %469 : vector<8x32xf32>
    %c7_i32_141 = arith.constant 7 : i32
    %471 = arith.subi %c7_i32_141, %c6_i32 : i32
    %472 = arith.index_cast %471 : i32 to index
    %c0_142 = arith.constant 0 : index
    %c0_143 = arith.constant 0 : index
    %473 = vector.load %arg16[%472, %c0_142, %c0_143] : memref<8x8x128xf32, #tpu.memory_space<vmem>>, vector<1x8x128xf32>
    %474 = vector.shape_cast %473 : vector<1x8x128xf32> to vector<8x128xf32>
    %cst_144 = arith.constant dense<0.000000e+00> : vector<8x128xf32>
    %475 = tpu.matmul %432, %22, %cst_144 {dimension_numbers = #tpu.dot_dimension_numbers<[1], [0], [0], [1], [0, 0, 1, 1], [], []>} : vector<8x32xf32>, vector<32x128xf32>, vector<8x128xf32> -> vector<8x128xf32>
    %476 = arith.addf %474, %475 : vector<8x128xf32>
    %477 = vector.extract_strided_slice %476 {offsets = [0, 0], sizes = [8, 32], strides = [1, 1]} : vector<8x128xf32> to vector<8x32xf32>
    %478 = arith.negf %477 : vector<8x32xf32>
    %479 = math.exp %478 : vector<8x32xf32>
    %cst_145 = arith.constant 1.000000e+00 : f32
    %480 = vector.broadcast %cst_145 : f32 to vector<8x32xf32>
    %481 = arith.addf %480, %479 : vector<8x32xf32>
    %482 = arith.divf %480, %481 : vector<8x32xf32>
    %483 = vector.extract_strided_slice %476 {offsets = [0, 32], sizes = [8, 32], strides = [1, 1]} : vector<8x128xf32> to vector<8x32xf32>
    %484 = arith.negf %483 : vector<8x32xf32>
    %485 = math.exp %484 : vector<8x32xf32>
    %cst_146 = arith.constant 1.000000e+00 : f32
    %486 = vector.broadcast %cst_146 : f32 to vector<8x32xf32>
    %487 = arith.addf %486, %485 : vector<8x32xf32>
    %488 = arith.divf %486, %487 : vector<8x32xf32>
    %489 = vector.extract_strided_slice %476 {offsets = [0, 64], sizes = [8, 32], strides = [1, 1]} : vector<8x128xf32> to vector<8x32xf32>
    %490 = math.tanh %489 : vector<8x32xf32>
    %491 = vector.extract_strided_slice %476 {offsets = [0, 96], sizes = [8, 32], strides = [1, 1]} : vector<8x128xf32> to vector<8x32xf32>
    %492 = arith.negf %491 : vector<8x32xf32>
    %493 = math.exp %492 : vector<8x32xf32>
    %cst_147 = arith.constant 1.000000e+00 : f32
    %494 = vector.broadcast %cst_147 : f32 to vector<8x32xf32>
    %495 = arith.addf %494, %493 : vector<8x32xf32>
    %496 = arith.divf %494, %495 : vector<8x32xf32>
    %497 = arith.mulf %488, %430 : vector<8x32xf32>
    %498 = arith.mulf %482, %490 : vector<8x32xf32>
    %499 = arith.addf %497, %498 : vector<8x32xf32>
    %500 = math.tanh %499 : vector<8x32xf32>
    %501 = arith.mulf %496, %500 : vector<8x32xf32>
    %502 = arith.index_cast %c6_i32 : i32 to index
    %c0_148 = arith.constant 0 : index
    %c0_149 = arith.constant 0 : index
    %503 = vector.load %arg9[%502, %c0_148, %c0_149] : memref<8x8x32xf32, #tpu.memory_space<vmem>>, vector<1x8x32xf32>
    %504 = vector.shape_cast %503 : vector<1x8x32xf32> to vector<8x32xf32>
    %505 = vector.shape_cast %470 : vector<8x32xf32> to vector<1x8x32xf32>
    tpu.vector_store %arg9[%502, %c0_148, %c0_149], %505 {strides = array<i32>} : memref<8x8x32xf32, #tpu.memory_space<vmem>>, vector<1x8x32xf32>,
    %506 = arith.index_cast %471 : i32 to index
    %c0_150 = arith.constant 0 : index
    %c0_151 = arith.constant 0 : index
    %507 = vector.load %arg10[%506, %c0_150, %c0_151] : memref<8x8x32xf32, #tpu.memory_space<vmem>>, vector<1x8x32xf32>
    %508 = vector.shape_cast %507 : vector<1x8x32xf32> to vector<8x32xf32>
    %509 = vector.shape_cast %501 : vector<8x32xf32> to vector<1x8x32xf32>
    tpu.vector_store %arg10[%506, %c0_150, %c0_151], %509 {strides = array<i32>} : memref<8x8x32xf32, #tpu.memory_space<vmem>>, vector<1x8x32xf32>,
    %c7_i32_152 = arith.constant 7 : i32
    %510 = arith.index_cast %c7_i32_152 : i32 to index
    %c0_153 = arith.constant 0 : index
    %c0_154 = arith.constant 0 : index
    %511 = vector.load %arg15[%510, %c0_153, %c0_154] : memref<8x8x128xf32, #tpu.memory_space<vmem>>, vector<1x8x128xf32>
    %512 = vector.shape_cast %511 : vector<1x8x128xf32> to vector<8x128xf32>
    %cst_155 = arith.constant dense<0.000000e+00> : vector<8x128xf32>
    %513 = tpu.matmul %470, %21, %cst_155 {dimension_numbers = #tpu.dot_dimension_numbers<[1], [0], [0], [1], [0, 0, 1, 1], [], []>} : vector<8x32xf32>, vector<32x128xf32>, vector<8x128xf32> -> vector<8x128xf32>
    %514 = arith.addf %512, %513 : vector<8x128xf32>
    %515 = vector.extract_strided_slice %514 {offsets = [0, 0], sizes = [8, 32], strides = [1, 1]} : vector<8x128xf32> to vector<8x32xf32>
    %516 = arith.negf %515 : vector<8x32xf32>
    %517 = math.exp %516 : vector<8x32xf32>
    %cst_156 = arith.constant 1.000000e+00 : f32
    %518 = vector.broadcast %cst_156 : f32 to vector<8x32xf32>
    %519 = arith.addf %518, %517 : vector<8x32xf32>
    %520 = arith.divf %518, %519 : vector<8x32xf32>
    %521 = vector.extract_strided_slice %514 {offsets = [0, 32], sizes = [8, 32], strides = [1, 1]} : vector<8x128xf32> to vector<8x32xf32>
    %522 = arith.negf %521 : vector<8x32xf32>
    %523 = math.exp %522 : vector<8x32xf32>
    %cst_157 = arith.constant 1.000000e+00 : f32
    %524 = vector.broadcast %cst_157 : f32 to vector<8x32xf32>
    %525 = arith.addf %524, %523 : vector<8x32xf32>
    %526 = arith.divf %524, %525 : vector<8x32xf32>
    %527 = vector.extract_strided_slice %514 {offsets = [0, 64], sizes = [8, 32], strides = [1, 1]} : vector<8x128xf32> to vector<8x32xf32>
    %528 = math.tanh %527 : vector<8x32xf32>
    %529 = vector.extract_strided_slice %514 {offsets = [0, 96], sizes = [8, 32], strides = [1, 1]} : vector<8x128xf32> to vector<8x32xf32>
    %530 = arith.negf %529 : vector<8x32xf32>
    %531 = math.exp %530 : vector<8x32xf32>
    %cst_158 = arith.constant 1.000000e+00 : f32
    %532 = vector.broadcast %cst_158 : f32 to vector<8x32xf32>
    %533 = arith.addf %532, %531 : vector<8x32xf32>
    %534 = arith.divf %532, %533 : vector<8x32xf32>
    %535 = arith.mulf %526, %468 : vector<8x32xf32>
    %536 = arith.mulf %520, %528 : vector<8x32xf32>
    %537 = arith.addf %535, %536 : vector<8x32xf32>
    %538 = math.tanh %537 : vector<8x32xf32>
    %539 = arith.mulf %534, %538 : vector<8x32xf32>
    %c7_i32_159 = arith.constant 7 : i32
    %540 = arith.subi %c7_i32_159, %c7_i32_152 : i32
    %541 = arith.index_cast %540 : i32 to index
    %c0_160 = arith.constant 0 : index
    %c0_161 = arith.constant 0 : index
    %542 = vector.load %arg16[%541, %c0_160, %c0_161] : memref<8x8x128xf32, #tpu.memory_space<vmem>>, vector<1x8x128xf32>
    %543 = vector.shape_cast %542 : vector<1x8x128xf32> to vector<8x128xf32>
    %cst_162 = arith.constant dense<0.000000e+00> : vector<8x128xf32>
    %544 = tpu.matmul %501, %22, %cst_162 {dimension_numbers = #tpu.dot_dimension_numbers<[1], [0], [0], [1], [0, 0, 1, 1], [], []>} : vector<8x32xf32>, vector<32x128xf32>, vector<8x128xf32> -> vector<8x128xf32>
    %545 = arith.addf %543, %544 : vector<8x128xf32>
    %546 = vector.extract_strided_slice %545 {offsets = [0, 0], sizes = [8, 32], strides = [1, 1]} : vector<8x128xf32> to vector<8x32xf32>
    %547 = arith.negf %546 : vector<8x32xf32>
    %548 = math.exp %547 : vector<8x32xf32>
    %cst_163 = arith.constant 1.000000e+00 : f32
    %549 = vector.broadcast %cst_163 : f32 to vector<8x32xf32>
    %550 = arith.addf %549, %548 : vector<8x32xf32>
    %551 = arith.divf %549, %550 : vector<8x32xf32>
    %552 = vector.extract_strided_slice %545 {offsets = [0, 32], sizes = [8, 32], strides = [1, 1]} : vector<8x128xf32> to vector<8x32xf32>
    %553 = arith.negf %552 : vector<8x32xf32>
    %554 = math.exp %553 : vector<8x32xf32>
    %cst_164 = arith.constant 1.000000e+00 : f32
    %555 = vector.broadcast %cst_164 : f32 to vector<8x32xf32>
    %556 = arith.addf %555, %554 : vector<8x32xf32>
    %557 = arith.divf %555, %556 : vector<8x32xf32>
    %558 = vector.extract_strided_slice %545 {offsets = [0, 64], sizes = [8, 32], strides = [1, 1]} : vector<8x128xf32> to vector<8x32xf32>
    %559 = math.tanh %558 : vector<8x32xf32>
    %560 = vector.extract_strided_slice %545 {offsets = [0, 96], sizes = [8, 32], strides = [1, 1]} : vector<8x128xf32> to vector<8x32xf32>
    %561 = arith.negf %560 : vector<8x32xf32>
    %562 = math.exp %561 : vector<8x32xf32>
    %cst_165 = arith.constant 1.000000e+00 : f32
    %563 = vector.broadcast %cst_165 : f32 to vector<8x32xf32>
    %564 = arith.addf %563, %562 : vector<8x32xf32>
    %565 = arith.divf %563, %564 : vector<8x32xf32>
    %566 = arith.mulf %557, %499 : vector<8x32xf32>
    %567 = arith.mulf %551, %559 : vector<8x32xf32>
    %568 = arith.addf %566, %567 : vector<8x32xf32>
    %569 = math.tanh %568 : vector<8x32xf32>
    %570 = arith.mulf %565, %569 : vector<8x32xf32>
    %571 = arith.index_cast %c7_i32_152 : i32 to index
    %c0_166 = arith.constant 0 : index
    %c0_167 = arith.constant 0 : index
    %572 = vector.load %arg9[%571, %c0_166, %c0_167] : memref<8x8x32xf32, #tpu.memory_space<vmem>>, vector<1x8x32xf32>
    %573 = vector.shape_cast %572 : vector<1x8x32xf32> to vector<8x32xf32>
    %574 = vector.shape_cast %539 : vector<8x32xf32> to vector<1x8x32xf32>
    tpu.vector_store %arg9[%571, %c0_166, %c0_167], %574 {strides = array<i32>} : memref<8x8x32xf32, #tpu.memory_space<vmem>>, vector<1x8x32xf32>,
    %575 = arith.index_cast %540 : i32 to index
    %c0_168 = arith.constant 0 : index
    %c0_169 = arith.constant 0 : index
    %576 = vector.load %arg10[%575, %c0_168, %c0_169] : memref<8x8x32xf32, #tpu.memory_space<vmem>>, vector<1x8x32xf32>
    %577 = vector.shape_cast %576 : vector<1x8x32xf32> to vector<8x32xf32>
    %578 = vector.shape_cast %570 : vector<8x32xf32> to vector<1x8x32xf32>
    tpu.vector_store %arg10[%575, %c0_168, %c0_169], %578 {strides = array<i32>} : memref<8x8x32xf32, #tpu.memory_space<vmem>>, vector<1x8x32xf32>,
    %c8_i32 = arith.constant 8 : i32
    %c0_170 = arith.constant 0 : index
    %c0_171 = arith.constant 0 : index
    %579 = vector.load %arg11[%c0_170, %c0_171] : memref<8x32xf32, #tpu.memory_space<vmem>>, vector<8x32xf32>
    tpu.vector_store %arg11[%c0_170, %c0_171], %539 {strides = array<i32>} : memref<8x32xf32, #tpu.memory_space<vmem>>, vector<8x32xf32>,
    %c0_172 = arith.constant 0 : index
    %c0_173 = arith.constant 0 : index
    %580 = vector.load %arg12[%c0_172, %c0_173] : memref<8x32xf32, #tpu.memory_space<vmem>>, vector<8x32xf32>
    tpu.vector_store %arg12[%c0_172, %c0_173], %537 {strides = array<i32>} : memref<8x32xf32, #tpu.memory_space<vmem>>, vector<8x32xf32>,
    %c0_174 = arith.constant 0 : index
    %c0_175 = arith.constant 0 : index
    %581 = vector.load %arg13[%c0_174, %c0_175] : memref<8x32xf32, #tpu.memory_space<vmem>>, vector<8x32xf32>
    tpu.vector_store %arg13[%c0_174, %c0_175], %570 {strides = array<i32>} : memref<8x32xf32, #tpu.memory_space<vmem>>, vector<8x32xf32>,
    %c0_176 = arith.constant 0 : index
    %c0_177 = arith.constant 0 : index
    %582 = vector.load %arg14[%c0_176, %c0_177] : memref<8x32xf32, #tpu.memory_space<vmem>>, vector<8x32xf32>
    tpu.vector_store %arg14[%c0_176, %c0_177], %568 {strides = array<i32>} : memref<8x32xf32, #tpu.memory_space<vmem>>, vector<8x32xf32>,
    return
  }
  func.func @transform_0(%arg0: i32) -> (i32, i32, i32) {
    %c0_i32 = arith.constant 0 : i32
    %c0_i32_0 = arith.constant 0 : i32
    %c0_i32_1 = arith.constant 0 : i32
    return %arg0, %c0_i32, %c0_i32_0 : i32, i32, i32
  }
  func.func @transform_1(%arg0: i32) -> (i32, i32, i32) {
    %c0_i32 = arith.constant 0 : i32
    %0 = arith.subi %c0_i32, %arg0 : i32
    %c0_i32_0 = arith.constant 0 : i32
    %c0_i32_1 = arith.constant 0 : i32
    %c0_i32_2 = arith.constant 0 : i32
    return %0, %c0_i32_0, %c0_i32_1 : i32, i32, i32
  }
  func.func @transform_2(%arg0: i32) -> (i32, i32) {
    %c0_i32 = arith.constant 0 : i32
    %c0_i32_0 = arith.constant 0 : i32
    %c0_i32_1 = arith.constant 0 : i32
    return %c0_i32, %c0_i32_0 : i32, i32
  }
  func.func @transform_3(%arg0: i32) -> (i32, i32) {
    %c0_i32 = arith.constant 0 : i32
    %c0_i32_0 = arith.constant 0 : i32
    %c0_i32_1 = arith.constant 0 : i32
    return %c0_i32, %c0_i32_0 : i32, i32
  }
  func.func @transform_4(%arg0: i32) -> (i32, i32) {
    %c0_i32 = arith.constant 0 : i32
    %c0_i32_0 = arith.constant 0 : i32
    %c0_i32_1 = arith.constant 0 : i32
    return %c0_i32, %c0_i32_0 : i32, i32
  }
  func.func @transform_5(%arg0: i32) -> (i32, i32) {
    %c0_i32 = arith.constant 0 : i32
    %c0_i32_0 = arith.constant 0 : i32
    %c0_i32_1 = arith.constant 0 : i32
    return %c0_i32, %c0_i32_0 : i32, i32
  }
  func.func @transform_6(%arg0: i32) -> (i32, i32) {
    %c0_i32 = arith.constant 0 : i32
    %c0_i32_0 = arith.constant 0 : i32
    %c0_i32_1 = arith.constant 0 : i32
    return %c0_i32, %c0_i32_0 : i32, i32
  }
  func.func @transform_7(%arg0: i32) -> (i32, i32) {
    %c0_i32 = arith.constant 0 : i32
    %c0_i32_0 = arith.constant 0 : i32
    %c0_i32_1 = arith.constant 0 : i32
    return %c0_i32, %c0_i32_0 : i32, i32
  }
  func.func @transform_8(%arg0: i32) -> (i32, i32, i32) {
    %c0_i32 = arith.constant 0 : i32
    %c0_i32_0 = arith.constant 0 : i32
    %c0_i32_1 = arith.constant 0 : i32
    return %arg0, %c0_i32, %c0_i32_0 : i32, i32, i32
  }
  func.func @transform_9(%arg0: i32) -> (i32, i32, i32) {
    %c0_i32 = arith.constant 0 : i32
    %0 = arith.subi %c0_i32, %arg0 : i32
    %c0_i32_0 = arith.constant 0 : i32
    %c0_i32_1 = arith.constant 0 : i32
    %c0_i32_2 = arith.constant 0 : i32
    return %0, %c0_i32_0, %c0_i32_1 : i32, i32, i32
  }
}

module attributes {stable_mosaic.version = 11 : i64} {
  func.func @_bilstm_kernel(%arg0: i32, %arg1: memref<8x8x32xf32, #tpu.memory_space<vmem>>, %arg2: memref<8x8x32xf32, #tpu.memory_space<vmem>>, %arg3: memref<8x8x32xf32, #tpu.memory_space<vmem>>, %arg4: memref<8x8x32xf32, #tpu.memory_space<vmem>>, %arg5: memref<32x128xf32, #tpu.memory_space<vmem>>, %arg6: memref<32x128xf32, #tpu.memory_space<vmem>>, %arg7: memref<32x128xf32, #tpu.memory_space<vmem>>, %arg8: memref<32x128xf32, #tpu.memory_space<vmem>>, %arg9: memref<32x128xf32, #tpu.memory_space<vmem>>, %arg10: memref<32x128xf32, #tpu.memory_space<vmem>>, %arg11: memref<1x128xf32, #tpu.memory_space<vmem>>, %arg12: memref<1x128xf32, #tpu.memory_space<vmem>>, %arg13: memref<2x32x4xf32, #tpu.memory_space<vmem>>, %arg14: memref<1x4xf32, #tpu.memory_space<vmem>>, %arg15: memref<8x4xf32, #tpu.memory_space<vmem>>, %arg16: memref<8x32xf32, #tpu.memory_space<vmem>>, %arg17: memref<8x32xf32, #tpu.memory_space<vmem>>, %arg18: memref<8x32xf32, #tpu.memory_space<vmem>>, %arg19: memref<8x32xf32, #tpu.memory_space<vmem>>, %arg20: memref<8x8x128xf32, #tpu.memory_space<vmem>>, %arg21: memref<8x8x128xf32, #tpu.memory_space<vmem>>, %arg22: memref<8x32xf32, #tpu.memory_space<vmem>>, %arg23: memref<8x32xf32, #tpu.memory_space<vmem>>) attributes {dimension_semantics = [#tpu.dimension_semantics<arbitrary>], iteration_bounds = array<i64: 1>, scalar_prefetch = 0 : i64, scratch_operands = 8 : i64, tpu.core_type = #tpu.core_type<tc>, window_params = [{transform_indices = @transform_0, window_bounds = array<i64: 8, 8, 32>}, {transform_indices = @transform_1, window_bounds = array<i64: 8, 8, 32>}, {transform_indices = @transform_2, window_bounds = array<i64: 8, 8, 32>}, {transform_indices = @transform_3, window_bounds = array<i64: 8, 8, 32>}, {pipeline_mode = #tpu.pipeline_mode<synchronous>, transform_indices = @transform_4, window_bounds = array<i64: 32, 128>}, {pipeline_mode = #tpu.pipeline_mode<synchronous>, transform_indices = @transform_5, window_bounds = array<i64: 32, 128>}, {pipeline_mode = #tpu.pipeline_mode<synchronous>, transform_indices = @transform_6, window_bounds = array<i64: 32, 128>}, {pipeline_mode = #tpu.pipeline_mode<synchronous>, transform_indices = @transform_7, window_bounds = array<i64: 32, 128>}, {pipeline_mode = #tpu.pipeline_mode<synchronous>, transform_indices = @transform_8, window_bounds = array<i64: 32, 128>}, {pipeline_mode = #tpu.pipeline_mode<synchronous>, transform_indices = @transform_9, window_bounds = array<i64: 32, 128>}, {pipeline_mode = #tpu.pipeline_mode<synchronous>, transform_indices = @transform_10, window_bounds = array<i64: 1, 128>}, {pipeline_mode = #tpu.pipeline_mode<synchronous>, transform_indices = @transform_11, window_bounds = array<i64: 1, 128>}, {pipeline_mode = #tpu.pipeline_mode<synchronous>, transform_indices = @transform_12, window_bounds = array<i64: 2, 32, 4>}, {pipeline_mode = #tpu.pipeline_mode<synchronous>, transform_indices = @transform_13, window_bounds = array<i64: 1, 4>}, {pipeline_mode = #tpu.pipeline_mode<synchronous>, transform_indices = @transform_14, window_bounds = array<i64: 8, 4>}]} {
    %c0_i32 = arith.constant 0 : i32
    %0 = arith.cmpi eq, %arg0, %c0_i32 : i32
    %1 = arith.extui %0 : i1 to i32
    %c0_i32_0 = arith.constant 0 : i32
    %2 = arith.cmpi ne, %1, %c0_i32_0 : i32
    scf.if %2 {
      %cst_168 = arith.constant 0.000000e+00 : f32
      %552 = vector.broadcast %cst_168 : f32 to vector<8x32xf32>
      %c0_169 = arith.constant 0 : index
      %c0_170 = arith.constant 0 : index
      %553 = vector.load %arg16[%c0_169, %c0_170] : memref<8x32xf32, #tpu.memory_space<vmem>>, vector<8x32xf32>
      tpu.vector_store %arg16[%c0_169, %c0_170], %552 {strides = array<i32>} : memref<8x32xf32, #tpu.memory_space<vmem>>, vector<8x32xf32>,
      %cst_171 = arith.constant 0.000000e+00 : f32
      %554 = vector.broadcast %cst_171 : f32 to vector<8x32xf32>
      %c0_172 = arith.constant 0 : index
      %c0_173 = arith.constant 0 : index
      %555 = vector.load %arg17[%c0_172, %c0_173] : memref<8x32xf32, #tpu.memory_space<vmem>>, vector<8x32xf32>
      tpu.vector_store %arg17[%c0_172, %c0_173], %554 {strides = array<i32>} : memref<8x32xf32, #tpu.memory_space<vmem>>, vector<8x32xf32>,
      %cst_174 = arith.constant 0.000000e+00 : f32
      %556 = vector.broadcast %cst_174 : f32 to vector<8x32xf32>
      %c0_175 = arith.constant 0 : index
      %c0_176 = arith.constant 0 : index
      %557 = vector.load %arg18[%c0_175, %c0_176] : memref<8x32xf32, #tpu.memory_space<vmem>>, vector<8x32xf32>
      tpu.vector_store %arg18[%c0_175, %c0_176], %556 {strides = array<i32>} : memref<8x32xf32, #tpu.memory_space<vmem>>, vector<8x32xf32>,
      %cst_177 = arith.constant 0.000000e+00 : f32
      %558 = vector.broadcast %cst_177 : f32 to vector<8x32xf32>
      %c0_178 = arith.constant 0 : index
      %c0_179 = arith.constant 0 : index
      %559 = vector.load %arg19[%c0_178, %c0_179] : memref<8x32xf32, #tpu.memory_space<vmem>>, vector<8x32xf32>
      tpu.vector_store %arg19[%c0_178, %c0_179], %558 {strides = array<i32>} : memref<8x32xf32, #tpu.memory_space<vmem>>, vector<8x32xf32>,
      %cst_180 = arith.constant 0.000000e+00 : f32
      %560 = vector.broadcast %cst_180 : f32 to vector<8x32xf32>
      %c0_181 = arith.constant 0 : index
      %c0_182 = arith.constant 0 : index
      %561 = vector.load %arg22[%c0_181, %c0_182] : memref<8x32xf32, #tpu.memory_space<vmem>>, vector<8x32xf32>
      tpu.vector_store %arg22[%c0_181, %c0_182], %560 {strides = array<i32>} : memref<8x32xf32, #tpu.memory_space<vmem>>, vector<8x32xf32>,
      %cst_183 = arith.constant 0.000000e+00 : f32
      %562 = vector.broadcast %cst_183 : f32 to vector<8x32xf32>
      %c0_184 = arith.constant 0 : index
      %c0_185 = arith.constant 0 : index
      %563 = vector.load %arg23[%c0_184, %c0_185] : memref<8x32xf32, #tpu.memory_space<vmem>>, vector<8x32xf32>
      tpu.vector_store %arg23[%c0_184, %c0_185], %562 {strides = array<i32>} : memref<8x32xf32, #tpu.memory_space<vmem>>, vector<8x32xf32>,
    } else {
    }
    %c0 = arith.constant 0 : index
    %c0_1 = arith.constant 0 : index
    %c0_2 = arith.constant 0 : index
    %3 = vector.load %arg1[%c0, %c0_1, %c0_2] : memref<8x8x32xf32, #tpu.memory_space<vmem>>, vector<8x8x32xf32>
    %4 = vector.shape_cast %3 : vector<8x8x32xf32> to vector<64x32xf32>
    %c0_3 = arith.constant 0 : index
    %c0_4 = arith.constant 0 : index
    %5 = vector.load %arg5[%c0_3, %c0_4] : memref<32x128xf32, #tpu.memory_space<vmem>>, vector<32x128xf32>
    %cst = arith.constant dense<0.000000e+00> : vector<64x128xf32>
    %6 = tpu.matmul %4, %5, %cst {dimension_numbers = #tpu.dot_dimension_numbers<[1], [0], [0], [1], [0, 0, 1, 1], [], []>} : vector<64x32xf32>, vector<32x128xf32>, vector<64x128xf32> -> vector<64x128xf32>
    %c0_5 = arith.constant 0 : index
    %c0_6 = arith.constant 0 : index
    %c0_7 = arith.constant 0 : index
    %7 = vector.load %arg2[%c0_5, %c0_6, %c0_7] : memref<8x8x32xf32, #tpu.memory_space<vmem>>, vector<8x8x32xf32>
    %8 = vector.shape_cast %7 : vector<8x8x32xf32> to vector<64x32xf32>
    %c0_8 = arith.constant 0 : index
    %c0_9 = arith.constant 0 : index
    %9 = vector.load %arg6[%c0_8, %c0_9] : memref<32x128xf32, #tpu.memory_space<vmem>>, vector<32x128xf32>
    %cst_10 = arith.constant dense<0.000000e+00> : vector<64x128xf32>
    %10 = tpu.matmul %8, %9, %cst_10 {dimension_numbers = #tpu.dot_dimension_numbers<[1], [0], [0], [1], [0, 0, 1, 1], [], []>} : vector<64x32xf32>, vector<32x128xf32>, vector<64x128xf32> -> vector<64x128xf32>
    %11 = arith.addf %6, %10 : vector<64x128xf32>
    %c0_11 = arith.constant 0 : index
    %c0_12 = arith.constant 0 : index
    %12 = vector.load %arg11[%c0_11, %c0_12] : memref<1x128xf32, #tpu.memory_space<vmem>>, vector<1x128xf32>
    %13 = vector.broadcast %12 : vector<1x128xf32> to vector<64x128xf32>
    %14 = arith.addf %11, %13 : vector<64x128xf32>
    %15 = vector.shape_cast %14 : vector<64x128xf32> to vector<8x8x128xf32>
    %c0_13 = arith.constant 0 : index
    %c0_14 = arith.constant 0 : index
    %c0_15 = arith.constant 0 : index
    %16 = vector.load %arg20[%c0_13, %c0_14, %c0_15] : memref<8x8x128xf32, #tpu.memory_space<vmem>>, vector<8x8x128xf32>
    tpu.vector_store %arg20[%c0_13, %c0_14, %c0_15], %15 {strides = array<i32>} : memref<8x8x128xf32, #tpu.memory_space<vmem>>, vector<8x8x128xf32>,
    %c0_16 = arith.constant 0 : index
    %c0_17 = arith.constant 0 : index
    %c0_18 = arith.constant 0 : index
    %17 = vector.load %arg3[%c0_16, %c0_17, %c0_18] : memref<8x8x32xf32, #tpu.memory_space<vmem>>, vector<8x8x32xf32>
    %18 = vector.shape_cast %17 : vector<8x8x32xf32> to vector<64x32xf32>
    %c0_19 = arith.constant 0 : index
    %c0_20 = arith.constant 0 : index
    %19 = vector.load %arg7[%c0_19, %c0_20] : memref<32x128xf32, #tpu.memory_space<vmem>>, vector<32x128xf32>
    %cst_21 = arith.constant dense<0.000000e+00> : vector<64x128xf32>
    %20 = tpu.matmul %18, %19, %cst_21 {dimension_numbers = #tpu.dot_dimension_numbers<[1], [0], [0], [1], [0, 0, 1, 1], [], []>} : vector<64x32xf32>, vector<32x128xf32>, vector<64x128xf32> -> vector<64x128xf32>
    %c0_22 = arith.constant 0 : index
    %c0_23 = arith.constant 0 : index
    %c0_24 = arith.constant 0 : index
    %21 = vector.load %arg4[%c0_22, %c0_23, %c0_24] : memref<8x8x32xf32, #tpu.memory_space<vmem>>, vector<8x8x32xf32>
    %22 = vector.shape_cast %21 : vector<8x8x32xf32> to vector<64x32xf32>
    %c0_25 = arith.constant 0 : index
    %c0_26 = arith.constant 0 : index
    %23 = vector.load %arg8[%c0_25, %c0_26] : memref<32x128xf32, #tpu.memory_space<vmem>>, vector<32x128xf32>
    %cst_27 = arith.constant dense<0.000000e+00> : vector<64x128xf32>
    %24 = tpu.matmul %22, %23, %cst_27 {dimension_numbers = #tpu.dot_dimension_numbers<[1], [0], [0], [1], [0, 0, 1, 1], [], []>} : vector<64x32xf32>, vector<32x128xf32>, vector<64x128xf32> -> vector<64x128xf32>
    %25 = arith.addf %20, %24 : vector<64x128xf32>
    %c0_28 = arith.constant 0 : index
    %c0_29 = arith.constant 0 : index
    %26 = vector.load %arg12[%c0_28, %c0_29] : memref<1x128xf32, #tpu.memory_space<vmem>>, vector<1x128xf32>
    %27 = vector.broadcast %26 : vector<1x128xf32> to vector<64x128xf32>
    %28 = arith.addf %25, %27 : vector<64x128xf32>
    %29 = vector.shape_cast %28 : vector<64x128xf32> to vector<8x8x128xf32>
    %c0_30 = arith.constant 0 : index
    %c0_31 = arith.constant 0 : index
    %c0_32 = arith.constant 0 : index
    %30 = vector.load %arg21[%c0_30, %c0_31, %c0_32] : memref<8x8x128xf32, #tpu.memory_space<vmem>>, vector<8x8x128xf32>
    tpu.vector_store %arg21[%c0_30, %c0_31, %c0_32], %29 {strides = array<i32>} : memref<8x8x128xf32, #tpu.memory_space<vmem>>, vector<8x8x128xf32>,
    %c0_33 = arith.constant 0 : index
    %c0_34 = arith.constant 0 : index
    %31 = vector.load %arg9[%c0_33, %c0_34] : memref<32x128xf32, #tpu.memory_space<vmem>>, vector<32x128xf32>
    %c0_35 = arith.constant 0 : index
    %c0_36 = arith.constant 0 : index
    %32 = vector.load %arg10[%c0_35, %c0_36] : memref<32x128xf32, #tpu.memory_space<vmem>>, vector<32x128xf32>
    %c0_37 = arith.constant 0 : index
    %c0_38 = arith.constant 0 : index
    %33 = vector.load %arg16[%c0_37, %c0_38] : memref<8x32xf32, #tpu.memory_space<vmem>>, vector<8x32xf32>
    %c0_39 = arith.constant 0 : index
    %c0_40 = arith.constant 0 : index
    %34 = vector.load %arg17[%c0_39, %c0_40] : memref<8x32xf32, #tpu.memory_space<vmem>>, vector<8x32xf32>
    %c0_41 = arith.constant 0 : index
    %c0_42 = arith.constant 0 : index
    %35 = vector.load %arg18[%c0_41, %c0_42] : memref<8x32xf32, #tpu.memory_space<vmem>>, vector<8x32xf32>
    %c0_43 = arith.constant 0 : index
    %c0_44 = arith.constant 0 : index
    %36 = vector.load %arg19[%c0_43, %c0_44] : memref<8x32xf32, #tpu.memory_space<vmem>>, vector<8x32xf32>
    %c0_45 = arith.constant 0 : index
    %c0_46 = arith.constant 0 : index
    %37 = vector.load %arg22[%c0_45, %c0_46] : memref<8x32xf32, #tpu.memory_space<vmem>>, vector<8x32xf32>
    %c0_47 = arith.constant 0 : index
    %c0_48 = arith.constant 0 : index
    %38 = vector.load %arg23[%c0_47, %c0_48] : memref<8x32xf32, #tpu.memory_space<vmem>>, vector<8x32xf32>
    %c0_i32_49 = arith.constant 0 : i32
    %39 = arith.index_cast %c0_i32_49 : i32 to index
    %c0_50 = arith.constant 0 : index
    %c0_51 = arith.constant 0 : index
    %40 = vector.load %arg20[%39, %c0_50, %c0_51] : memref<8x8x128xf32, #tpu.memory_space<vmem>>, vector<1x8x128xf32>
    %41 = vector.shape_cast %40 : vector<1x8x128xf32> to vector<8x128xf32>
    %cst_52 = arith.constant dense<0.000000e+00> : vector<8x128xf32>
    %42 = tpu.matmul %33, %31, %cst_52 {dimension_numbers = #tpu.dot_dimension_numbers<[1], [0], [0], [1], [0, 0, 1, 1], [], []>} : vector<8x32xf32>, vector<32x128xf32>, vector<8x128xf32> -> vector<8x128xf32>
    %43 = arith.addf %41, %42 : vector<8x128xf32>
    %44 = vector.extract_strided_slice %43 {offsets = [0, 0], sizes = [8, 32], strides = [1, 1]} : vector<8x128xf32> to vector<8x32xf32>
    %45 = arith.negf %44 : vector<8x32xf32>
    %46 = math.exp %45 : vector<8x32xf32>
    %cst_53 = arith.constant 1.000000e+00 : f32
    %47 = vector.broadcast %cst_53 : f32 to vector<8x32xf32>
    %48 = arith.addf %47, %46 : vector<8x32xf32>
    %49 = arith.divf %47, %48 : vector<8x32xf32>
    %50 = vector.extract_strided_slice %43 {offsets = [0, 32], sizes = [8, 32], strides = [1, 1]} : vector<8x128xf32> to vector<8x32xf32>
    %51 = arith.negf %50 : vector<8x32xf32>
    %52 = math.exp %51 : vector<8x32xf32>
    %cst_54 = arith.constant 1.000000e+00 : f32
    %53 = vector.broadcast %cst_54 : f32 to vector<8x32xf32>
    %54 = arith.addf %53, %52 : vector<8x32xf32>
    %55 = arith.divf %53, %54 : vector<8x32xf32>
    %56 = vector.extract_strided_slice %43 {offsets = [0, 64], sizes = [8, 32], strides = [1, 1]} : vector<8x128xf32> to vector<8x32xf32>
    %57 = math.tanh %56 : vector<8x32xf32>
    %58 = vector.extract_strided_slice %43 {offsets = [0, 96], sizes = [8, 32], strides = [1, 1]} : vector<8x128xf32> to vector<8x32xf32>
    %59 = arith.negf %58 : vector<8x32xf32>
    %60 = math.exp %59 : vector<8x32xf32>
    %cst_55 = arith.constant 1.000000e+00 : f32
    %61 = vector.broadcast %cst_55 : f32 to vector<8x32xf32>
    %62 = arith.addf %61, %60 : vector<8x32xf32>
    %63 = arith.divf %61, %62 : vector<8x32xf32>
    %64 = arith.mulf %55, %34 : vector<8x32xf32>
    %65 = arith.mulf %49, %57 : vector<8x32xf32>
    %66 = arith.addf %64, %65 : vector<8x32xf32>
    %67 = math.tanh %66 : vector<8x32xf32>
    %68 = arith.mulf %63, %67 : vector<8x32xf32>
    %c7_i32 = arith.constant 7 : i32
    %69 = arith.subi %c7_i32, %c0_i32_49 : i32
    %70 = arith.index_cast %69 : i32 to index
    %c0_56 = arith.constant 0 : index
    %c0_57 = arith.constant 0 : index
    %71 = vector.load %arg21[%70, %c0_56, %c0_57] : memref<8x8x128xf32, #tpu.memory_space<vmem>>, vector<1x8x128xf32>
    %72 = vector.shape_cast %71 : vector<1x8x128xf32> to vector<8x128xf32>
    %cst_58 = arith.constant dense<0.000000e+00> : vector<8x128xf32>
    %73 = tpu.matmul %35, %32, %cst_58 {dimension_numbers = #tpu.dot_dimension_numbers<[1], [0], [0], [1], [0, 0, 1, 1], [], []>} : vector<8x32xf32>, vector<32x128xf32>, vector<8x128xf32> -> vector<8x128xf32>
    %74 = arith.addf %72, %73 : vector<8x128xf32>
    %75 = vector.extract_strided_slice %74 {offsets = [0, 0], sizes = [8, 32], strides = [1, 1]} : vector<8x128xf32> to vector<8x32xf32>
    %76 = arith.negf %75 : vector<8x32xf32>
    %77 = math.exp %76 : vector<8x32xf32>
    %cst_59 = arith.constant 1.000000e+00 : f32
    %78 = vector.broadcast %cst_59 : f32 to vector<8x32xf32>
    %79 = arith.addf %78, %77 : vector<8x32xf32>
    %80 = arith.divf %78, %79 : vector<8x32xf32>
    %81 = vector.extract_strided_slice %74 {offsets = [0, 32], sizes = [8, 32], strides = [1, 1]} : vector<8x128xf32> to vector<8x32xf32>
    %82 = arith.negf %81 : vector<8x32xf32>
    %83 = math.exp %82 : vector<8x32xf32>
    %cst_60 = arith.constant 1.000000e+00 : f32
    %84 = vector.broadcast %cst_60 : f32 to vector<8x32xf32>
    %85 = arith.addf %84, %83 : vector<8x32xf32>
    %86 = arith.divf %84, %85 : vector<8x32xf32>
    %87 = vector.extract_strided_slice %74 {offsets = [0, 64], sizes = [8, 32], strides = [1, 1]} : vector<8x128xf32> to vector<8x32xf32>
    %88 = math.tanh %87 : vector<8x32xf32>
    %89 = vector.extract_strided_slice %74 {offsets = [0, 96], sizes = [8, 32], strides = [1, 1]} : vector<8x128xf32> to vector<8x32xf32>
    %90 = arith.negf %89 : vector<8x32xf32>
    %91 = math.exp %90 : vector<8x32xf32>
    %cst_61 = arith.constant 1.000000e+00 : f32
    %92 = vector.broadcast %cst_61 : f32 to vector<8x32xf32>
    %93 = arith.addf %92, %91 : vector<8x32xf32>
    %94 = arith.divf %92, %93 : vector<8x32xf32>
    %95 = arith.mulf %86, %36 : vector<8x32xf32>
    %96 = arith.mulf %80, %88 : vector<8x32xf32>
    %97 = arith.addf %95, %96 : vector<8x32xf32>
    %98 = math.tanh %97 : vector<8x32xf32>
    %99 = arith.mulf %94, %98 : vector<8x32xf32>
    %100 = arith.addf %37, %68 : vector<8x32xf32>
    %101 = arith.addf %38, %99 : vector<8x32xf32>
    %c1_i32 = arith.constant 1 : i32
    %102 = arith.index_cast %c1_i32 : i32 to index
    %c0_62 = arith.constant 0 : index
    %c0_63 = arith.constant 0 : index
    %103 = vector.load %arg20[%102, %c0_62, %c0_63] : memref<8x8x128xf32, #tpu.memory_space<vmem>>, vector<1x8x128xf32>
    %104 = vector.shape_cast %103 : vector<1x8x128xf32> to vector<8x128xf32>
    %cst_64 = arith.constant dense<0.000000e+00> : vector<8x128xf32>
    %105 = tpu.matmul %68, %31, %cst_64 {dimension_numbers = #tpu.dot_dimension_numbers<[1], [0], [0], [1], [0, 0, 1, 1], [], []>} : vector<8x32xf32>, vector<32x128xf32>, vector<8x128xf32> -> vector<8x128xf32>
    %106 = arith.addf %104, %105 : vector<8x128xf32>
    %107 = vector.extract_strided_slice %106 {offsets = [0, 0], sizes = [8, 32], strides = [1, 1]} : vector<8x128xf32> to vector<8x32xf32>
    %108 = arith.negf %107 : vector<8x32xf32>
    %109 = math.exp %108 : vector<8x32xf32>
    %cst_65 = arith.constant 1.000000e+00 : f32
    %110 = vector.broadcast %cst_65 : f32 to vector<8x32xf32>
    %111 = arith.addf %110, %109 : vector<8x32xf32>
    %112 = arith.divf %110, %111 : vector<8x32xf32>
    %113 = vector.extract_strided_slice %106 {offsets = [0, 32], sizes = [8, 32], strides = [1, 1]} : vector<8x128xf32> to vector<8x32xf32>
    %114 = arith.negf %113 : vector<8x32xf32>
    %115 = math.exp %114 : vector<8x32xf32>
    %cst_66 = arith.constant 1.000000e+00 : f32
    %116 = vector.broadcast %cst_66 : f32 to vector<8x32xf32>
    %117 = arith.addf %116, %115 : vector<8x32xf32>
    %118 = arith.divf %116, %117 : vector<8x32xf32>
    %119 = vector.extract_strided_slice %106 {offsets = [0, 64], sizes = [8, 32], strides = [1, 1]} : vector<8x128xf32> to vector<8x32xf32>
    %120 = math.tanh %119 : vector<8x32xf32>
    %121 = vector.extract_strided_slice %106 {offsets = [0, 96], sizes = [8, 32], strides = [1, 1]} : vector<8x128xf32> to vector<8x32xf32>
    %122 = arith.negf %121 : vector<8x32xf32>
    %123 = math.exp %122 : vector<8x32xf32>
    %cst_67 = arith.constant 1.000000e+00 : f32
    %124 = vector.broadcast %cst_67 : f32 to vector<8x32xf32>
    %125 = arith.addf %124, %123 : vector<8x32xf32>
    %126 = arith.divf %124, %125 : vector<8x32xf32>
    %127 = arith.mulf %118, %66 : vector<8x32xf32>
    %128 = arith.mulf %112, %120 : vector<8x32xf32>
    %129 = arith.addf %127, %128 : vector<8x32xf32>
    %130 = math.tanh %129 : vector<8x32xf32>
    %131 = arith.mulf %126, %130 : vector<8x32xf32>
    %c7_i32_68 = arith.constant 7 : i32
    %132 = arith.subi %c7_i32_68, %c1_i32 : i32
    %133 = arith.index_cast %132 : i32 to index
    %c0_69 = arith.constant 0 : index
    %c0_70 = arith.constant 0 : index
    %134 = vector.load %arg21[%133, %c0_69, %c0_70] : memref<8x8x128xf32, #tpu.memory_space<vmem>>, vector<1x8x128xf32>
    %135 = vector.shape_cast %134 : vector<1x8x128xf32> to vector<8x128xf32>
    %cst_71 = arith.constant dense<0.000000e+00> : vector<8x128xf32>
    %136 = tpu.matmul %99, %32, %cst_71 {dimension_numbers = #tpu.dot_dimension_numbers<[1], [0], [0], [1], [0, 0, 1, 1], [], []>} : vector<8x32xf32>, vector<32x128xf32>, vector<8x128xf32> -> vector<8x128xf32>
    %137 = arith.addf %135, %136 : vector<8x128xf32>
    %138 = vector.extract_strided_slice %137 {offsets = [0, 0], sizes = [8, 32], strides = [1, 1]} : vector<8x128xf32> to vector<8x32xf32>
    %139 = arith.negf %138 : vector<8x32xf32>
    %140 = math.exp %139 : vector<8x32xf32>
    %cst_72 = arith.constant 1.000000e+00 : f32
    %141 = vector.broadcast %cst_72 : f32 to vector<8x32xf32>
    %142 = arith.addf %141, %140 : vector<8x32xf32>
    %143 = arith.divf %141, %142 : vector<8x32xf32>
    %144 = vector.extract_strided_slice %137 {offsets = [0, 32], sizes = [8, 32], strides = [1, 1]} : vector<8x128xf32> to vector<8x32xf32>
    %145 = arith.negf %144 : vector<8x32xf32>
    %146 = math.exp %145 : vector<8x32xf32>
    %cst_73 = arith.constant 1.000000e+00 : f32
    %147 = vector.broadcast %cst_73 : f32 to vector<8x32xf32>
    %148 = arith.addf %147, %146 : vector<8x32xf32>
    %149 = arith.divf %147, %148 : vector<8x32xf32>
    %150 = vector.extract_strided_slice %137 {offsets = [0, 64], sizes = [8, 32], strides = [1, 1]} : vector<8x128xf32> to vector<8x32xf32>
    %151 = math.tanh %150 : vector<8x32xf32>
    %152 = vector.extract_strided_slice %137 {offsets = [0, 96], sizes = [8, 32], strides = [1, 1]} : vector<8x128xf32> to vector<8x32xf32>
    %153 = arith.negf %152 : vector<8x32xf32>
    %154 = math.exp %153 : vector<8x32xf32>
    %cst_74 = arith.constant 1.000000e+00 : f32
    %155 = vector.broadcast %cst_74 : f32 to vector<8x32xf32>
    %156 = arith.addf %155, %154 : vector<8x32xf32>
    %157 = arith.divf %155, %156 : vector<8x32xf32>
    %158 = arith.mulf %149, %97 : vector<8x32xf32>
    %159 = arith.mulf %143, %151 : vector<8x32xf32>
    %160 = arith.addf %158, %159 : vector<8x32xf32>
    %161 = math.tanh %160 : vector<8x32xf32>
    %162 = arith.mulf %157, %161 : vector<8x32xf32>
    %163 = arith.addf %100, %131 : vector<8x32xf32>
    %164 = arith.addf %101, %162 : vector<8x32xf32>
    %c2_i32 = arith.constant 2 : i32
    %165 = arith.index_cast %c2_i32 : i32 to index
    %c0_75 = arith.constant 0 : index
    %c0_76 = arith.constant 0 : index
    %166 = vector.load %arg20[%165, %c0_75, %c0_76] : memref<8x8x128xf32, #tpu.memory_space<vmem>>, vector<1x8x128xf32>
    %167 = vector.shape_cast %166 : vector<1x8x128xf32> to vector<8x128xf32>
    %cst_77 = arith.constant dense<0.000000e+00> : vector<8x128xf32>
    %168 = tpu.matmul %131, %31, %cst_77 {dimension_numbers = #tpu.dot_dimension_numbers<[1], [0], [0], [1], [0, 0, 1, 1], [], []>} : vector<8x32xf32>, vector<32x128xf32>, vector<8x128xf32> -> vector<8x128xf32>
    %169 = arith.addf %167, %168 : vector<8x128xf32>
    %170 = vector.extract_strided_slice %169 {offsets = [0, 0], sizes = [8, 32], strides = [1, 1]} : vector<8x128xf32> to vector<8x32xf32>
    %171 = arith.negf %170 : vector<8x32xf32>
    %172 = math.exp %171 : vector<8x32xf32>
    %cst_78 = arith.constant 1.000000e+00 : f32
    %173 = vector.broadcast %cst_78 : f32 to vector<8x32xf32>
    %174 = arith.addf %173, %172 : vector<8x32xf32>
    %175 = arith.divf %173, %174 : vector<8x32xf32>
    %176 = vector.extract_strided_slice %169 {offsets = [0, 32], sizes = [8, 32], strides = [1, 1]} : vector<8x128xf32> to vector<8x32xf32>
    %177 = arith.negf %176 : vector<8x32xf32>
    %178 = math.exp %177 : vector<8x32xf32>
    %cst_79 = arith.constant 1.000000e+00 : f32
    %179 = vector.broadcast %cst_79 : f32 to vector<8x32xf32>
    %180 = arith.addf %179, %178 : vector<8x32xf32>
    %181 = arith.divf %179, %180 : vector<8x32xf32>
    %182 = vector.extract_strided_slice %169 {offsets = [0, 64], sizes = [8, 32], strides = [1, 1]} : vector<8x128xf32> to vector<8x32xf32>
    %183 = math.tanh %182 : vector<8x32xf32>
    %184 = vector.extract_strided_slice %169 {offsets = [0, 96], sizes = [8, 32], strides = [1, 1]} : vector<8x128xf32> to vector<8x32xf32>
    %185 = arith.negf %184 : vector<8x32xf32>
    %186 = math.exp %185 : vector<8x32xf32>
    %cst_80 = arith.constant 1.000000e+00 : f32
    %187 = vector.broadcast %cst_80 : f32 to vector<8x32xf32>
    %188 = arith.addf %187, %186 : vector<8x32xf32>
    %189 = arith.divf %187, %188 : vector<8x32xf32>
    %190 = arith.mulf %181, %129 : vector<8x32xf32>
    %191 = arith.mulf %175, %183 : vector<8x32xf32>
    %192 = arith.addf %190, %191 : vector<8x32xf32>
    %193 = math.tanh %192 : vector<8x32xf32>
    %194 = arith.mulf %189, %193 : vector<8x32xf32>
    %c7_i32_81 = arith.constant 7 : i32
    %195 = arith.subi %c7_i32_81, %c2_i32 : i32
    %196 = arith.index_cast %195 : i32 to index
    %c0_82 = arith.constant 0 : index
    %c0_83 = arith.constant 0 : index
    %197 = vector.load %arg21[%196, %c0_82, %c0_83] : memref<8x8x128xf32, #tpu.memory_space<vmem>>, vector<1x8x128xf32>
    %198 = vector.shape_cast %197 : vector<1x8x128xf32> to vector<8x128xf32>
    %cst_84 = arith.constant dense<0.000000e+00> : vector<8x128xf32>
    %199 = tpu.matmul %162, %32, %cst_84 {dimension_numbers = #tpu.dot_dimension_numbers<[1], [0], [0], [1], [0, 0, 1, 1], [], []>} : vector<8x32xf32>, vector<32x128xf32>, vector<8x128xf32> -> vector<8x128xf32>
    %200 = arith.addf %198, %199 : vector<8x128xf32>
    %201 = vector.extract_strided_slice %200 {offsets = [0, 0], sizes = [8, 32], strides = [1, 1]} : vector<8x128xf32> to vector<8x32xf32>
    %202 = arith.negf %201 : vector<8x32xf32>
    %203 = math.exp %202 : vector<8x32xf32>
    %cst_85 = arith.constant 1.000000e+00 : f32
    %204 = vector.broadcast %cst_85 : f32 to vector<8x32xf32>
    %205 = arith.addf %204, %203 : vector<8x32xf32>
    %206 = arith.divf %204, %205 : vector<8x32xf32>
    %207 = vector.extract_strided_slice %200 {offsets = [0, 32], sizes = [8, 32], strides = [1, 1]} : vector<8x128xf32> to vector<8x32xf32>
    %208 = arith.negf %207 : vector<8x32xf32>
    %209 = math.exp %208 : vector<8x32xf32>
    %cst_86 = arith.constant 1.000000e+00 : f32
    %210 = vector.broadcast %cst_86 : f32 to vector<8x32xf32>
    %211 = arith.addf %210, %209 : vector<8x32xf32>
    %212 = arith.divf %210, %211 : vector<8x32xf32>
    %213 = vector.extract_strided_slice %200 {offsets = [0, 64], sizes = [8, 32], strides = [1, 1]} : vector<8x128xf32> to vector<8x32xf32>
    %214 = math.tanh %213 : vector<8x32xf32>
    %215 = vector.extract_strided_slice %200 {offsets = [0, 96], sizes = [8, 32], strides = [1, 1]} : vector<8x128xf32> to vector<8x32xf32>
    %216 = arith.negf %215 : vector<8x32xf32>
    %217 = math.exp %216 : vector<8x32xf32>
    %cst_87 = arith.constant 1.000000e+00 : f32
    %218 = vector.broadcast %cst_87 : f32 to vector<8x32xf32>
    %219 = arith.addf %218, %217 : vector<8x32xf32>
    %220 = arith.divf %218, %219 : vector<8x32xf32>
    %221 = arith.mulf %212, %160 : vector<8x32xf32>
    %222 = arith.mulf %206, %214 : vector<8x32xf32>
    %223 = arith.addf %221, %222 : vector<8x32xf32>
    %224 = math.tanh %223 : vector<8x32xf32>
    %225 = arith.mulf %220, %224 : vector<8x32xf32>
    %226 = arith.addf %163, %194 : vector<8x32xf32>
    %227 = arith.addf %164, %225 : vector<8x32xf32>
    %c3_i32 = arith.constant 3 : i32
    %228 = arith.index_cast %c3_i32 : i32 to index
    %c0_88 = arith.constant 0 : index
    %c0_89 = arith.constant 0 : index
    %229 = vector.load %arg20[%228, %c0_88, %c0_89] : memref<8x8x128xf32, #tpu.memory_space<vmem>>, vector<1x8x128xf32>
    %230 = vector.shape_cast %229 : vector<1x8x128xf32> to vector<8x128xf32>
    %cst_90 = arith.constant dense<0.000000e+00> : vector<8x128xf32>
    %231 = tpu.matmul %194, %31, %cst_90 {dimension_numbers = #tpu.dot_dimension_numbers<[1], [0], [0], [1], [0, 0, 1, 1], [], []>} : vector<8x32xf32>, vector<32x128xf32>, vector<8x128xf32> -> vector<8x128xf32>
    %232 = arith.addf %230, %231 : vector<8x128xf32>
    %233 = vector.extract_strided_slice %232 {offsets = [0, 0], sizes = [8, 32], strides = [1, 1]} : vector<8x128xf32> to vector<8x32xf32>
    %234 = arith.negf %233 : vector<8x32xf32>
    %235 = math.exp %234 : vector<8x32xf32>
    %cst_91 = arith.constant 1.000000e+00 : f32
    %236 = vector.broadcast %cst_91 : f32 to vector<8x32xf32>
    %237 = arith.addf %236, %235 : vector<8x32xf32>
    %238 = arith.divf %236, %237 : vector<8x32xf32>
    %239 = vector.extract_strided_slice %232 {offsets = [0, 32], sizes = [8, 32], strides = [1, 1]} : vector<8x128xf32> to vector<8x32xf32>
    %240 = arith.negf %239 : vector<8x32xf32>
    %241 = math.exp %240 : vector<8x32xf32>
    %cst_92 = arith.constant 1.000000e+00 : f32
    %242 = vector.broadcast %cst_92 : f32 to vector<8x32xf32>
    %243 = arith.addf %242, %241 : vector<8x32xf32>
    %244 = arith.divf %242, %243 : vector<8x32xf32>
    %245 = vector.extract_strided_slice %232 {offsets = [0, 64], sizes = [8, 32], strides = [1, 1]} : vector<8x128xf32> to vector<8x32xf32>
    %246 = math.tanh %245 : vector<8x32xf32>
    %247 = vector.extract_strided_slice %232 {offsets = [0, 96], sizes = [8, 32], strides = [1, 1]} : vector<8x128xf32> to vector<8x32xf32>
    %248 = arith.negf %247 : vector<8x32xf32>
    %249 = math.exp %248 : vector<8x32xf32>
    %cst_93 = arith.constant 1.000000e+00 : f32
    %250 = vector.broadcast %cst_93 : f32 to vector<8x32xf32>
    %251 = arith.addf %250, %249 : vector<8x32xf32>
    %252 = arith.divf %250, %251 : vector<8x32xf32>
    %253 = arith.mulf %244, %192 : vector<8x32xf32>
    %254 = arith.mulf %238, %246 : vector<8x32xf32>
    %255 = arith.addf %253, %254 : vector<8x32xf32>
    %256 = math.tanh %255 : vector<8x32xf32>
    %257 = arith.mulf %252, %256 : vector<8x32xf32>
    %c7_i32_94 = arith.constant 7 : i32
    %258 = arith.subi %c7_i32_94, %c3_i32 : i32
    %259 = arith.index_cast %258 : i32 to index
    %c0_95 = arith.constant 0 : index
    %c0_96 = arith.constant 0 : index
    %260 = vector.load %arg21[%259, %c0_95, %c0_96] : memref<8x8x128xf32, #tpu.memory_space<vmem>>, vector<1x8x128xf32>
    %261 = vector.shape_cast %260 : vector<1x8x128xf32> to vector<8x128xf32>
    %cst_97 = arith.constant dense<0.000000e+00> : vector<8x128xf32>
    %262 = tpu.matmul %225, %32, %cst_97 {dimension_numbers = #tpu.dot_dimension_numbers<[1], [0], [0], [1], [0, 0, 1, 1], [], []>} : vector<8x32xf32>, vector<32x128xf32>, vector<8x128xf32> -> vector<8x128xf32>
    %263 = arith.addf %261, %262 : vector<8x128xf32>
    %264 = vector.extract_strided_slice %263 {offsets = [0, 0], sizes = [8, 32], strides = [1, 1]} : vector<8x128xf32> to vector<8x32xf32>
    %265 = arith.negf %264 : vector<8x32xf32>
    %266 = math.exp %265 : vector<8x32xf32>
    %cst_98 = arith.constant 1.000000e+00 : f32
    %267 = vector.broadcast %cst_98 : f32 to vector<8x32xf32>
    %268 = arith.addf %267, %266 : vector<8x32xf32>
    %269 = arith.divf %267, %268 : vector<8x32xf32>
    %270 = vector.extract_strided_slice %263 {offsets = [0, 32], sizes = [8, 32], strides = [1, 1]} : vector<8x128xf32> to vector<8x32xf32>
    %271 = arith.negf %270 : vector<8x32xf32>
    %272 = math.exp %271 : vector<8x32xf32>
    %cst_99 = arith.constant 1.000000e+00 : f32
    %273 = vector.broadcast %cst_99 : f32 to vector<8x32xf32>
    %274 = arith.addf %273, %272 : vector<8x32xf32>
    %275 = arith.divf %273, %274 : vector<8x32xf32>
    %276 = vector.extract_strided_slice %263 {offsets = [0, 64], sizes = [8, 32], strides = [1, 1]} : vector<8x128xf32> to vector<8x32xf32>
    %277 = math.tanh %276 : vector<8x32xf32>
    %278 = vector.extract_strided_slice %263 {offsets = [0, 96], sizes = [8, 32], strides = [1, 1]} : vector<8x128xf32> to vector<8x32xf32>
    %279 = arith.negf %278 : vector<8x32xf32>
    %280 = math.exp %279 : vector<8x32xf32>
    %cst_100 = arith.constant 1.000000e+00 : f32
    %281 = vector.broadcast %cst_100 : f32 to vector<8x32xf32>
    %282 = arith.addf %281, %280 : vector<8x32xf32>
    %283 = arith.divf %281, %282 : vector<8x32xf32>
    %284 = arith.mulf %275, %223 : vector<8x32xf32>
    %285 = arith.mulf %269, %277 : vector<8x32xf32>
    %286 = arith.addf %284, %285 : vector<8x32xf32>
    %287 = math.tanh %286 : vector<8x32xf32>
    %288 = arith.mulf %283, %287 : vector<8x32xf32>
    %289 = arith.addf %226, %257 : vector<8x32xf32>
    %290 = arith.addf %227, %288 : vector<8x32xf32>
    %c4_i32 = arith.constant 4 : i32
    %291 = arith.index_cast %c4_i32 : i32 to index
    %c0_101 = arith.constant 0 : index
    %c0_102 = arith.constant 0 : index
    %292 = vector.load %arg20[%291, %c0_101, %c0_102] : memref<8x8x128xf32, #tpu.memory_space<vmem>>, vector<1x8x128xf32>
    %293 = vector.shape_cast %292 : vector<1x8x128xf32> to vector<8x128xf32>
    %cst_103 = arith.constant dense<0.000000e+00> : vector<8x128xf32>
    %294 = tpu.matmul %257, %31, %cst_103 {dimension_numbers = #tpu.dot_dimension_numbers<[1], [0], [0], [1], [0, 0, 1, 1], [], []>} : vector<8x32xf32>, vector<32x128xf32>, vector<8x128xf32> -> vector<8x128xf32>
    %295 = arith.addf %293, %294 : vector<8x128xf32>
    %296 = vector.extract_strided_slice %295 {offsets = [0, 0], sizes = [8, 32], strides = [1, 1]} : vector<8x128xf32> to vector<8x32xf32>
    %297 = arith.negf %296 : vector<8x32xf32>
    %298 = math.exp %297 : vector<8x32xf32>
    %cst_104 = arith.constant 1.000000e+00 : f32
    %299 = vector.broadcast %cst_104 : f32 to vector<8x32xf32>
    %300 = arith.addf %299, %298 : vector<8x32xf32>
    %301 = arith.divf %299, %300 : vector<8x32xf32>
    %302 = vector.extract_strided_slice %295 {offsets = [0, 32], sizes = [8, 32], strides = [1, 1]} : vector<8x128xf32> to vector<8x32xf32>
    %303 = arith.negf %302 : vector<8x32xf32>
    %304 = math.exp %303 : vector<8x32xf32>
    %cst_105 = arith.constant 1.000000e+00 : f32
    %305 = vector.broadcast %cst_105 : f32 to vector<8x32xf32>
    %306 = arith.addf %305, %304 : vector<8x32xf32>
    %307 = arith.divf %305, %306 : vector<8x32xf32>
    %308 = vector.extract_strided_slice %295 {offsets = [0, 64], sizes = [8, 32], strides = [1, 1]} : vector<8x128xf32> to vector<8x32xf32>
    %309 = math.tanh %308 : vector<8x32xf32>
    %310 = vector.extract_strided_slice %295 {offsets = [0, 96], sizes = [8, 32], strides = [1, 1]} : vector<8x128xf32> to vector<8x32xf32>
    %311 = arith.negf %310 : vector<8x32xf32>
    %312 = math.exp %311 : vector<8x32xf32>
    %cst_106 = arith.constant 1.000000e+00 : f32
    %313 = vector.broadcast %cst_106 : f32 to vector<8x32xf32>
    %314 = arith.addf %313, %312 : vector<8x32xf32>
    %315 = arith.divf %313, %314 : vector<8x32xf32>
    %316 = arith.mulf %307, %255 : vector<8x32xf32>
    %317 = arith.mulf %301, %309 : vector<8x32xf32>
    %318 = arith.addf %316, %317 : vector<8x32xf32>
    %319 = math.tanh %318 : vector<8x32xf32>
    %320 = arith.mulf %315, %319 : vector<8x32xf32>
    %c7_i32_107 = arith.constant 7 : i32
    %321 = arith.subi %c7_i32_107, %c4_i32 : i32
    %322 = arith.index_cast %321 : i32 to index
    %c0_108 = arith.constant 0 : index
    %c0_109 = arith.constant 0 : index
    %323 = vector.load %arg21[%322, %c0_108, %c0_109] : memref<8x8x128xf32, #tpu.memory_space<vmem>>, vector<1x8x128xf32>
    %324 = vector.shape_cast %323 : vector<1x8x128xf32> to vector<8x128xf32>
    %cst_110 = arith.constant dense<0.000000e+00> : vector<8x128xf32>
    %325 = tpu.matmul %288, %32, %cst_110 {dimension_numbers = #tpu.dot_dimension_numbers<[1], [0], [0], [1], [0, 0, 1, 1], [], []>} : vector<8x32xf32>, vector<32x128xf32>, vector<8x128xf32> -> vector<8x128xf32>
    %326 = arith.addf %324, %325 : vector<8x128xf32>
    %327 = vector.extract_strided_slice %326 {offsets = [0, 0], sizes = [8, 32], strides = [1, 1]} : vector<8x128xf32> to vector<8x32xf32>
    %328 = arith.negf %327 : vector<8x32xf32>
    %329 = math.exp %328 : vector<8x32xf32>
    %cst_111 = arith.constant 1.000000e+00 : f32
    %330 = vector.broadcast %cst_111 : f32 to vector<8x32xf32>
    %331 = arith.addf %330, %329 : vector<8x32xf32>
    %332 = arith.divf %330, %331 : vector<8x32xf32>
    %333 = vector.extract_strided_slice %326 {offsets = [0, 32], sizes = [8, 32], strides = [1, 1]} : vector<8x128xf32> to vector<8x32xf32>
    %334 = arith.negf %333 : vector<8x32xf32>
    %335 = math.exp %334 : vector<8x32xf32>
    %cst_112 = arith.constant 1.000000e+00 : f32
    %336 = vector.broadcast %cst_112 : f32 to vector<8x32xf32>
    %337 = arith.addf %336, %335 : vector<8x32xf32>
    %338 = arith.divf %336, %337 : vector<8x32xf32>
    %339 = vector.extract_strided_slice %326 {offsets = [0, 64], sizes = [8, 32], strides = [1, 1]} : vector<8x128xf32> to vector<8x32xf32>
    %340 = math.tanh %339 : vector<8x32xf32>
    %341 = vector.extract_strided_slice %326 {offsets = [0, 96], sizes = [8, 32], strides = [1, 1]} : vector<8x128xf32> to vector<8x32xf32>
    %342 = arith.negf %341 : vector<8x32xf32>
    %343 = math.exp %342 : vector<8x32xf32>
    %cst_113 = arith.constant 1.000000e+00 : f32
    %344 = vector.broadcast %cst_113 : f32 to vector<8x32xf32>
    %345 = arith.addf %344, %343 : vector<8x32xf32>
    %346 = arith.divf %344, %345 : vector<8x32xf32>
    %347 = arith.mulf %338, %286 : vector<8x32xf32>
    %348 = arith.mulf %332, %340 : vector<8x32xf32>
    %349 = arith.addf %347, %348 : vector<8x32xf32>
    %350 = math.tanh %349 : vector<8x32xf32>
    %351 = arith.mulf %346, %350 : vector<8x32xf32>
    %352 = arith.addf %289, %320 : vector<8x32xf32>
    %353 = arith.addf %290, %351 : vector<8x32xf32>
    %c5_i32 = arith.constant 5 : i32
    %354 = arith.index_cast %c5_i32 : i32 to index
    %c0_114 = arith.constant 0 : index
    %c0_115 = arith.constant 0 : index
    %355 = vector.load %arg20[%354, %c0_114, %c0_115] : memref<8x8x128xf32, #tpu.memory_space<vmem>>, vector<1x8x128xf32>
    %356 = vector.shape_cast %355 : vector<1x8x128xf32> to vector<8x128xf32>
    %cst_116 = arith.constant dense<0.000000e+00> : vector<8x128xf32>
    %357 = tpu.matmul %320, %31, %cst_116 {dimension_numbers = #tpu.dot_dimension_numbers<[1], [0], [0], [1], [0, 0, 1, 1], [], []>} : vector<8x32xf32>, vector<32x128xf32>, vector<8x128xf32> -> vector<8x128xf32>
    %358 = arith.addf %356, %357 : vector<8x128xf32>
    %359 = vector.extract_strided_slice %358 {offsets = [0, 0], sizes = [8, 32], strides = [1, 1]} : vector<8x128xf32> to vector<8x32xf32>
    %360 = arith.negf %359 : vector<8x32xf32>
    %361 = math.exp %360 : vector<8x32xf32>
    %cst_117 = arith.constant 1.000000e+00 : f32
    %362 = vector.broadcast %cst_117 : f32 to vector<8x32xf32>
    %363 = arith.addf %362, %361 : vector<8x32xf32>
    %364 = arith.divf %362, %363 : vector<8x32xf32>
    %365 = vector.extract_strided_slice %358 {offsets = [0, 32], sizes = [8, 32], strides = [1, 1]} : vector<8x128xf32> to vector<8x32xf32>
    %366 = arith.negf %365 : vector<8x32xf32>
    %367 = math.exp %366 : vector<8x32xf32>
    %cst_118 = arith.constant 1.000000e+00 : f32
    %368 = vector.broadcast %cst_118 : f32 to vector<8x32xf32>
    %369 = arith.addf %368, %367 : vector<8x32xf32>
    %370 = arith.divf %368, %369 : vector<8x32xf32>
    %371 = vector.extract_strided_slice %358 {offsets = [0, 64], sizes = [8, 32], strides = [1, 1]} : vector<8x128xf32> to vector<8x32xf32>
    %372 = math.tanh %371 : vector<8x32xf32>
    %373 = vector.extract_strided_slice %358 {offsets = [0, 96], sizes = [8, 32], strides = [1, 1]} : vector<8x128xf32> to vector<8x32xf32>
    %374 = arith.negf %373 : vector<8x32xf32>
    %375 = math.exp %374 : vector<8x32xf32>
    %cst_119 = arith.constant 1.000000e+00 : f32
    %376 = vector.broadcast %cst_119 : f32 to vector<8x32xf32>
    %377 = arith.addf %376, %375 : vector<8x32xf32>
    %378 = arith.divf %376, %377 : vector<8x32xf32>
    %379 = arith.mulf %370, %318 : vector<8x32xf32>
    %380 = arith.mulf %364, %372 : vector<8x32xf32>
    %381 = arith.addf %379, %380 : vector<8x32xf32>
    %382 = math.tanh %381 : vector<8x32xf32>
    %383 = arith.mulf %378, %382 : vector<8x32xf32>
    %c7_i32_120 = arith.constant 7 : i32
    %384 = arith.subi %c7_i32_120, %c5_i32 : i32
    %385 = arith.index_cast %384 : i32 to index
    %c0_121 = arith.constant 0 : index
    %c0_122 = arith.constant 0 : index
    %386 = vector.load %arg21[%385, %c0_121, %c0_122] : memref<8x8x128xf32, #tpu.memory_space<vmem>>, vector<1x8x128xf32>
    %387 = vector.shape_cast %386 : vector<1x8x128xf32> to vector<8x128xf32>
    %cst_123 = arith.constant dense<0.000000e+00> : vector<8x128xf32>
    %388 = tpu.matmul %351, %32, %cst_123 {dimension_numbers = #tpu.dot_dimension_numbers<[1], [0], [0], [1], [0, 0, 1, 1], [], []>} : vector<8x32xf32>, vector<32x128xf32>, vector<8x128xf32> -> vector<8x128xf32>
    %389 = arith.addf %387, %388 : vector<8x128xf32>
    %390 = vector.extract_strided_slice %389 {offsets = [0, 0], sizes = [8, 32], strides = [1, 1]} : vector<8x128xf32> to vector<8x32xf32>
    %391 = arith.negf %390 : vector<8x32xf32>
    %392 = math.exp %391 : vector<8x32xf32>
    %cst_124 = arith.constant 1.000000e+00 : f32
    %393 = vector.broadcast %cst_124 : f32 to vector<8x32xf32>
    %394 = arith.addf %393, %392 : vector<8x32xf32>
    %395 = arith.divf %393, %394 : vector<8x32xf32>
    %396 = vector.extract_strided_slice %389 {offsets = [0, 32], sizes = [8, 32], strides = [1, 1]} : vector<8x128xf32> to vector<8x32xf32>
    %397 = arith.negf %396 : vector<8x32xf32>
    %398 = math.exp %397 : vector<8x32xf32>
    %cst_125 = arith.constant 1.000000e+00 : f32
    %399 = vector.broadcast %cst_125 : f32 to vector<8x32xf32>
    %400 = arith.addf %399, %398 : vector<8x32xf32>
    %401 = arith.divf %399, %400 : vector<8x32xf32>
    %402 = vector.extract_strided_slice %389 {offsets = [0, 64], sizes = [8, 32], strides = [1, 1]} : vector<8x128xf32> to vector<8x32xf32>
    %403 = math.tanh %402 : vector<8x32xf32>
    %404 = vector.extract_strided_slice %389 {offsets = [0, 96], sizes = [8, 32], strides = [1, 1]} : vector<8x128xf32> to vector<8x32xf32>
    %405 = arith.negf %404 : vector<8x32xf32>
    %406 = math.exp %405 : vector<8x32xf32>
    %cst_126 = arith.constant 1.000000e+00 : f32
    %407 = vector.broadcast %cst_126 : f32 to vector<8x32xf32>
    %408 = arith.addf %407, %406 : vector<8x32xf32>
    %409 = arith.divf %407, %408 : vector<8x32xf32>
    %410 = arith.mulf %401, %349 : vector<8x32xf32>
    %411 = arith.mulf %395, %403 : vector<8x32xf32>
    %412 = arith.addf %410, %411 : vector<8x32xf32>
    %413 = math.tanh %412 : vector<8x32xf32>
    %414 = arith.mulf %409, %413 : vector<8x32xf32>
    %415 = arith.addf %352, %383 : vector<8x32xf32>
    %416 = arith.addf %353, %414 : vector<8x32xf32>
    %c6_i32 = arith.constant 6 : i32
    %417 = arith.index_cast %c6_i32 : i32 to index
    %c0_127 = arith.constant 0 : index
    %c0_128 = arith.constant 0 : index
    %418 = vector.load %arg20[%417, %c0_127, %c0_128] : memref<8x8x128xf32, #tpu.memory_space<vmem>>, vector<1x8x128xf32>
    %419 = vector.shape_cast %418 : vector<1x8x128xf32> to vector<8x128xf32>
    %cst_129 = arith.constant dense<0.000000e+00> : vector<8x128xf32>
    %420 = tpu.matmul %383, %31, %cst_129 {dimension_numbers = #tpu.dot_dimension_numbers<[1], [0], [0], [1], [0, 0, 1, 1], [], []>} : vector<8x32xf32>, vector<32x128xf32>, vector<8x128xf32> -> vector<8x128xf32>
    %421 = arith.addf %419, %420 : vector<8x128xf32>
    %422 = vector.extract_strided_slice %421 {offsets = [0, 0], sizes = [8, 32], strides = [1, 1]} : vector<8x128xf32> to vector<8x32xf32>
    %423 = arith.negf %422 : vector<8x32xf32>
    %424 = math.exp %423 : vector<8x32xf32>
    %cst_130 = arith.constant 1.000000e+00 : f32
    %425 = vector.broadcast %cst_130 : f32 to vector<8x32xf32>
    %426 = arith.addf %425, %424 : vector<8x32xf32>
    %427 = arith.divf %425, %426 : vector<8x32xf32>
    %428 = vector.extract_strided_slice %421 {offsets = [0, 32], sizes = [8, 32], strides = [1, 1]} : vector<8x128xf32> to vector<8x32xf32>
    %429 = arith.negf %428 : vector<8x32xf32>
    %430 = math.exp %429 : vector<8x32xf32>
    %cst_131 = arith.constant 1.000000e+00 : f32
    %431 = vector.broadcast %cst_131 : f32 to vector<8x32xf32>
    %432 = arith.addf %431, %430 : vector<8x32xf32>
    %433 = arith.divf %431, %432 : vector<8x32xf32>
    %434 = vector.extract_strided_slice %421 {offsets = [0, 64], sizes = [8, 32], strides = [1, 1]} : vector<8x128xf32> to vector<8x32xf32>
    %435 = math.tanh %434 : vector<8x32xf32>
    %436 = vector.extract_strided_slice %421 {offsets = [0, 96], sizes = [8, 32], strides = [1, 1]} : vector<8x128xf32> to vector<8x32xf32>
    %437 = arith.negf %436 : vector<8x32xf32>
    %438 = math.exp %437 : vector<8x32xf32>
    %cst_132 = arith.constant 1.000000e+00 : f32
    %439 = vector.broadcast %cst_132 : f32 to vector<8x32xf32>
    %440 = arith.addf %439, %438 : vector<8x32xf32>
    %441 = arith.divf %439, %440 : vector<8x32xf32>
    %442 = arith.mulf %433, %381 : vector<8x32xf32>
    %443 = arith.mulf %427, %435 : vector<8x32xf32>
    %444 = arith.addf %442, %443 : vector<8x32xf32>
    %445 = math.tanh %444 : vector<8x32xf32>
    %446 = arith.mulf %441, %445 : vector<8x32xf32>
    %c7_i32_133 = arith.constant 7 : i32
    %447 = arith.subi %c7_i32_133, %c6_i32 : i32
    %448 = arith.index_cast %447 : i32 to index
    %c0_134 = arith.constant 0 : index
    %c0_135 = arith.constant 0 : index
    %449 = vector.load %arg21[%448, %c0_134, %c0_135] : memref<8x8x128xf32, #tpu.memory_space<vmem>>, vector<1x8x128xf32>
    %450 = vector.shape_cast %449 : vector<1x8x128xf32> to vector<8x128xf32>
    %cst_136 = arith.constant dense<0.000000e+00> : vector<8x128xf32>
    %451 = tpu.matmul %414, %32, %cst_136 {dimension_numbers = #tpu.dot_dimension_numbers<[1], [0], [0], [1], [0, 0, 1, 1], [], []>} : vector<8x32xf32>, vector<32x128xf32>, vector<8x128xf32> -> vector<8x128xf32>
    %452 = arith.addf %450, %451 : vector<8x128xf32>
    %453 = vector.extract_strided_slice %452 {offsets = [0, 0], sizes = [8, 32], strides = [1, 1]} : vector<8x128xf32> to vector<8x32xf32>
    %454 = arith.negf %453 : vector<8x32xf32>
    %455 = math.exp %454 : vector<8x32xf32>
    %cst_137 = arith.constant 1.000000e+00 : f32
    %456 = vector.broadcast %cst_137 : f32 to vector<8x32xf32>
    %457 = arith.addf %456, %455 : vector<8x32xf32>
    %458 = arith.divf %456, %457 : vector<8x32xf32>
    %459 = vector.extract_strided_slice %452 {offsets = [0, 32], sizes = [8, 32], strides = [1, 1]} : vector<8x128xf32> to vector<8x32xf32>
    %460 = arith.negf %459 : vector<8x32xf32>
    %461 = math.exp %460 : vector<8x32xf32>
    %cst_138 = arith.constant 1.000000e+00 : f32
    %462 = vector.broadcast %cst_138 : f32 to vector<8x32xf32>
    %463 = arith.addf %462, %461 : vector<8x32xf32>
    %464 = arith.divf %462, %463 : vector<8x32xf32>
    %465 = vector.extract_strided_slice %452 {offsets = [0, 64], sizes = [8, 32], strides = [1, 1]} : vector<8x128xf32> to vector<8x32xf32>
    %466 = math.tanh %465 : vector<8x32xf32>
    %467 = vector.extract_strided_slice %452 {offsets = [0, 96], sizes = [8, 32], strides = [1, 1]} : vector<8x128xf32> to vector<8x32xf32>
    %468 = arith.negf %467 : vector<8x32xf32>
    %469 = math.exp %468 : vector<8x32xf32>
    %cst_139 = arith.constant 1.000000e+00 : f32
    %470 = vector.broadcast %cst_139 : f32 to vector<8x32xf32>
    %471 = arith.addf %470, %469 : vector<8x32xf32>
    %472 = arith.divf %470, %471 : vector<8x32xf32>
    %473 = arith.mulf %464, %412 : vector<8x32xf32>
    %474 = arith.mulf %458, %466 : vector<8x32xf32>
    %475 = arith.addf %473, %474 : vector<8x32xf32>
    %476 = math.tanh %475 : vector<8x32xf32>
    %477 = arith.mulf %472, %476 : vector<8x32xf32>
    %478 = arith.addf %415, %446 : vector<8x32xf32>
    %479 = arith.addf %416, %477 : vector<8x32xf32>
    %c7_i32_140 = arith.constant 7 : i32
    %480 = arith.index_cast %c7_i32_140 : i32 to index
    %c0_141 = arith.constant 0 : index
    %c0_142 = arith.constant 0 : index
    %481 = vector.load %arg20[%480, %c0_141, %c0_142] : memref<8x8x128xf32, #tpu.memory_space<vmem>>, vector<1x8x128xf32>
    %482 = vector.shape_cast %481 : vector<1x8x128xf32> to vector<8x128xf32>
    %cst_143 = arith.constant dense<0.000000e+00> : vector<8x128xf32>
    %483 = tpu.matmul %446, %31, %cst_143 {dimension_numbers = #tpu.dot_dimension_numbers<[1], [0], [0], [1], [0, 0, 1, 1], [], []>} : vector<8x32xf32>, vector<32x128xf32>, vector<8x128xf32> -> vector<8x128xf32>
    %484 = arith.addf %482, %483 : vector<8x128xf32>
    %485 = vector.extract_strided_slice %484 {offsets = [0, 0], sizes = [8, 32], strides = [1, 1]} : vector<8x128xf32> to vector<8x32xf32>
    %486 = arith.negf %485 : vector<8x32xf32>
    %487 = math.exp %486 : vector<8x32xf32>
    %cst_144 = arith.constant 1.000000e+00 : f32
    %488 = vector.broadcast %cst_144 : f32 to vector<8x32xf32>
    %489 = arith.addf %488, %487 : vector<8x32xf32>
    %490 = arith.divf %488, %489 : vector<8x32xf32>
    %491 = vector.extract_strided_slice %484 {offsets = [0, 32], sizes = [8, 32], strides = [1, 1]} : vector<8x128xf32> to vector<8x32xf32>
    %492 = arith.negf %491 : vector<8x32xf32>
    %493 = math.exp %492 : vector<8x32xf32>
    %cst_145 = arith.constant 1.000000e+00 : f32
    %494 = vector.broadcast %cst_145 : f32 to vector<8x32xf32>
    %495 = arith.addf %494, %493 : vector<8x32xf32>
    %496 = arith.divf %494, %495 : vector<8x32xf32>
    %497 = vector.extract_strided_slice %484 {offsets = [0, 64], sizes = [8, 32], strides = [1, 1]} : vector<8x128xf32> to vector<8x32xf32>
    %498 = math.tanh %497 : vector<8x32xf32>
    %499 = vector.extract_strided_slice %484 {offsets = [0, 96], sizes = [8, 32], strides = [1, 1]} : vector<8x128xf32> to vector<8x32xf32>
    %500 = arith.negf %499 : vector<8x32xf32>
    %501 = math.exp %500 : vector<8x32xf32>
    %cst_146 = arith.constant 1.000000e+00 : f32
    %502 = vector.broadcast %cst_146 : f32 to vector<8x32xf32>
    %503 = arith.addf %502, %501 : vector<8x32xf32>
    %504 = arith.divf %502, %503 : vector<8x32xf32>
    %505 = arith.mulf %496, %444 : vector<8x32xf32>
    %506 = arith.mulf %490, %498 : vector<8x32xf32>
    %507 = arith.addf %505, %506 : vector<8x32xf32>
    %508 = math.tanh %507 : vector<8x32xf32>
    %509 = arith.mulf %504, %508 : vector<8x32xf32>
    %c7_i32_147 = arith.constant 7 : i32
    %510 = arith.subi %c7_i32_147, %c7_i32_140 : i32
    %511 = arith.index_cast %510 : i32 to index
    %c0_148 = arith.constant 0 : index
    %c0_149 = arith.constant 0 : index
    %512 = vector.load %arg21[%511, %c0_148, %c0_149] : memref<8x8x128xf32, #tpu.memory_space<vmem>>, vector<1x8x128xf32>
    %513 = vector.shape_cast %512 : vector<1x8x128xf32> to vector<8x128xf32>
    %cst_150 = arith.constant dense<0.000000e+00> : vector<8x128xf32>
    %514 = tpu.matmul %477, %32, %cst_150 {dimension_numbers = #tpu.dot_dimension_numbers<[1], [0], [0], [1], [0, 0, 1, 1], [], []>} : vector<8x32xf32>, vector<32x128xf32>, vector<8x128xf32> -> vector<8x128xf32>
    %515 = arith.addf %513, %514 : vector<8x128xf32>
    %516 = vector.extract_strided_slice %515 {offsets = [0, 0], sizes = [8, 32], strides = [1, 1]} : vector<8x128xf32> to vector<8x32xf32>
    %517 = arith.negf %516 : vector<8x32xf32>
    %518 = math.exp %517 : vector<8x32xf32>
    %cst_151 = arith.constant 1.000000e+00 : f32
    %519 = vector.broadcast %cst_151 : f32 to vector<8x32xf32>
    %520 = arith.addf %519, %518 : vector<8x32xf32>
    %521 = arith.divf %519, %520 : vector<8x32xf32>
    %522 = vector.extract_strided_slice %515 {offsets = [0, 32], sizes = [8, 32], strides = [1, 1]} : vector<8x128xf32> to vector<8x32xf32>
    %523 = arith.negf %522 : vector<8x32xf32>
    %524 = math.exp %523 : vector<8x32xf32>
    %cst_152 = arith.constant 1.000000e+00 : f32
    %525 = vector.broadcast %cst_152 : f32 to vector<8x32xf32>
    %526 = arith.addf %525, %524 : vector<8x32xf32>
    %527 = arith.divf %525, %526 : vector<8x32xf32>
    %528 = vector.extract_strided_slice %515 {offsets = [0, 64], sizes = [8, 32], strides = [1, 1]} : vector<8x128xf32> to vector<8x32xf32>
    %529 = math.tanh %528 : vector<8x32xf32>
    %530 = vector.extract_strided_slice %515 {offsets = [0, 96], sizes = [8, 32], strides = [1, 1]} : vector<8x128xf32> to vector<8x32xf32>
    %531 = arith.negf %530 : vector<8x32xf32>
    %532 = math.exp %531 : vector<8x32xf32>
    %cst_153 = arith.constant 1.000000e+00 : f32
    %533 = vector.broadcast %cst_153 : f32 to vector<8x32xf32>
    %534 = arith.addf %533, %532 : vector<8x32xf32>
    %535 = arith.divf %533, %534 : vector<8x32xf32>
    %536 = arith.mulf %527, %475 : vector<8x32xf32>
    %537 = arith.mulf %521, %529 : vector<8x32xf32>
    %538 = arith.addf %536, %537 : vector<8x32xf32>
    %539 = math.tanh %538 : vector<8x32xf32>
    %540 = arith.mulf %535, %539 : vector<8x32xf32>
    %541 = arith.addf %478, %509 : vector<8x32xf32>
    %542 = arith.addf %479, %540 : vector<8x32xf32>
    %c8_i32 = arith.constant 8 : i32
    %c0_154 = arith.constant 0 : index
    %c0_155 = arith.constant 0 : index
    %543 = vector.load %arg16[%c0_154, %c0_155] : memref<8x32xf32, #tpu.memory_space<vmem>>, vector<8x32xf32>
    tpu.vector_store %arg16[%c0_154, %c0_155], %509 {strides = array<i32>} : memref<8x32xf32, #tpu.memory_space<vmem>>, vector<8x32xf32>,
    %c0_156 = arith.constant 0 : index
    %c0_157 = arith.constant 0 : index
    %544 = vector.load %arg17[%c0_156, %c0_157] : memref<8x32xf32, #tpu.memory_space<vmem>>, vector<8x32xf32>
    tpu.vector_store %arg17[%c0_156, %c0_157], %507 {strides = array<i32>} : memref<8x32xf32, #tpu.memory_space<vmem>>, vector<8x32xf32>,
    %c0_158 = arith.constant 0 : index
    %c0_159 = arith.constant 0 : index
    %545 = vector.load %arg18[%c0_158, %c0_159] : memref<8x32xf32, #tpu.memory_space<vmem>>, vector<8x32xf32>
    tpu.vector_store %arg18[%c0_158, %c0_159], %540 {strides = array<i32>} : memref<8x32xf32, #tpu.memory_space<vmem>>, vector<8x32xf32>,
    %c0_160 = arith.constant 0 : index
    %c0_161 = arith.constant 0 : index
    %546 = vector.load %arg19[%c0_160, %c0_161] : memref<8x32xf32, #tpu.memory_space<vmem>>, vector<8x32xf32>
    tpu.vector_store %arg19[%c0_160, %c0_161], %538 {strides = array<i32>} : memref<8x32xf32, #tpu.memory_space<vmem>>, vector<8x32xf32>,
    %c0_162 = arith.constant 0 : index
    %c0_163 = arith.constant 0 : index
    %547 = vector.load %arg22[%c0_162, %c0_163] : memref<8x32xf32, #tpu.memory_space<vmem>>, vector<8x32xf32>
    tpu.vector_store %arg22[%c0_162, %c0_163], %541 {strides = array<i32>} : memref<8x32xf32, #tpu.memory_space<vmem>>, vector<8x32xf32>,
    %c0_164 = arith.constant 0 : index
    %c0_165 = arith.constant 0 : index
    %548 = vector.load %arg23[%c0_164, %c0_165] : memref<8x32xf32, #tpu.memory_space<vmem>>, vector<8x32xf32>
    tpu.vector_store %arg23[%c0_164, %c0_165], %542 {strides = array<i32>} : memref<8x32xf32, #tpu.memory_space<vmem>>, vector<8x32xf32>,
    %c0_i32_166 = arith.constant 0 : i32
    %549 = arith.cmpi eq, %arg0, %c0_i32_166 : i32
    %550 = arith.extui %549 : i1 to i32
    %c0_i32_167 = arith.constant 0 : i32
    %551 = arith.cmpi ne, %550, %c0_i32_167 : i32
    scf.if %551 {
      %cst_168 = arith.constant 1.250000e-01 : f32
      %552 = vector.broadcast %cst_168 : f32 to vector<8x32xf32>
      %553 = arith.mulf %541, %552 : vector<8x32xf32>
      %cst_169 = arith.constant 1.250000e-01 : f32
      %554 = vector.broadcast %cst_169 : f32 to vector<8x32xf32>
      %555 = arith.mulf %542, %554 : vector<8x32xf32>
      %c0_170 = arith.constant 0 : index
      %c0_171 = arith.constant 0 : index
      %c0_172 = arith.constant 0 : index
      %556 = vector.load %arg13[%c0_170, %c0_171, %c0_172] : memref<2x32x4xf32, #tpu.memory_space<vmem>>, vector<1x32x4xf32>
      %557 = vector.shape_cast %556 : vector<1x32x4xf32> to vector<32x4xf32>
      %cst_173 = arith.constant dense<0.000000e+00> : vector<8x4xf32>
      %558 = tpu.matmul %553, %557, %cst_173 {dimension_numbers = #tpu.dot_dimension_numbers<[1], [0], [0], [1], [0, 0, 1, 1], [], []>} : vector<8x32xf32>, vector<32x4xf32>, vector<8x4xf32> -> vector<8x4xf32>
      %c1 = arith.constant 1 : index
      %c0_174 = arith.constant 0 : index
      %c0_175 = arith.constant 0 : index
      %559 = vector.load %arg13[%c1, %c0_174, %c0_175] : memref<2x32x4xf32, #tpu.memory_space<vmem>>, vector<1x32x4xf32>
      %560 = vector.shape_cast %559 : vector<1x32x4xf32> to vector<32x4xf32>
      %cst_176 = arith.constant dense<0.000000e+00> : vector<8x4xf32>
      %561 = tpu.matmul %555, %560, %cst_176 {dimension_numbers = #tpu.dot_dimension_numbers<[1], [0], [0], [1], [0, 0, 1, 1], [], []>} : vector<8x32xf32>, vector<32x4xf32>, vector<8x4xf32> -> vector<8x4xf32>
      %562 = arith.addf %558, %561 : vector<8x4xf32>
      %c0_177 = arith.constant 0 : index
      %c0_178 = arith.constant 0 : index
      %563 = vector.load %arg14[%c0_177, %c0_178] : memref<1x4xf32, #tpu.memory_space<vmem>>, vector<1x4xf32>
      %564 = vector.broadcast %563 : vector<1x4xf32> to vector<8x4xf32>
      %565 = arith.addf %562, %564 : vector<8x4xf32>
      %c0_179 = arith.constant 0 : index
      %c0_180 = arith.constant 0 : index
      %566 = vector.load %arg15[%c0_179, %c0_180] : memref<8x4xf32, #tpu.memory_space<vmem>>, vector<8x4xf32>
      tpu.vector_store %arg15[%c0_179, %c0_180], %565 {strides = array<i32>} : memref<8x4xf32, #tpu.memory_space<vmem>>, vector<8x4xf32>,
    } else {
    }
    return
  }
  func.func @transform_0(%arg0: i32) -> (i32, i32, i32) {
    %c0_i32 = arith.constant 0 : i32
    %c0_i32_0 = arith.constant 0 : i32
    %c0_i32_1 = arith.constant 0 : i32
    return %arg0, %c0_i32, %c0_i32_0 : i32, i32, i32
  }
  func.func @transform_1(%arg0: i32) -> (i32, i32, i32) {
    %c0_i32 = arith.constant 0 : i32
    %c0_i32_0 = arith.constant 0 : i32
    %c0_i32_1 = arith.constant 0 : i32
    return %arg0, %c0_i32, %c0_i32_0 : i32, i32, i32
  }
  func.func @transform_2(%arg0: i32) -> (i32, i32, i32) {
    %c0_i32 = arith.constant 0 : i32
    %0 = arith.subi %c0_i32, %arg0 : i32
    %c0_i32_0 = arith.constant 0 : i32
    %c0_i32_1 = arith.constant 0 : i32
    %c0_i32_2 = arith.constant 0 : i32
    return %0, %c0_i32_0, %c0_i32_1 : i32, i32, i32
  }
  func.func @transform_3(%arg0: i32) -> (i32, i32, i32) {
    %c0_i32 = arith.constant 0 : i32
    %0 = arith.subi %c0_i32, %arg0 : i32
    %c0_i32_0 = arith.constant 0 : i32
    %c0_i32_1 = arith.constant 0 : i32
    %c0_i32_2 = arith.constant 0 : i32
    return %0, %c0_i32_0, %c0_i32_1 : i32, i32, i32
  }
  func.func @transform_4(%arg0: i32) -> (i32, i32) {
    %c0_i32 = arith.constant 0 : i32
    %c0_i32_0 = arith.constant 0 : i32
    %c0_i32_1 = arith.constant 0 : i32
    return %c0_i32, %c0_i32_0 : i32, i32
  }
  func.func @transform_5(%arg0: i32) -> (i32, i32) {
    %c0_i32 = arith.constant 0 : i32
    %c0_i32_0 = arith.constant 0 : i32
    %c0_i32_1 = arith.constant 0 : i32
    return %c0_i32, %c0_i32_0 : i32, i32
  }
  func.func @transform_6(%arg0: i32) -> (i32, i32) {
    %c0_i32 = arith.constant 0 : i32
    %c0_i32_0 = arith.constant 0 : i32
    %c0_i32_1 = arith.constant 0 : i32
    return %c0_i32, %c0_i32_0 : i32, i32
  }
  func.func @transform_7(%arg0: i32) -> (i32, i32) {
    %c0_i32 = arith.constant 0 : i32
    %c0_i32_0 = arith.constant 0 : i32
    %c0_i32_1 = arith.constant 0 : i32
    return %c0_i32, %c0_i32_0 : i32, i32
  }
  func.func @transform_8(%arg0: i32) -> (i32, i32) {
    %c0_i32 = arith.constant 0 : i32
    %c0_i32_0 = arith.constant 0 : i32
    %c0_i32_1 = arith.constant 0 : i32
    return %c0_i32, %c0_i32_0 : i32, i32
  }
  func.func @transform_9(%arg0: i32) -> (i32, i32) {
    %c0_i32 = arith.constant 0 : i32
    %c0_i32_0 = arith.constant 0 : i32
    %c0_i32_1 = arith.constant 0 : i32
    return %c0_i32, %c0_i32_0 : i32, i32
  }
  func.func @transform_10(%arg0: i32) -> (i32, i32) {
    %c0_i32 = arith.constant 0 : i32
    %c0_i32_0 = arith.constant 0 : i32
    %c0_i32_1 = arith.constant 0 : i32
    return %c0_i32, %c0_i32_0 : i32, i32
  }
  func.func @transform_11(%arg0: i32) -> (i32, i32) {
    %c0_i32 = arith.constant 0 : i32
    %c0_i32_0 = arith.constant 0 : i32
    %c0_i32_1 = arith.constant 0 : i32
    return %c0_i32, %c0_i32_0 : i32, i32
  }
  func.func @transform_12(%arg0: i32) -> (i32, i32, i32) {
    %c0_i32 = arith.constant 0 : i32
    %c0_i32_0 = arith.constant 0 : i32
    %c0_i32_1 = arith.constant 0 : i32
    %c0_i32_2 = arith.constant 0 : i32
    return %c0_i32, %c0_i32_0, %c0_i32_1 : i32, i32, i32
  }
  func.func @transform_13(%arg0: i32) -> (i32, i32) {
    %c0_i32 = arith.constant 0 : i32
    %c0_i32_0 = arith.constant 0 : i32
    %c0_i32_1 = arith.constant 0 : i32
    return %c0_i32, %c0_i32_0 : i32, i32
  }
  func.func @transform_14(%arg0: i32) -> (i32, i32) {
    %c0_i32 = arith.constant 0 : i32
    %c0_i32_0 = arith.constant 0 : i32
    %c0_i32_1 = arith.constant 0 : i32
    return %c0_i32, %c0_i32_0 : i32, i32
  }
}

</mosaic_0001>

<bundles_post_ra>
// kernel: lstm_model_forward.2
= control target key start
LH: loop header
LB: loop body
LE: loop exit
PB: predicated region body
PF: predicated region fallthrough
CT: control target
= control target key end

     0   :  { %vm93_vm0 = vcmask 130048   ;;  %vm71_vm1 = vcmask 261120   ;;  %v2742_v6 = vmov 0.0   ;;  %v2743_v15 = vmov 0.0|0.0   ;;  %s2744_s30 = smov 32   ;;  %s2747_s19 = smov 96   ;;  %s3216_s2 = inlined_call_operand.vmem [shape: f32[16,128], index: 2, kind: input, shape index: {}]   ;;  %s3217_s0 = inlined_call_operand.vmem [shape: f32[8,8,16], index: 0, kind: input, shape index: {}, may-alias: {0,1}]   ;;  %s3218_s3 = inlined_call_operand.vmem [shape: f32[16,128], index: 3, kind: input, shape index: {}]   ;;  %s3219_s4 = inlined_call_operand.vmem [shape: f32[32,128], index: 4, kind: input, shape index: {}]   ;;  %s3220_s1 = inlined_call_operand.vmem [shape: f32[8,8,16], index: 1, kind: input, shape index: {}, may-alias: {0,1}]   ;;  %s3221_s5 = inlined_call_operand.vmem [shape: f32[32,128], index: 5, kind: input, shape index: {}]   ;;  %s3222_s6 = inlined_call_operand.vmem [shape: f32[1,128], index: 6, kind: input, shape index: {}]   ;;  %s3223_s7 = inlined_call_operand.vmem [shape: f32[1,128], index: 7, kind: input, shape index: {}]   ;;  %s3224_s8 = inlined_call_operand.vmem [shape: f32[8,8,32], index: 8, kind: output, shape index: {0}]   ;;  %s3225_s9 = inlined_call_operand.vmem [shape: f32[8,8,32], index: 9, kind: output, shape index: {1}]  }
   0x1   :  { %v84_v0 = vld [vmem:[%s3216_s2] sm:$0xff]  ;;  %v85_v1 = vld [vmem:[%s3216_s2 + $0x8] sm:$0xff]  ;;  %72 = vst.msk [vmem:[#allocation2] sm:$0xff] %vm71_vm1, %v2742_v6  ;;  %73 = vst.msk [vmem:[#allocation3] sm:$0xff] %vm71_vm1, %v2742_v6  ;;  %vm2745_vm2 = vmmov 0  }
   0x2   :  { %v76_v2 = vld [vmem:[%s3217_s0] sm:$0xff]  ;;  %v2504_v3 = vpack.c.bf16 %v85_v1, %v84_v0  ;;  %v240_v5 = vld [vmem:[%s3218_s3 + $0x8] sm:$0xff]  ;;  %74 = vst.msk [vmem:[#allocation4] sm:$0xff] %vm71_vm1, %v2742_v6  ;;  %75 = vst.msk [vmem:[#allocation5] sm:$0xff] %vm71_vm1, %v2742_v6 }
   0x3   :  { %2300 = vmatprep.mubr.msk.f32.mxu0 %vm93_vm0, %v76_v2  ;;  %v239_v4 = vld [vmem:[%s3218_s3] sm:$0xff]  ;;  %v386_v9 = vld [vmem:[%s3219_s4 + $0x8] sm:$0xff]  ;;  %v78_v16 = vld [vmem:[%s3217_s0 + $0x10] sm:$0xff] }
   0x4   :  { %v2508_v7 = vpack.c.bf16 %v240_v5, %v239_v4  ;;  %v385_v8 = vld [vmem:[%s3219_s4] sm:$0xff]  ;;  %2505 = vmatprep.subr.bf16.mxu0 %v2504_v3  ;;  %v77_v11 = vld [vmem:[%s3217_s0 + $0x8] sm:$0xff]  ;;  %v387_v19 = vld [vmem:[%s3219_s4 + $0x10] sm:$0xff] }
   0x5   :  { %v231_v10 = vld [vmem:[%s3220_s1] sm:$0xff]  ;;  %2507 = vmatpush3.bf16.msra.mxu0 %v2504_v3  ;;  %v2835_v12 = vpack.c.bf16 %v386_v9, %v385_v8  ;;  %v390_v14 = vld [vmem:[%s3221_s5 + $0x8] sm:$0xff]  ;;  %v388_v20 = vld [vmem:[%s3219_s4 + $0x18] sm:$0xff] }
   0x6   :  { %2316 = vmatprep.mubr.msk.f32.mxu1 %vm93_vm0, %v231_v10  ;;  %2509 = vmatprep.subr.bf16.mxu1 %v2508_v7  ;;  %v389_v13 = vld [vmem:[%s3221_s5] sm:$0xff]  ;;  %v232_v17 = vld [vmem:[%s3220_s1 + $0x8] sm:$0xff]  ;;  %v233_v21 = vld [vmem:[%s3220_s1 + $0x10] sm:$0xff]  ;;  %v2868_v23 = vpack.c.bf16 %v388_v20, %v387_v19 }
   0x7   :  { %2511 = vmatpush3.bf16.msra.mxu1 %v2508_v7  ;;  %2512 = vmatprep.subr.bf16.mxu0 %v2743_v15  ;;  %v2851_v18 = vpack.c.bf16 %v390_v14, %v389_v13  ;;  %v79_v22 = vld [vmem:[%s3217_s0 + $0x18] sm:$0xff]  ;;  %v391_v24 = vld [vmem:[%s3221_s5 + $0x10] sm:$0xff]  ;;  %v80_v26 = vld [vmem:[%s3217_s0 + $0x20] sm:$0xff] }
   0x8   :  { %2518 = vmatprep.subr.bf16.mxu1 %v2743_v15  ;;  %2301 = vmatmul.mubr.msk.f32.vlgmr.msra.gmra.mrb[0].mxu0 %vm93_vm0, %v77_v11  ;;  %v392_v25 = vld [vmem:[%s3221_s5 + $0x18] sm:$0xff]  ;;  %v394_v29 = vld [vmem:[#allocation3] sm:$0xff]  ;;  %v235_v30 = vld [vmem:[%s3220_s1 + $0x20] sm:$0xff] }
   0x9   :  { %2514 = vmatpush3.bf16.msra.mxu0 %v2835_v12  ;;  %2303 = vmatprep.mubr.msk.f32.mxu0 %vm93_vm0, %v78_v16  ;;  %v234_v27 = vld [vmem:[%s3220_s1 + $0x18] sm:$0xff]  ;;  %v2886_v28 = vpack.c.bf16 %v392_v25, %v391_v24  ;;  %v81_v31 = vld [vmem:[%s3217_s0 + $0x28] sm:$0xff]  ;;  %v82_v32 = vld [vmem:[%s3217_s0 + $0x30] sm:$0xff] }
   0xa   :  { %2317 = vmatmul.mubr.msk.f32.vlgmr.msra.gmra.mrb[0].mxu1 %vm93_vm0, %v232_v17  ;;  %2515 = vmatprep.subr.bf16.mxu0 %v2743_v15  ;;  %v236_v33 = vld [vmem:[%s3220_s1 + $0x28] sm:$0xff]  ;;  %v396_v34 = vld [vmem:[#allocation5] sm:$0xff]  ;;  %v237_v35 = vld [vmem:[%s3220_s1 + $0x30] sm:$0xff] }
   0xb   :  { %2520 = vmatpush3.bf16.msra.mxu1 %v2851_v18  ;;  %2319 = vmatprep.mubr.msk.f32.mxu1 %vm93_vm0, %v233_v21  ;;  %v83_v36 = vld [vmem:[%s3217_s0 + $0x38] sm:$0xff]  ;;  %v393_v38 = vld [vmem:[#allocation2] sm:$0xff]  ;;  %v395_v39 = vld [vmem:[#allocation4] sm:$0xff] }
   0xc   :  { %2304 = vmatmul.mubr.msk.f32.gmra.mrb[2].mxu0 %vm93_vm0, %v79_v22  ;;  %2521 = vmatprep.subr.bf16.mxu1 %v2743_v15  ;;  %v238_v37 = vld [vmem:[%s3220_s1 + $0x38] sm:$0xff]  ;;  %v2132_v40 = vld [vmem:[%s3222_s6] ss:$0 sm:$0xff]  ;;  %s2746_s6 = smov 64  }
   0xd   :  { %2306 = vmatprep.mubr.msk.f32.mxu0 %vm93_vm0, %v80_v26  ;;  %2517 = vmatpush3.bf16.msra.mxu0 %v2868_v23  ;;  %v2141_v42 = vld [vmem:[%s3223_s7] ss:$0 sm:$0xff] }
   0xe   :  { %2320 = vmatmul.mubr.msk.f32.gmra.mrb[2].mxu1 %vm93_vm0, %v234_v27  ;;  %481 = vrot.lane.b32.xlu1 %v394_v29, %s2744_s30 }
   0xf   :  { %2322 = vmatprep.mubr.msk.f32.mxu1 %vm93_vm0, %v235_v30  ;;  %2523 = vmatpush3.bf16.msra.mxu1 %v2886_v28 }
  0x10   :  { %2307 = vmatmul.mubr.msk.f32.gmra.mrb[4].mxu0 %vm93_vm0, %v81_v31  ;;  %2524 = vmatprep.subr.bf16.mxu0 %v2743_v15 }
  0x11   :  { %2309 = vmatprep.mubr.msk.f32.mxu0 %vm93_vm0, %v82_v32  ;;  %2530 = vmatprep.subr.bf16.mxu1 %v2743_v15 }
  0x12   :  { %2323 = vmatmul.mubr.msk.f32.gmra.mrb[4].mxu1 %vm93_vm0, %v236_v33  ;;  %585 = vrot.lane.b32.xlu1 %v396_v34, %s2744_s30 }
  0x13   :  { %2325 = vmatprep.mubr.msk.f32.mxu1 %vm93_vm0, %v237_v35 }
  0x14   :  { %2310 = vmatmul.mubr.msk.f32.gmra.mrb[6].mxu0 %vm93_vm0, %v83_v36 }
  0x15   :  { %2336 = vmatprep.mubr.msk.f32.mxu0 %vm2745_vm2, %v2742_v6 }
  0x16   :  { %2326 = vmatmul.mubr.msk.f32.gmra.mrb[6].mxu1 %vm93_vm0, %v238_v37 }
  0x17   :  { %2347 = vmatprep.mubr.msk.f32.mxu1 %vm2745_vm2, %v2742_v6 }
  0x18   :  { %2337 = vmatmul.mubr.msk.f32.vlgmr.msra.gmra.mrb[8].mxu0 %vm71_vm1, %v393_v38 }
  0x19   :  { %2526 = vmatpush3.bf16.msra.mxu0 %v2835_v12  ;;  %2358 = vmatprep.mubr.msk.f32.mxu0 %vm2745_vm2, %v2742_v6 }
  0x1a   :  { %2348 = vmatmul.mubr.msk.f32.vlgmr.msra.gmra.mrb[8].mxu1 %vm71_vm1, %v395_v39  ;;  %2527 = vmatprep.subr.bf16.mxu0 %v2743_v15 }
  0x1b   :  { %2532 = vmatpush3.bf16.msra.mxu1 %v2851_v18  ;;  %2369 = vmatprep.mubr.msk.f32.mxu1 %vm2745_vm2, %v2742_v6 }
  0x1c   :  { %2533 = vmatprep.subr.bf16.mxu1 %v2743_v15 }
  0x1d   :  { %2529 = vmatpush3.bf16.msra.mxu0 %v2868_v23 }
  0x1e   :  { %2536 = vmatprep.subr.bf16.mxu0 %v2743_v15 }
  0x1f   :  { %2535 = vmatpush3.bf16.msra.mxu1 %v2886_v28 }
  0x20   :  { %2542 = vmatprep.subr.bf16.mxu1 %v2743_v15 }
  0x80   :  { %v482_v36 = vpop.permute.xlu1 %481 }
  0x84   :  { %v586_v38 = vpop.permute.xlu1 %585 }
  0xdb   :  { %v2302_v41 = vpop.f32.mrb[0].mxu0 }
  0xdc   :  { %v2950_v43 = vadd.f32 %v2302_v41, %v2132_v40  ;;  %v184_v44 = vpop.f32.mrb[1].mxu0 }
  0xdd   :  { %v2318_v45 = vpop.f32.mrb[0].mxu1  ;;  %v185_v7 = vadd.f32 %v2132_v40, %v184_v44 }
  0xde   :  { %v2952_v46 = vadd.f32 %v2318_v45, %v2141_v42  ;;  %v338_v47 = vpop.f32.mrb[1].mxu1 }
  0xdf   :  { %v2305_v48 = vpop.f32.mrb[2].mxu0  ;;  %v2954_v49 = vadd.f32 %v2141_v42, %v338_v47 }
  0xe0   :  { %v2956_v50 = vadd.f32 %v2305_v48, %v2132_v40  ;;  %v194_v51 = vpop.f32.mrb[3].mxu0 }
  0xe1   :  { %v2958_v52 = vadd.f32 %v2132_v40, %v194_v51  ;;  %v2321_v53 = vpop.f32.mrb[2].mxu1 }
  0xe2   :  { %v2960_v54 = vadd.f32 %v2321_v53, %v2141_v42  ;;  %v348_v55 = vpop.f32.mrb[3].mxu1 }
  0xe3   :  { %v2308_v56 = vpop.f32.mrb[4].mxu0  ;;  %v2962_v57 = vadd.f32 %v2141_v42, %v348_v55 }
  0xe4   :  { %v2964_v58 = vadd.f32 %v2308_v56, %v2132_v40  ;;  %v204_v59 = vpop.f32.mrb[5].mxu0 }
  0xe5   :  { %v2966_v60 = vadd.f32 %v2132_v40, %v204_v59  ;;  %v2324_v61 = vpop.f32.mrb[4].mxu1 }
  0xe6   :  { %v2968_v62 = vadd.f32 %v2324_v61, %v2141_v42  ;;  %v358_v63 = vpop.f32.mrb[5].mxu1 }
  0xe7   :  { %v2311_v0 = vpop.f32.mrb[6].mxu0  ;;  %v2970_v1 = vadd.f32 %v2141_v42, %v358_v63 }
  0xe8   :  { %v2972_v2 = vadd.f32 %v2311_v0, %v2132_v40  ;;  %v214_v3 = vpop.f32.mrb[7].mxu0 }
  0xe9   :  { %v2974_v4 = vadd.f32 %v2132_v40, %v214_v3  ;;  %v2327_v5 = vpop.f32.mrb[6].mxu1 }
  0xea   :  { %v374_v8 = vadd.f32 %v2327_v5, %v2141_v42  ;;  %v368_v9 = vpop.f32.mrb[7].mxu1 }
  0xeb   :  { %v468_v10 = vpop.f32.mrb[8].mxu0  ;;  %v2976_v11 = vadd.f32 %v2141_v42, %v368_v9 }
  0xec   :  { %v472_v13 = vadd.f32 %v468_v10, %v185_v7  ;;  %v2338_v14 = vpop.f32.mrb[9].mxu0 }
  0xed   :  { %v572_v16 = vpop.f32.mrb[8].mxu1 }
  0xee   :  { %2614 = vtanh.f32 %v472_v13  ;;  %v576_v17 = vadd.f32 %v572_v16, %v374_v8  ;;  %v2349_v19 = vpop.f32.mrb[9].mxu1  ;;  %v2151_v22 = vmul.f32 -1.442695, %v472_v13 }
  0xf0   :  { %2616 = vtanh.f32 %v576_v17  ;;  %v2153_v24 = vmul.f32 -1.442695, %v576_v17 }
  0xf1   :  { %2618 = vpow2.f32 %v2151_v22 }
  0xf2   :  { %2620 = vpow2.f32 %v2153_v24 }
  0xf8   :  { %v2615_v20 = vpop.eup %2614 }
  0xf9   :  { %486 = vrot.lane.b32.xlu0 %v2615_v20, %s2746_s6 }
  0xfa   :  { %v2617_v21 = vpop.eup %2616 }
  0xfb   :  { %v2619_v25 = vpop.eup %2618 }
  0xfc   :  { %v476_v26 = vadd.f32 1.0, %v2619_v25  ;;  %v2621_v27 = vpop.eup %2620 }
  0xfd   :  { %590 = vrot.lane.b32.xlu0 %v2617_v21, %s2746_s6  ;;  %v580_v29 = vadd.f32 1.0, %v2621_v27 }
  0xfe   :  { %2622 = vrcp.f32 %v476_v26 }
  0xff   :  { %2624 = vrcp.f32 %v580_v29 }
 0x108   :  { %v2623_v30 = vpop.eup %2622 }
 0x109   :  { %v2625_v33 = vpop.eup %2624  ;;  %v484_v37 = vmul.f32 %v2623_v30, %v482_v36 }
 0x10a   :  { %v588_v41 = vmul.f32 %v2625_v33, %v586_v38 }
 0x16b   :  { %v487_v31 = vpop.permute.xlu0 %486 }
 0x16c   :  { %v489_v32 = vmul.f32 %v2623_v30, %v487_v31 }
 0x16e   :  { %491 = vrot.lane.b32.xlu0 %v489_v32, %s2744_s30 }
 0x16f   :  { %v591_v34 = vpop.permute.xlu0 %590 }
 0x170   :  { %v593_v35 = vmul.f32 %v2625_v33, %v591_v34 }
 0x172   :  { %595 = vrot.lane.b32.xlu1 %v593_v35, %s2744_s30 }
 0x1e0   :  { %v492_v39 = vpop.permute.xlu0 %491 }
 0x1e1   :  { %v2982_v40 = vadd.f32 %v492_v39, %v484_v37 }
 0x1e3   :  { %2626 = vtanh.f32 %v2982_v40 }
 0x1e4   :  { %v596_v42 = vpop.permute.xlu1 %595 }
 0x1e5   :  { %v2985_v44 = vadd.f32 %v596_v42, %v588_v41 }
 0x1e7   :  { %2628 = vtanh.f32 %v2985_v44 }
 0x1ed   :  { %v2627_v45 = vpop.eup %2626 }
 0x1ee   :  { %497 = vrot.lane.b32.xlu0 %v2627_v45, %s2746_s6 }
 0x1f1   :  { %v2629_v47 = vpop.eup %2628 }
 0x1f2   :  { %601 = vrot.lane.b32.xlu1 %v2629_v47, %s2746_s6 }
 0x260   :  { %v498_v48 = vpop.permute.xlu0 %497 }
 0x261   :  { %v500_v51 = vmul.f32 %v2623_v30, %v498_v48 }
 0x263   :  { %606 = vrot.lane.b32.xlu0 %v500_v51, %s2744_s30 }
 0x264   :  { %v602_v53 = vpop.permute.xlu1 %601 }
 0x265   :  { %v604_v55 = vmul.f32 %v2625_v33, %v602_v53 }
 0x267   :  { %611 = vrot.lane.b32.xlu1 %v604_v55, %s2744_s30 }
 0x2d5   :  { %v607_v56 = vpop.permute.xlu0 %606 }
 0x2d6   :  { %609 = vst.msk [vmem:[%s3224_s8] sm:$0xff] %vm71_vm1, %v607_v56  ;;  %2359 = vmatmul.mubr.msk.f32.vlgmr.msra.gmra.mrb[10].mxu0 %vm71_vm1, %v607_v56 }
 0x2d7   :  { %2538 = vmatpush3.bf16.msra.mxu0 %v2835_v12  ;;  %2380 = vmatprep.mubr.msk.f32.mxu0 %vm2745_vm2, %v2742_v6 }
 0x2d8   :  { %2539 = vmatprep.subr.bf16.mxu0 %v2743_v15 }
 0x2d9   :  { %v612_v59 = vpop.permute.xlu1 %611 }
 0x2da   :  { %2154 = vst.msk [vmem:[%s3225_s9 + $0x38] sm:$0xff] %vm71_vm1, %v612_v59  ;;  %2370 = vmatmul.mubr.msk.f32.vlgmr.msra.gmra.mrb[10].mxu1 %vm71_vm1, %v612_v59 }
 0x2db   :  { %2541 = vmatpush3.bf16.msra.mxu0 %v2868_v23  ;;  %2544 = vmatpush3.bf16.msra.mxu1 %v2851_v18 }
 0x2dc   :  { %2545 = vmatprep.subr.bf16.mxu1 %v2743_v15  ;;  %2391 = vmatprep.mubr.msk.f32.mxu1 %vm2745_vm2, %v2742_v6 }
 0x2dd   :  { %2548 = vmatprep.subr.bf16.mxu0 %v2743_v15 }
 0x2df   :  { %2547 = vmatpush3.bf16.msra.mxu1 %v2886_v28 }
 0x2e0   :  { %2554 = vmatprep.subr.bf16.mxu1 %v2743_v15 }
 0x3a9   :  { %v686_v61 = vpop.f32.mrb[10].mxu0 }
 0x3aa   :  { %v690_v63 = vadd.f32 %v686_v61, %v2950_v43  ;;  %v2360_v0 = vpop.f32.mrb[11].mxu0 }
 0x3ac   :  { %2630 = vtanh.f32 %v690_v63  ;;  %v2156_v10 = vmul.f32 -1.442695, %v690_v63 }
 0x3ad   :  { %v785_v3 = vpop.f32.mrb[10].mxu1 }
 0x3ae   :  { %v789_v5 = vadd.f32 %v785_v3, %v2976_v11  ;;  %v2371_v7 = vpop.f32.mrb[11].mxu1 }
 0x3b0   :  { %2632 = vtanh.f32 %v789_v5  ;;  %v2158_v13 = vmul.f32 -1.442695, %v789_v5 }
 0x3b1   :  { %2634 = vpow2.f32 %v2156_v10 }
 0x3b2   :  { %2636 = vpow2.f32 %v2158_v13 }
 0x3b6   :  { %v2631_v8 = vpop.eup %2630 }
 0x3b7   :  { %700 = vrot.lane.b32.xlu0 %v2631_v8, %s2746_s6 }
 0x3ba   :  { %v2633_v9 = vpop.eup %2632 }
 0x3bb   :  { %799 = vrot.lane.b32.xlu1 %v2633_v9, %s2746_s6  ;;  %v2635_v14 = vpop.eup %2634 }
 0x3bc   :  { %v694_v16 = vadd.f32 1.0, %v2635_v14  ;;  %v2637_v43 = vpop.eup %2636 }
 0x3bd   :  { %v793_v17 = vadd.f32 1.0, %v2637_v43 }
 0x3be   :  { %2638 = vrcp.f32 %v694_v16 }
 0x3bf   :  { %2640 = vrcp.f32 %v793_v17 }
 0x3c8   :  { %v2639_v19 = vpop.eup %2638 }
 0x3c9   :  { %v2641_v21 = vpop.eup %2640  ;;  %v698_v25 = vmul.f32 %v2639_v19, %v2982_v40 }
 0x3ca   :  { %v797_v29 = vmul.f32 %v2641_v21, %v2985_v44 }
 0x429   :  { %v701_v11 = vpop.permute.xlu0 %700 }
 0x42a   :  { %v703_v20 = vmul.f32 %v2639_v19, %v701_v11 }
 0x42c   :  { %705 = vrot.lane.b32.xlu0 %v703_v20, %s2744_s30 }
 0x42d   :  { %v800_v22 = vpop.permute.xlu1 %799 }
 0x42e   :  { %v802_v24 = vmul.f32 %v2641_v21, %v800_v22 }
 0x430   :  { %804 = vrot.lane.b32.xlu1 %v802_v24, %s2744_s30 }
 0x49e   :  { %v706_v26 = vpop.permute.xlu0 %705 }
 0x49f   :  { %v708_v27 = vadd.f32 %v706_v26, %v698_v25 }
 0x4a1   :  { %2642 = vtanh.f32 %v708_v27 }
 0x4a2   :  { %v805_v30 = vpop.permute.xlu1 %804 }
 0x4a3   :  { %v807_v31 = vadd.f32 %v805_v30, %v797_v29 }
 0x4a5   :  { %2644 = vtanh.f32 %v807_v31 }
 0x4ab   :  { %v2643_v32 = vpop.eup %2642 }
 0x4ac   :  { %711 = vrot.lane.b32.xlu0 %v2643_v32, %s2746_s6 }
 0x4af   :  { %v2645_v33 = vpop.eup %2644 }
 0x4b0   :  { %810 = vrot.lane.b32.xlu1 %v2645_v33, %s2746_s6 }
 0x51e   :  { %v712_v34 = vpop.permute.xlu0 %711 }
 0x51f   :  { %v714_v35 = vmul.f32 %v2639_v19, %v712_v34 }
 0x521   :  { %815 = vrot.lane.b32.xlu0 %v714_v35, %s2744_s30 }
 0x522   :  { %v811_v36 = vpop.permute.xlu1 %810 }
 0x523   :  { %v813_v37 = vmul.f32 %v2641_v21, %v811_v36 }
 0x525   :  { %821 = vrot.lane.b32.xlu1 %v813_v37, %s2744_s30 }
 0x593   :  { %v816_v38 = vpop.permute.xlu0 %815 }
 0x594   :  { %2159 = vst.msk [vmem:[%s3224_s8 + $0x8] sm:$0xff] %vm71_vm1, %v816_v38  ;;  %2381 = vmatmul.mubr.msk.f32.vlgmr.msra.gmra.mrb[12].mxu0 %vm71_vm1, %v816_v38 }
 0x595   :  { %2550 = vmatpush3.bf16.msra.mxu0 %v2835_v12  ;;  %2402 = vmatprep.mubr.msk.f32.mxu0 %vm2745_vm2, %v2742_v6 }
 0x596   :  { %2551 = vmatprep.subr.bf16.mxu0 %v2743_v15 }
 0x597   :  { %v822_v39 = vpop.permute.xlu1 %821 }
 0x598   :  { %2160 = vst.msk [vmem:[%s3225_s9 + $0x30] sm:$0xff] %vm71_vm1, %v822_v39  ;;  %2392 = vmatmul.mubr.msk.f32.vlgmr.msra.gmra.mrb[12].mxu1 %vm71_vm1, %v822_v39 }
 0x599   :  { %2553 = vmatpush3.bf16.msra.mxu0 %v2868_v23  ;;  %2556 = vmatpush3.bf16.msra.mxu1 %v2851_v18 }
 0x59a   :  { %2557 = vmatprep.subr.bf16.mxu1 %v2743_v15  ;;  %2413 = vmatprep.mubr.msk.f32.mxu1 %vm2745_vm2, %v2742_v6 }
 0x59b   :  { %2560 = vmatprep.subr.bf16.mxu0 %v2743_v15 }
 0x59d   :  { %2559 = vmatpush3.bf16.msra.mxu1 %v2886_v28 }
 0x59e   :  { %2566 = vmatprep.subr.bf16.mxu1 %v2743_v15 }
 0x667   :  { %v896_v40 = vpop.f32.mrb[12].mxu0 }
 0x668   :  { %v900_v41 = vadd.f32 %v896_v40, %v2958_v52  ;;  %v2382_v42 = vpop.f32.mrb[13].mxu0 }
 0x66a   :  { %2646 = vtanh.f32 %v900_v41  ;;  %v2162_v53 = vmul.f32 -1.442695, %v900_v41 }
 0x66b   :  { %v995_v44 = vpop.f32.mrb[12].mxu1 }
 0x66c   :  { %v999_v45 = vadd.f32 %v995_v44, %v2968_v62  ;;  %v2393_v47 = vpop.f32.mrb[13].mxu1 }
 0x66e   :  { %2648 = vtanh.f32 %v999_v45  ;;  %v2164_v55 = vmul.f32 -1.442695, %v999_v45 }
 0x66f   :  { %2650 = vpow2.f32 %v2162_v53 }
 0x670   :  { %2652 = vpow2.f32 %v2164_v55 }
 0x674   :  { %v2647_v48 = vpop.eup %2646 }
 0x675   :  { %910 = vrot.lane.b32.xlu0 %v2647_v48, %s2746_s6 }
 0x678   :  { %v2649_v51 = vpop.eup %2648 }
 0x679   :  { %1009 = vrot.lane.b32.xlu1 %v2649_v51, %s2746_s6  ;;  %v2651_v56 = vpop.eup %2650 }
 0x67a   :  { %v904_v59 = vadd.f32 1.0, %v2651_v56  ;;  %v2653_v52 = vpop.eup %2652 }
 0x67b   :  { %v1003_v61 = vadd.f32 1.0, %v2653_v52 }
 0x67c   :  { %2654 = vrcp.f32 %v904_v59 }
 0x67d   :  { %2656 = vrcp.f32 %v1003_v61 }
 0x686   :  { %v2655_v63 = vpop.eup %2654 }
 0x687   :  { %v2657_v3 = vpop.eup %2656  ;;  %v908_v8 = vmul.f32 %v2655_v63, %v708_v27 }
 0x688   :  { %v1007_v13 = vmul.f32 %v2657_v3, %v807_v31 }
 0x6e7   :  { %v911_v62 = vpop.permute.xlu0 %910 }
 0x6e8   :  { %v913_v0 = vmul.f32 %v2655_v63, %v911_v62 }
 0x6ea   :  { %915 = vrot.lane.b32.xlu0 %v913_v0, %s2744_s30 }
 0x6eb   :  { %v1010_v5 = vpop.permute.xlu1 %1009 }
 0x6ec   :  { %v1012_v7 = vmul.f32 %v2657_v3, %v1010_v5 }
 0x6ee   :  { %1014 = vrot.lane.b32.xlu1 %v1012_v7, %s2744_s30 }
 0x75c   :  { %v916_v9 = vpop.permute.xlu0 %915 }
 0x75d   :  { %v918_v10 = vadd.f32 %v916_v9, %v908_v8 }
 0x75f   :  { %2658 = vtanh.f32 %v918_v10 }
 0x760   :  { %v1015_v14 = vpop.permute.xlu1 %1014 }
 0x761   :  { %v1017_v16 = vadd.f32 %v1015_v14, %v1007_v13 }
 0x763   :  { %2660 = vtanh.f32 %v1017_v16 }
 0x769   :  { %v2659_v43 = vpop.eup %2658 }
 0x76a   :  { %921 = vrot.lane.b32.xlu0 %v2659_v43, %s2746_s6 }
 0x76d   :  { %v2661_v17 = vpop.eup %2660 }
 0x76e   :  { %1020 = vrot.lane.b32.xlu1 %v2661_v17, %s2746_s6 }
 0x7dc   :  { %v922_v19 = vpop.permute.xlu0 %921 }
 0x7dd   :  { %v924_v11 = vmul.f32 %v2655_v63, %v922_v19 }
 0x7df   :  { %1025 = vrot.lane.b32.xlu0 %v924_v11, %s2744_s30 }
 0x7e0   :  { %v1021_v20 = vpop.permute.xlu1 %1020 }
 0x7e1   :  { %v1023_v21 = vmul.f32 %v2657_v3, %v1021_v20 }
 0x7e3   :  { %1031 = vrot.lane.b32.xlu1 %v1023_v21, %s2744_s30 }
 0x851   :  { %v1026_v22 = vpop.permute.xlu0 %1025 }
 0x852   :  { %2165 = vst.msk [vmem:[%s3224_s8 + $0x10] sm:$0xff] %vm71_vm1, %v1026_v22  ;;  %2403 = vmatmul.mubr.msk.f32.vlgmr.msra.gmra.mrb[14].mxu0 %vm71_vm1, %v1026_v22 }
 0x853   :  { %2562 = vmatpush3.bf16.msra.mxu0 %v2835_v12  ;;  %2424 = vmatprep.mubr.msk.f32.mxu0 %vm2745_vm2, %v2742_v6 }
 0x854   :  { %2563 = vmatprep.subr.bf16.mxu0 %v2743_v15 }
 0x855   :  { %v1032_v24 = vpop.permute.xlu1 %1031 }
 0x856   :  { %2166 = vst.msk [vmem:[%s3225_s9 + $0x28] sm:$0xff] %vm71_vm1, %v1032_v24  ;;  %2414 = vmatmul.mubr.msk.f32.vlgmr.msra.gmra.mrb[14].mxu1 %vm71_vm1, %v1032_v24 }
 0x857   :  { %2565 = vmatpush3.bf16.msra.mxu0 %v2868_v23  ;;  %2568 = vmatpush3.bf16.msra.mxu1 %v2851_v18 }
 0x858   :  { %2569 = vmatprep.subr.bf16.mxu1 %v2743_v15  ;;  %2435 = vmatprep.mubr.msk.f32.mxu1 %vm2745_vm2, %v2742_v6 }
 0x859   :  { %2572 = vmatprep.subr.bf16.mxu0 %v2743_v15 }
 0x85b   :  { %2571 = vmatpush3.bf16.msra.mxu1 %v2886_v28 }
 0x85c   :  { %2578 = vmatprep.subr.bf16.mxu1 %v2743_v15 }
 0x925   :  { %v1106_v25 = vpop.f32.mrb[14].mxu0 }
 0x926   :  { %v1110_v26 = vadd.f32 %v1106_v25, %v2956_v50  ;;  %v2404_v27 = vpop.f32.mrb[15].mxu0 }
 0x928   :  { %2662 = vtanh.f32 %v1110_v26  ;;  %v2168_v34 = vmul.f32 -1.442695, %v1110_v26 }
 0x929   :  { %v1205_v29 = vpop.f32.mrb[14].mxu1 }
 0x92a   :  { %v1209_v30 = vadd.f32 %v1205_v29, %v2970_v1  ;;  %v2415_v31 = vpop.f32.mrb[15].mxu1 }
 0x92c   :  { %2664 = vtanh.f32 %v1209_v30  ;;  %v2170_v35 = vmul.f32 -1.442695, %v1209_v30 }
 0x92d   :  { %2666 = vpow2.f32 %v2168_v34 }
 0x92e   :  { %2668 = vpow2.f32 %v2170_v35 }
 0x932   :  { %v2663_v32 = vpop.eup %2662 }
 0x933   :  { %1120 = vrot.lane.b32.xlu0 %v2663_v32, %s2746_s6 }
 0x936   :  { %v2665_v33 = vpop.eup %2664 }
 0x937   :  { %1219 = vrot.lane.b32.xlu1 %v2665_v33, %s2746_s6  ;;  %v2667_v36 = vpop.eup %2666 }
 0x938   :  { %v1114_v37 = vadd.f32 1.0, %v2667_v36  ;;  %v2669_v50 = vpop.eup %2668 }
 0x939   :  { %v1213_v38 = vadd.f32 1.0, %v2669_v50 }
 0x93a   :  { %2670 = vrcp.f32 %v1114_v37 }
 0x93b   :  { %2672 = vrcp.f32 %v1213_v38 }
 0x944   :  { %v2671_v39 = vpop.eup %2670 }
 0x945   :  { %v2673_v41 = vpop.eup %2672  ;;  %v1118_v45 = vmul.f32 %v2671_v39, %v918_v10 }
 0x946   :  { %v1217_v51 = vmul.f32 %v2673_v41, %v1017_v16 }
 0x9a5   :  { %v1121_v1 = vpop.permute.xlu0 %1120 }
 0x9a6   :  { %v1123_v40 = vmul.f32 %v2671_v39, %v1121_v1 }
 0x9a8   :  { %1125 = vrot.lane.b32.xlu0 %v1123_v40, %s2744_s30 }
 0x9a9   :  { %v1220_v42 = vpop.permute.xlu1 %1219 }
 0x9aa   :  { %v1222_v44 = vmul.f32 %v2673_v41, %v1220_v42 }
 0x9ac   :  { %1224 = vrot.lane.b32.xlu1 %v1222_v44, %s2744_s30 }
 0xa1a   :  { %v1126_v47 = vpop.permute.xlu0 %1125 }
 0xa1b   :  { %v1128_v48 = vadd.f32 %v1126_v47, %v1118_v45 }
 0xa1d   :  { %2674 = vtanh.f32 %v1128_v48 }
 0xa1e   :  { %v1225_v53 = vpop.permute.xlu1 %1224 }
 0xa1f   :  { %v1227_v55 = vadd.f32 %v1225_v53, %v1217_v51 }
 0xa21   :  { %2676 = vtanh.f32 %v1227_v55 }
 0xa27   :  { %v2675_v56 = vpop.eup %2674 }
 0xa28   :  { %1131 = vrot.lane.b32.xlu0 %v2675_v56, %s2746_s6 }
 0xa2b   :  { %v2677_v59 = vpop.eup %2676 }
 0xa2c   :  { %1230 = vrot.lane.b32.xlu1 %v2677_v59, %s2746_s6 }
 0xa9a   :  { %v1132_v52 = vpop.permute.xlu0 %1131 }
 0xa9b   :  { %v1134_v61 = vmul.f32 %v2671_v39, %v1132_v52 }
 0xa9d   :  { %1235 = vrot.lane.b32.xlu0 %v1134_v61, %s2744_s30 }
 0xa9e   :  { %v1231_v63 = vpop.permute.xlu1 %1230 }
 0xa9f   :  { %v1233_v62 = vmul.f32 %v2673_v41, %v1231_v63 }
 0xaa1   :  { %1241 = vrot.lane.b32.xlu1 %v1233_v62, %s2744_s30 }
 0xb0f   :  { %v1236_v0 = vpop.permute.xlu0 %1235 }
 0xb10   :  { %2171 = vst.msk [vmem:[%s3224_s8 + $0x18] sm:$0xff] %vm71_vm1, %v1236_v0  ;;  %2425 = vmatmul.mubr.msk.f32.vlgmr.msra.gmra.mrb[16].mxu0 %vm71_vm1, %v1236_v0 }
 0xb11   :  { %2574 = vmatpush3.bf16.msra.mxu0 %v2835_v12  ;;  %2446 = vmatprep.mubr.msk.f32.mxu0 %vm2745_vm2, %v2742_v6 }
 0xb12   :  { %2575 = vmatprep.subr.bf16.mxu0 %v2743_v15 }
 0xb13   :  { %v1242_v3 = vpop.permute.xlu1 %1241 }
 0xb14   :  { %2172 = vst.msk [vmem:[%s3225_s9 + $0x20] sm:$0xff] %vm71_vm1, %v1242_v3  ;;  %2436 = vmatmul.mubr.msk.f32.vlgmr.msra.gmra.mrb[16].mxu1 %vm71_vm1, %v1242_v3 }
 0xb15   :  { %2577 = vmatpush3.bf16.msra.mxu0 %v2868_v23  ;;  %2580 = vmatpush3.bf16.msra.mxu1 %v2851_v18 }
 0xb16   :  { %2581 = vmatprep.subr.bf16.mxu1 %v2743_v15  ;;  %2457 = vmatprep.mubr.msk.f32.mxu1 %vm2745_vm2, %v2742_v6 }
 0xb17   :  { %2584 = vmatprep.subr.bf16.mxu0 %v2743_v15 }
 0xb19   :  { %2583 = vmatpush3.bf16.msra.mxu1 %v2886_v28 }
 0xb1a   :  { %2590 = vmatprep.subr.bf16.mxu1 %v2743_v15 }
 0xbe3   :  { %v1316_v5 = vpop.f32.mrb[16].mxu0 }
 0xbe4   :  { %v1320_v7 = vadd.f32 %v1316_v5, %v2966_v60  ;;  %v2426_v8 = vpop.f32.mrb[17].mxu0 }
 0xbe6   :  { %2678 = vtanh.f32 %v1320_v7  ;;  %v2174_v43 = vmul.f32 -1.442695, %v1320_v7 }
 0xbe7   :  { %v1415_v9 = vpop.f32.mrb[16].mxu1 }
 0xbe8   :  { %v1419_v10 = vadd.f32 %v1415_v9, %v2960_v54  ;;  %v2437_v13 = vpop.f32.mrb[17].mxu1 }
 0xbea   :  { %2680 = vtanh.f32 %v1419_v10  ;;  %v2176_v17 = vmul.f32 -1.442695, %v1419_v10 }
 0xbeb   :  { %2682 = vpow2.f32 %v2174_v43 }
 0xbec   :  { %2684 = vpow2.f32 %v2176_v17 }
 0xbf0   :  { %v2679_v14 = vpop.eup %2678 }
 0xbf1   :  { %1330 = vrot.lane.b32.xlu0 %v2679_v14, %s2746_s6 }
 0xbf4   :  { %v2681_v16 = vpop.eup %2680 }
 0xbf5   :  { %1429 = vrot.lane.b32.xlu1 %v2681_v16, %s2746_s6  ;;  %v2683_v19 = vpop.eup %2682 }
 0xbf6   :  { %v1324_v11 = vadd.f32 1.0, %v2683_v19  ;;  %v2685_v60 = vpop.eup %2684 }
 0xbf7   :  { %v1423_v20 = vadd.f32 1.0, %v2685_v60 }
 0xbf8   :  { %2686 = vrcp.f32 %v1324_v11 }
 0xbf9   :  { %2688 = vrcp.f32 %v1423_v20 }
 0xc02   :  { %v2687_v21 = vpop.eup %2686 }
 0xc03   :  { %v2689_v24 = vpop.eup %2688  ;;  %v1328_v27 = vmul.f32 %v2687_v21, %v1128_v48 }
 0xc04   :  { %v1427_v31 = vmul.f32 %v2689_v24, %v1227_v55 }
 0xc63   :  { %v1331_v54 = vpop.permute.xlu0 %1330 }
 0xc64   :  { %v1333_v22 = vmul.f32 %v2687_v21, %v1331_v54 }
 0xc66   :  { %1335 = vrot.lane.b32.xlu0 %v1333_v22, %s2744_s30 }
 0xc67   :  { %v1430_v25 = vpop.permute.xlu1 %1429 }
 0xc68   :  { %v1432_v26 = vmul.f32 %v2689_v24, %v1430_v25 }
 0xc6a   :  { %1434 = vrot.lane.b32.xlu1 %v1432_v26, %s2744_s30 }
 0xcd8   :  { %v1336_v29 = vpop.permute.xlu0 %1335 }
 0xcd9   :  { %v1338_v30 = vadd.f32 %v1336_v29, %v1328_v27 }
 0xcdb   :  { %2690 = vtanh.f32 %v1338_v30 }
 0xcdc   :  { %v1435_v32 = vpop.permute.xlu1 %1434 }
 0xcdd   :  { %v1437_v33 = vadd.f32 %v1435_v32, %v1427_v31 }
 0xcdf   :  { %2692 = vtanh.f32 %v1437_v33 }
 0xce5   :  { %v2691_v34 = vpop.eup %2690 }
 0xce6   :  { %1341 = vrot.lane.b32.xlu0 %v2691_v34, %s2746_s6 }
 0xce9   :  { %v2693_v35 = vpop.eup %2692 }
 0xcea   :  { %1440 = vrot.lane.b32.xlu1 %v2693_v35, %s2746_s6 }
 0xd58   :  { %v1342_v36 = vpop.permute.xlu0 %1341 }
 0xd59   :  { %v1344_v37 = vmul.f32 %v2687_v21, %v1342_v36 }
 0xd5b   :  { %1445 = vrot.lane.b32.xlu0 %v1344_v37, %s2744_s30 }
 0xd5c   :  { %v1441_v50 = vpop.permute.xlu1 %1440 }
 0xd5d   :  { %v1443_v38 = vmul.f32 %v2689_v24, %v1441_v50 }
 0xd5f   :  { %1451 = vrot.lane.b32.xlu1 %v1443_v38, %s2744_s30 }
 0xdcd   :  { %v1446_v39 = vpop.permute.xlu0 %1445 }
 0xdce   :  { %2177 = vst.msk [vmem:[%s3224_s8 + $0x20] sm:$0xff] %vm71_vm1, %v1446_v39  ;;  %2447 = vmatmul.mubr.msk.f32.vlgmr.msra.gmra.mrb[18].mxu0 %vm71_vm1, %v1446_v39 }
 0xdcf   :  { %2586 = vmatpush3.bf16.msra.mxu0 %v2835_v12  ;;  %2468 = vmatprep.mubr.msk.f32.mxu0 %vm2745_vm2, %v2742_v6 }
 0xdd0   :  { %2587 = vmatprep.subr.bf16.mxu0 %v2743_v15 }
 0xdd1   :  { %v1452_v1 = vpop.permute.xlu1 %1451 }
 0xdd2   :  { %2178 = vst.msk [vmem:[%s3225_s9 + $0x18] sm:$0xff] %vm71_vm1, %v1452_v1  ;;  %2458 = vmatmul.mubr.msk.f32.vlgmr.msra.gmra.mrb[18].mxu1 %vm71_vm1, %v1452_v1 }
 0xdd3   :  { %2589 = vmatpush3.bf16.msra.mxu0 %v2868_v23  ;;  %2592 = vmatpush3.bf16.msra.mxu1 %v2851_v18 }
 0xdd4   :  { %2593 = vmatprep.subr.bf16.mxu1 %v2743_v15  ;;  %2479 = vmatprep.mubr.msk.f32.mxu1 %vm2745_vm2, %v2742_v6 }
 0xdd5   :  { %2596 = vmatprep.subr.bf16.mxu0 %v2743_v15 }
 0xdd7   :  { %2595 = vmatpush3.bf16.msra.mxu1 %v2886_v28 }
 0xdd8   :  { %2602 = vmatprep.subr.bf16.mxu1 %v2743_v15 }
 0xea1   :  { %v1526_v40 = vpop.f32.mrb[18].mxu0 }
 0xea2   :  { %v1530_v41 = vadd.f32 %v1526_v40, %v2964_v58  ;;  %v2448_v42 = vpop.f32.mrb[19].mxu0 }
 0xea4   :  { %2694 = vtanh.f32 %v1530_v41  ;;  %v2180_v53 = vmul.f32 -1.442695, %v1530_v41 }
 0xea5   :  { %v1625_v44 = vpop.f32.mrb[18].mxu1 }
 0xea6   :  { %v1629_v45 = vadd.f32 %v1625_v44, %v2962_v57  ;;  %v2459_v47 = vpop.f32.mrb[19].mxu1 }
 0xea8   :  { %2696 = vtanh.f32 %v1629_v45  ;;  %v2182_v55 = vmul.f32 -1.442695, %v1629_v45 }
 0xea9   :  { %2698 = vpow2.f32 %v2180_v53 }
 0xeaa   :  { %2700 = vpow2.f32 %v2182_v55 }
 0xeae   :  { %v2695_v48 = vpop.eup %2694 }
 0xeaf   :  { %1540 = vrot.lane.b32.xlu0 %v2695_v48, %s2746_s6 }
 0xeb2   :  { %v2697_v51 = vpop.eup %2696 }
 0xeb3   :  { %1639 = vrot.lane.b32.xlu1 %v2697_v51, %s2746_s6  ;;  %v2699_v56 = vpop.eup %2698 }
 0xeb4   :  { %v1534_v59 = vadd.f32 1.0, %v2699_v56  ;;  %v2701_v58 = vpop.eup %2700 }
 0xeb5   :  { %v1633_v52 = vadd.f32 1.0, %v2701_v58 }
 0xeb6   :  { %2702 = vrcp.f32 %v1534_v59 }
 0xeb7   :  { %2704 = vrcp.f32 %v1633_v52 }
 0xec0   :  { %v2703_v61 = vpop.eup %2702 }
 0xec1   :  { %v2705_v62 = vpop.eup %2704  ;;  %v1538_v5 = vmul.f32 %v2703_v61, %v1338_v30 }
 0xec2   :  { %v1637_v9 = vmul.f32 %v2705_v62, %v1437_v33 }
 0xf21   :  { %v1541_v57 = vpop.permute.xlu0 %1540 }
 0xf22   :  { %v1543_v63 = vmul.f32 %v2703_v61, %v1541_v57 }
 0xf24   :  { %1545 = vrot.lane.b32.xlu0 %v1543_v63, %s2744_s30 }
 0xf25   :  { %v1640_v0 = vpop.permute.xlu1 %1639 }
 0xf26   :  { %v1642_v3 = vmul.f32 %v2705_v62, %v1640_v0 }
 0xf28   :  { %1644 = vrot.lane.b32.xlu1 %v1642_v3, %s2744_s30 }
 0xf96   :  { %v1546_v7 = vpop.permute.xlu0 %1545 }
 0xf97   :  { %v1548_v8 = vadd.f32 %v1546_v7, %v1538_v5 }
 0xf99   :  { %2706 = vtanh.f32 %v1548_v8 }
 0xf9a   :  { %v1645_v10 = vpop.permute.xlu1 %1644 }
 0xf9b   :  { %v1647_v13 = vadd.f32 %v1645_v10, %v1637_v9 }
 0xf9d   :  { %2708 = vtanh.f32 %v1647_v13 }
 0xfa3   :  { %v2707_v14 = vpop.eup %2706 }
 0xfa4   :  { %1551 = vrot.lane.b32.xlu0 %v2707_v14, %s2746_s6 }
 0xfa7   :  { %v2709_v16 = vpop.eup %2708 }
 0xfa8   :  { %1650 = vrot.lane.b32.xlu1 %v2709_v16, %s2746_s6 }
0x1016   :  { %v1552_v43 = vpop.permute.xlu0 %1551 }
0x1017   :  { %v1554_v17 = vmul.f32 %v2703_v61, %v1552_v43 }
0x1019   :  { %1655 = vrot.lane.b32.xlu0 %v1554_v17, %s2744_s30 }
0x101a   :  { %v1651_v19 = vpop.permute.xlu1 %1650 }
0x101b   :  { %v1653_v11 = vmul.f32 %v2705_v62, %v1651_v19 }
0x101d   :  { %1661 = vrot.lane.b32.xlu1 %v1653_v11, %s2744_s30 }
0x108b   :  { %v1656_v60 = vpop.permute.xlu0 %1655 }
0x108c   :  { %2183 = vst.msk [vmem:[%s3224_s8 + $0x28] sm:$0xff] %vm71_vm1, %v1656_v60  ;;  %2469 = vmatmul.mubr.msk.f32.vlgmr.msra.gmra.mrb[20].mxu0 %vm71_vm1, %v1656_v60 }
0x108d   :  { %2598 = vmatpush3.bf16.msra.mxu0 %v2835_v12  ;;  %2490 = vmatprep.mubr.msk.f32.mxu0 %vm2745_vm2, %v2742_v6 }
0x108e   :  { %2599 = vmatprep.subr.bf16.mxu0 %v2743_v15 }
0x108f   :  { %v1662_v20 = vpop.permute.xlu1 %1661 }
0x1090   :  { %2184 = vst.msk [vmem:[%s3225_s9 + $0x10] sm:$0xff] %vm71_vm1, %v1662_v20  ;;  %2480 = vmatmul.mubr.msk.f32.vlgmr.msra.gmra.mrb[20].mxu1 %vm71_vm1, %v1662_v20 }
0x1091   :  { %2601 = vmatpush3.bf16.msra.mxu0 %v2868_v23  ;;  %2604 = vmatpush3.bf16.msra.mxu1 %v2851_v18 }
0x1092   :  { %2605 = vmatprep.subr.bf16.mxu1 %v2743_v15  ;;  %2501 = vmatprep.mubr.msk.f32.mxu1 %vm2745_vm2, %v2742_v6 }
0x1095   :  { %2607 = vmatpush3.bf16.msra.mxu1 %v2886_v28 }
0x115f   :  { %v1736_v12 = vpop.f32.mrb[20].mxu0 }
0x1160   :  { %v1740_v21 = vadd.f32 %v1736_v12, %v2974_v4  ;;  %v2470_v54 = vpop.f32.mrb[21].mxu0 }
0x1162   :  { %2710 = vtanh.f32 %v1740_v21  ;;  %v2186_v15 = vmul.f32 -1.442695, %v1740_v21 }
0x1163   :  { %v1835_v22 = vpop.f32.mrb[20].mxu1 }
0x1164   :  { %v1839_v24 = vadd.f32 %v1835_v22, %v2952_v46  ;;  %v2481_v25 = vpop.f32.mrb[21].mxu1 }
0x1166   :  { %2712 = vtanh.f32 %v1839_v24  ;;  %v2188_v6 = vmul.f32 -1.442695, %v1839_v24 }
0x1167   :  { %2714 = vpow2.f32 %v2186_v15 }
0x1168   :  { %2716 = vpow2.f32 %v2188_v6 }
0x116c   :  { %v2711_v23 = vpop.eup %2710 }
0x116d   :  { %1750 = vrot.lane.b32.xlu0 %v2711_v23, %s2746_s6 }
0x1170   :  { %v2713_v18 = vpop.eup %2712 }
0x1171   :  { %1849 = vrot.lane.b32.xlu1 %v2713_v18, %s2746_s6  ;;  %v2715_v28 = vpop.eup %2714 }
0x1172   :  { %v1744_v26 = vadd.f32 1.0, %v2715_v28  ;;  %v2717_v4 = vpop.eup %2716 }
0x1173   :  { %v1843_v27 = vadd.f32 1.0, %v2717_v4 }
0x1174   :  { %2718 = vrcp.f32 %v1744_v26 }
0x1175   :  { %2720 = vrcp.f32 %v1843_v27 }
0x117e   :  { %v2719_v29 = vpop.eup %2718 }
0x117f   :  { %v2721_v31 = vpop.eup %2720  ;;  %v1748_v34 = vmul.f32 %v2719_v29, %v1548_v8 }
0x1180   :  { %v1847_v37 = vmul.f32 %v2721_v31, %v1647_v13 }
0x11df   :  { %v1751_v46 = vpop.permute.xlu0 %1750 }
0x11e0   :  { %v1753_v30 = vmul.f32 %v2719_v29, %v1751_v46 }
0x11e2   :  { %1755 = vrot.lane.b32.xlu0 %v1753_v30, %s2744_s30 }
0x11e3   :  { %v1850_v32 = vpop.permute.xlu1 %1849 }
0x11e4   :  { %v1852_v33 = vmul.f32 %v2721_v31, %v1850_v32 }
0x11e6   :  { %1854 = vrot.lane.b32.xlu1 %v1852_v33, %s2744_s30 }
0x1254   :  { %v1756_v35 = vpop.permute.xlu0 %1755 }
0x1255   :  { %v1758_v36 = vadd.f32 %v1756_v35, %v1748_v34 }
0x1257   :  { %2722 = vtanh.f32 %v1758_v36 }
0x1258   :  { %v1855_v50 = vpop.permute.xlu1 %1854 }
0x1259   :  { %v1857_v38 = vadd.f32 %v1855_v50, %v1847_v37 }
0x125b   :  { %2724 = vtanh.f32 %v1857_v38 }
0x1261   :  { %v2723_v39 = vpop.eup %2722 }
0x1262   :  { %1761 = vrot.lane.b32.xlu0 %v2723_v39, %s2746_s6 }
0x1265   :  { %v2725_v1 = vpop.eup %2724 }
0x1266   :  { %1860 = vrot.lane.b32.xlu1 %v2725_v1, %s2746_s6 }
0x12d4   :  { %v1762_v40 = vpop.permute.xlu0 %1761 }
0x12d5   :  { %v1764_v41 = vmul.f32 %v2719_v29, %v1762_v40 }
0x12d7   :  { %1865 = vrot.lane.b32.xlu0 %v1764_v41, %s2744_s30 }
0x12d8   :  { %v1861_v42 = vpop.permute.xlu1 %1860 }
0x12d9   :  { %v1863_v44 = vmul.f32 %v2721_v31, %v1861_v42 }
0x12db   :  { %1871 = vrot.lane.b32.xlu1 %v1863_v44, %s2744_s30 }
0x1349   :  { %v1866_v45 = vpop.permute.xlu0 %1865 }
0x134a   :  { %2189 = vst.msk [vmem:[%s3224_s8 + $0x30] sm:$0xff] %vm71_vm1, %v1866_v45  ;;  %2491 = vmatmul.mubr.msk.f32.vlgmr.msra.gmra.mrb[22].mxu0 %vm71_vm1, %v1866_v45 }
0x134d   :  { %v1872_v47 = vpop.permute.xlu1 %1871 }
0x134e   :  { %2190 = vst.msk [vmem:[%s3225_s9 + $0x8] sm:$0xff] %vm71_vm1, %v1872_v47  ;;  %2502 = vmatmul.mubr.msk.f32.vlgmr.msra.gmra.mrb[22].mxu1 %vm71_vm1, %v1872_v47 }
0x141d   :  { %v1946_v48 = vpop.f32.mrb[22].mxu0 }
0x141e   :  { %v1950_v51 = vadd.f32 %v1946_v48, %v2972_v2  ;;  %v2492_v53 = vpop.f32.mrb[23].mxu0 }
0x1420   :  { %2726 = vtanh.f32 %v1950_v51  ;;  %v2192_v61 = vmul.f32 -1.442695, %v1950_v51 }
0x1421   :  { %v2044_v55 = vpop.f32.mrb[22].mxu1 }
0x1422   :  { %v2048_v56 = vadd.f32 %v2044_v55, %v2954_v49  ;;  %v2503_v59 = vpop.f32.mrb[23].mxu1 }
0x1424   :  { %2728 = vtanh.f32 %v2048_v56  ;;  %v2194_v57 = vmul.f32 -1.442695, %v2048_v56 }
0x1425   :  { %2730 = vpow2.f32 %v2192_v61 }
0x1426   :  { %2732 = vpow2.f32 %v2194_v57 }
0x142a   :  { %v2727_v58 = vpop.eup %2726 }
0x142b   :  { %1960 = vrot.lane.b32.xlu0 %v2727_v58, %s2746_s6 }
0x142e   :  { %v2729_v52 = vpop.eup %2728 }
0x142f   :  { %2058 = vrot.lane.b32.xlu1 %v2729_v52, %s2746_s6  ;;  %v2731_v63 = vpop.eup %2730 }
0x1430   :  { %v1954_v62 = vadd.f32 1.0, %v2731_v63  ;;  %v2733_v2 = vpop.eup %2732 }
0x1431   :  { %v2052_v0 = vadd.f32 1.0, %v2733_v2 }
0x1432   :  { %2734 = vrcp.f32 %v1954_v62 }
0x1433   :  { %2736 = vrcp.f32 %v2052_v0 }
0x143c   :  { %v2735_v3 = vpop.eup %2734 }
0x143d   :  { %v2737_v7 = vpop.eup %2736  ;;  %v1958_v10 = vmul.f32 %v2735_v3, %v1758_v36 }
0x143e   :  { %v2056_v16 = vmul.f32 %v2737_v7, %v1857_v38 }
0x149d   :  { %v1961_v49 = vpop.permute.xlu0 %1960 }
0x149e   :  { %v1963_v5 = vmul.f32 %v2735_v3, %v1961_v49 }
0x14a0   :  { %1965 = vrot.lane.b32.xlu0 %v1963_v5, %s2744_s30 }
0x14a1   :  { %v2059_v8 = vpop.permute.xlu1 %2058 }
0x14a2   :  { %v2061_v9 = vmul.f32 %v2737_v7, %v2059_v8 }
0x14a4   :  { %2063 = vrot.lane.b32.xlu1 %v2061_v9, %s2744_s30 }
0x1512   :  { %v1966_v13 = vpop.permute.xlu0 %1965 }
0x1513   :  { %v1968_v14 = vadd.f32 %v1966_v13, %v1958_v10 }
0x1515   :  { %2738 = vtanh.f32 %v1968_v14 }
0x1516   :  { %v2064_v43 = vpop.permute.xlu1 %2063 }
0x1517   :  { %v2066_v17 = vadd.f32 %v2064_v43, %v2056_v16 }
0x1519   :  { %2740 = vtanh.f32 %v2066_v17 }
0x151f   :  { %v2739_v19 = vpop.eup %2738 }
0x1520   :  { %1971 = vrot.lane.b32.xlu0 %v2739_v19, %s2746_s6 }
0x1523   :  { %v2741_v11 = vpop.eup %2740 }
0x1524   :  { %2069 = vrot.lane.b32.xlu1 %v2741_v11, %s2746_s6 }
0x1592   :  { %v1972_v60 = vpop.permute.xlu0 %1971 }
0x1593   :  { %v1974_v20 = vmul.f32 %v2735_v3, %v1972_v60 }
0x1595   :  { %2074 = vrot.lane.b32.xlu0 %v1974_v20, %s2744_s30 }
0x1596   :  { %v2070_v12 = vpop.permute.xlu1 %2069 }
0x1597   :  { %v2072_v21 = vmul.f32 %v2737_v7, %v2070_v12 }
0x1599   :  { %2080 = vrot.lane.b32.xlu1 %v2072_v21, %s2744_s30  ;;  %2086 = vrot.lane.b32.xlu0 %v1968_v14, %s2747_s19 }
0x159d   :  { %2092 = vrot.lane.b32.xlu1 %v2066_v17, %s2747_s19 }
0x1607   :  { %v2075_v54 = vpop.permute.xlu0 %2074 }
0x1608   :  { %2195 = vst.msk [vmem:[%s3224_s8 + $0x38] sm:$0xff] %vm71_vm1, %v2075_v54  ;;  %2084 = vst.msk [vmem:[#allocation2] sm:$0xff] %vm71_vm1, %v2075_v54 }
0x160b   :  { %v2081_v22 = vpop.permute.xlu1 %2080  ;;  %v2087_v24 = vpop.permute.xlu0 %2086 }
0x160c   :  { %2083 = vst.msk [vmem:[%s3225_s9] sm:$0xff] %vm71_vm1, %v2081_v22  ;;  %2090 = vst.msk [vmem:[#allocation4] sm:$0xff] %vm71_vm1, %v2081_v22 }
0x160d   :  { %2089 = vst.msk [vmem:[#allocation3] sm:$0xff] %vm71_vm1, %v2087_v24 }
0x160f   :  { %v2093_v25 = vpop.permute.xlu1 %2092 }
0x1610   :  { %2095 = vst.msk [vmem:[#allocation5] sm:$0xff] %vm71_vm1, %v2093_v25 }

// kernel: lstm_model_forward.3
= control target key start
LH: loop header
LB: loop body
LE: loop exit
PB: predicated region body
PF: predicated region fallthrough
CT: control target
= control target key end

     0   :  { %vm95_vm0 = vcmask 261120   ;;  %v3378_v3 = vmov 0.0   ;;  %v3379_v39 = vmov 0.0|0.0   ;;  %s3380_s25 = smov 32   ;;  %vm3381_vm1 = vmmov 0   ;;  %s4007_s5 = inlined_call_operand.vmem [shape: f32[32,128], index: 5, kind: input, shape index: {}]   ;;  %s4008_s7 = inlined_call_operand.vmem [shape: f32[32,128], index: 7, kind: input, shape index: {}]   ;;  %s4009_s1 = inlined_call_operand.vmem [shape: f32[8,8,32], index: 1, kind: input, shape index: {}, may-alias: {1,3}]   ;;  %s4010_s3 = inlined_call_operand.vmem [shape: f32[8,8,32], index: 3, kind: input, shape index: {}, may-alias: {1,3}]   ;;  %s4011_s4 = inlined_call_operand.vmem [shape: f32[32,128], index: 4, kind: input, shape index: {}]   ;;  %s4012_s6 = inlined_call_operand.vmem [shape: f32[32,128], index: 6, kind: input, shape index: {}]   ;;  %s4013_s0 = inlined_call_operand.vmem [shape: f32[8,8,32], index: 0, kind: input, shape index: {}, may-alias: {0,2}]   ;;  %s4014_s8 = inlined_call_operand.vmem [shape: f32[32,128], index: 8, kind: input, shape index: {}]   ;;  %s4015_s2 = inlined_call_operand.vmem [shape: f32[8,8,32], index: 2, kind: input, shape index: {}, may-alias: {0,2}]   ;;  %s4016_s9 = inlined_call_operand.vmem [shape: f32[32,128], index: 9, kind: input, shape index: {}]   ;;  %s4017_s10 = inlined_call_operand.vmem [shape: f32[1,128], index: 10, kind: input, shape index: {}]   ;;  %s4018_s11 = inlined_call_operand.vmem [shape: f32[1,128], index: 11, kind: input, shape index: {}]   ;;  %s4019_s12 = inlined_call_operand.vmem [shape: f32[2,32,4], index: 12, kind: input, shape index: {}]   ;;  %s4020_s13 = inlined_call_operand.vmem [shape: f32[1,4], index: 13, kind: input, shape index: {}]   ;;  %s4021_s14 = inlined_call_operand.vmem [shape: f32[8,4], index: 14, kind: output, shape index: {}]  }
   0x1   :  { %v122_v0 = vld [vmem:[%s4007_s5] sm:$0xff]  ;;  %v123_v1 = vld [vmem:[%s4007_s5 + $0x8] sm:$0xff]  ;;  %96 = vst.msk [vmem:[#allocation2] sm:$0xff] %vm95_vm0, %v3378_v3  ;;  %97 = vst.msk [vmem:[#allocation3] sm:$0xff] %vm95_vm0, %v3378_v3  ;;  %vm2581_vm2 = vcmask 31744  }
   0x2   :  { %v428_v2 = vld [vmem:[%s4008_s7] sm:$0xff]  ;;  %98 = vst.msk [vmem:[#allocation4] sm:$0xff] %vm95_vm0, %v3378_v3  ;;  %99 = vst.msk [vmem:[#allocation5] sm:$0xff] %vm95_vm0, %v3378_v3  ;;  %v3088_v4 = vpack.c.bf16 %v123_v1, %v122_v0  ;;  %v429_v5 = vld [vmem:[%s4008_s7 + $0x8] sm:$0xff] }
   0x3   :  { %100 = vst.msk [vmem:[#allocation8] sm:$0xff] %vm95_vm0, %v3378_v3  ;;  %101 = vst.msk [vmem:[#allocation9] sm:$0xff] %vm95_vm0, %v3378_v3  ;;  %v124_v6 = vld [vmem:[%s4007_s5 + $0x10] sm:$0xff]  ;;  %v125_v7 = vld [vmem:[%s4007_s5 + $0x18] sm:$0xff]  ;;  %v3104_v8 = vpack.c.bf16 %v429_v5, %v428_v2 }
   0x4   :  { %v3092_v9 = vpack.c.bf16 %v125_v7, %v124_v6  ;;  %v430_v10 = vld [vmem:[%s4008_s7 + $0x10] sm:$0xff]  ;;  %v431_v11 = vld [vmem:[%s4008_s7 + $0x18] sm:$0xff]  ;;  %v114_v12 = vld [vmem:[%s4009_s1] sm:$0xff]  ;;  %3089 = vmatprep.subr.bf16.mxu0 %v3088_v4 }
   0x5   :  { %v3108_v13 = vpack.c.bf16 %v431_v11, %v430_v10  ;;  %2818 = vmatprep.mubr.msk.f32.mxu0 %vm95_vm0, %v114_v12  ;;  %v420_v14 = vld [vmem:[%s4010_s3] sm:$0xff]  ;;  %3105 = vmatprep.subr.bf16.mxu1 %v3104_v8  ;;  %v111_v16 = vld [vmem:[%s4011_s4 + $0x8] sm:$0xff]  ;;  %v112_v21 = vld [vmem:[%s4011_s4 + $0x10] sm:$0xff] }
   0x6   :  { %v110_v15 = vld [vmem:[%s4011_s4] sm:$0xff]  ;;  %3091 = vmatpush3.bf16.msra.mxu0 %v3088_v4  ;;  %3107 = vmatpush3.bf16.msra.mxu1 %v3104_v8  ;;  %v417_v19 = vld [vmem:[%s4012_s6 + $0x8] sm:$0xff]  ;;  %v113_v23 = vld [vmem:[%s4011_s4 + $0x18] sm:$0xff]  ;;  %s3383_s4 = smov 96  }
   0x7   :  { %3093 = vmatprep.subr.bf16.mxu0 %v3092_v9  ;;  %v3096_v17 = vpack.c.bf16 %v111_v16, %v110_v15  ;;  %3109 = vmatprep.subr.bf16.mxu1 %v3108_v13  ;;  %v416_v18 = vld [vmem:[%s4012_s6] sm:$0xff]  ;;  %v115_v22 = vld [vmem:[%s4009_s1 + $0x8] sm:$0xff]  ;;  %v116_v25 = vld [vmem:[%s4009_s1 + $0x10] sm:$0xff]  ;;  %v3100_v27 = vpack.c.bf16 %v113_v23, %v112_v21 }
   0x8   :  { %2858 = vmatprep.mubr.msk.f32.mxu1 %vm95_vm0, %v420_v14  ;;  %v3112_v20 = vpack.c.bf16 %v417_v19, %v416_v18  ;;  %v421_v24 = vld [vmem:[%s4010_s3 + $0x8] sm:$0xff]  ;;  %v422_v26 = vld [vmem:[%s4010_s3 + $0x10] sm:$0xff]  ;;  %v419_v29 = vld [vmem:[%s4012_s6 + $0x18] sm:$0xff] }
   0x9   :  { %v418_v28 = vld [vmem:[%s4012_s6 + $0x10] sm:$0xff]  ;;  %v117_v31 = vld [vmem:[%s4009_s1 + $0x18] sm:$0xff]  ;;  %v118_v33 = vld [vmem:[%s4009_s1 + $0x20] sm:$0xff] }
   0xa   :  { %3095 = vmatpush3.bf16.msra.mxu0 %v3092_v9  ;;  %3111 = vmatpush3.bf16.msra.mxu1 %v3108_v13  ;;  %v3116_v30 = vpack.c.bf16 %v419_v29, %v418_v28  ;;  %v423_v32 = vld [vmem:[%s4010_s3 + $0x18] sm:$0xff]  ;;  %v424_v34 = vld [vmem:[%s4010_s3 + $0x20] sm:$0xff]  ;;  %v119_v35 = vld [vmem:[%s4009_s1 + $0x28] sm:$0xff] }
   0xb   :  { %3097 = vmatprep.subr.bf16.mxu0 %v3096_v17  ;;  %3113 = vmatprep.subr.bf16.mxu1 %v3112_v20  ;;  %v425_v36 = vld [vmem:[%s4010_s3 + $0x28] sm:$0xff]  ;;  %v120_v37 = vld [vmem:[%s4009_s1 + $0x30] sm:$0xff]  ;;  %v121_v41 = vld [vmem:[%s4009_s1 + $0x38] sm:$0xff] }
   0xc   :  { %v426_v38 = vld [vmem:[%s4010_s3 + $0x30] sm:$0xff]  ;;  %v722_v40 = vld [vmem:[#allocation3] sm:$0xff]  ;;  %v427_v42 = vld [vmem:[%s4010_s3 + $0x38] sm:$0xff] }
   0xd   :  { %2819 = vmatmul.mubr.msk.f32.vlgmr.msra.gmra.mrb[0].mxu0 %vm95_vm0, %v115_v22  ;;  %2859 = vmatmul.mubr.msk.f32.vlgmr.msra.gmra.mrb[0].mxu1 %vm95_vm0, %v421_v24  ;;  %v102_v43 = vld [vmem:[%s4013_s0] sm:$0xff]  ;;  %v714_v45 = vld [vmem:[%s4014_s8 + $0x8] sm:$0xff]  ;;  %v724_v47 = vld [vmem:[#allocation5] sm:$0xff] }
   0xe   :  { %3099 = vmatpush3.bf16.msra.mxu0 %v3096_v17  ;;  %2821 = vmatprep.mubr.msk.f32.mxu0 %vm95_vm0, %v116_v25  ;;  %v713_v44 = vld [vmem:[%s4014_s8] sm:$0xff]  ;;  %v718_v49 = vld [vmem:[%s4016_s9 + $0x8] sm:$0xff]  ;;  %v104_v53 = vld [vmem:[%s4013_s0 + $0x10] sm:$0xff] }
   0xf   :  { %2861 = vmatprep.mubr.msk.f32.mxu1 %vm95_vm0, %v422_v26  ;;  %3115 = vmatpush3.bf16.msra.mxu1 %v3112_v20  ;;  %v408_v46 = vld [vmem:[%s4015_s2] sm:$0xff]  ;;  %v103_v50 = vld [vmem:[%s4013_s0 + $0x8] sm:$0xff]  ;;  %v3608_v51 = vpack.c.bf16 %v714_v45, %v713_v44  ;;  %v410_v54 = vld [vmem:[%s4015_s2 + $0x10] sm:$0xff] }
  0x10   :  { %3101 = vmatprep.subr.bf16.mxu0 %v3100_v27  ;;  %3117 = vmatprep.subr.bf16.mxu1 %v3116_v30  ;;  %v717_v48 = vld [vmem:[%s4016_s9] sm:$0xff]  ;;  %v409_v52 = vld [vmem:[%s4015_s2 + $0x8] sm:$0xff]  ;;  %v715_v56 = vld [vmem:[%s4014_s8 + $0x10] sm:$0xff] }
  0x11   :  { %2822 = vmatmul.mubr.msk.f32.gmra.mrb[2].mxu0 %vm95_vm0, %v117_v31  ;;  %2862 = vmatmul.mubr.msk.f32.gmra.mrb[2].mxu1 %vm95_vm0, %v423_v32  ;;  %v3621_v55 = vpack.c.bf16 %v718_v49, %v717_v48  ;;  %v716_v57 = vld [vmem:[%s4014_s8 + $0x18] sm:$0xff]  ;;  %v719_v58 = vld [vmem:[%s4016_s9 + $0x10] sm:$0xff]  ;;  %v106_v62 = vld [vmem:[%s4013_s0 + $0x20] sm:$0xff] }
  0x12   :  { %2824 = vmatprep.mubr.msk.f32.mxu0 %vm95_vm0, %v118_v33  ;;  %2864 = vmatprep.mubr.msk.f32.mxu1 %vm95_vm0, %v424_v34  ;;  %v720_v59 = vld [vmem:[%s4016_s9 + $0x18] sm:$0xff]  ;;  %v3649_v63 = vpack.c.bf16 %v716_v57, %v715_v56  ;;  %v412_v0 = vld [vmem:[%s4015_s2 + $0x20] sm:$0xff]  ;;  %v107_v2 = vld [vmem:[%s4013_s0 + $0x28] sm:$0xff] }
  0x13   :  { %3103 = vmatpush3.bf16.msra.mxu0 %v3100_v27  ;;  %3119 = vmatpush3.bf16.msra.mxu1 %v3116_v30  ;;  %v105_v60 = vld [vmem:[%s4013_s0 + $0x18] sm:$0xff]  ;;  %v3656_v1 = vpack.c.bf16 %v720_v59, %v719_v58  ;;  %v413_v4 = vld [vmem:[%s4015_s2 + $0x28] sm:$0xff]  ;;  %v108_v5 = vld [vmem:[%s4013_s0 + $0x30] sm:$0xff] }
  0x14   :  { %3120 = vmatprep.subr.bf16.mxu0 %v3379_v39  ;;  %3126 = vmatprep.subr.bf16.mxu1 %v3379_v39  ;;  %v411_v61 = vld [vmem:[%s4015_s2 + $0x18] sm:$0xff]  ;;  %v414_v6 = vld [vmem:[%s4015_s2 + $0x30] sm:$0xff]  ;;  %v721_v9 = vld [vmem:[#allocation2] sm:$0xff] }
  0x15   :  { %2825 = vmatmul.mubr.msk.f32.gmra.mrb[4].mxu0 %vm95_vm0, %v119_v35  ;;  %2865 = vmatmul.mubr.msk.f32.gmra.mrb[4].mxu1 %vm95_vm0, %v425_v36  ;;  %v109_v7 = vld [vmem:[%s4013_s0 + $0x38] sm:$0xff]  ;;  %v723_v10 = vld [vmem:[#allocation4] sm:$0xff]  ;;  %v2615_v11 = vld [vmem:[%s4017_s10] ss:$0 sm:$0xff]  ;;  %s3382_s10 = smov 64  }
  0x16   :  { %2827 = vmatprep.mubr.msk.f32.mxu0 %vm95_vm0, %v120_v37  ;;  %2867 = vmatprep.mubr.msk.f32.mxu1 %vm95_vm0, %v426_v38  ;;  %v415_v8 = vld [vmem:[%s4015_s2 + $0x38] sm:$0xff]  ;;  %v2632_v12 = vld [vmem:[%s4018_s11] ss:$0 sm:$0xff] }
  0x17   :  { %810 = vrot.lane.b32.xlu1 %v722_v40, %s3380_s25 }
  0x19   :  { %2828 = vmatmul.mubr.msk.f32.gmra.mrb[6].mxu0 %vm95_vm0, %v121_v41  ;;  %2868 = vmatmul.mubr.msk.f32.gmra.mrb[6].mxu1 %vm95_vm0, %v427_v42 }
  0x1a   :  { %2838 = vmatprep.mubr.msk.f32.mxu0 %vm95_vm0, %v102_v43  ;;  %2878 = vmatprep.mubr.msk.f32.mxu1 %vm95_vm0, %v408_v46 }
  0x1b   :  { %914 = vrot.lane.b32.xlu1 %v724_v47, %s3380_s25 }
  0x1d   :  { %2839 = vmatmul.mubr.msk.f32.vlgmr.msra.gmra.mrb[0].mxu0 %vm95_vm0, %v103_v50  ;;  %2879 = vmatmul.mubr.msk.f32.vlgmr.msra.gmra.mrb[0].mxu1 %vm95_vm0, %v409_v52 }
  0x1e   :  { %3122 = vmatpush3.bf16.msra.mxu0 %v3608_v51  ;;  %2841 = vmatprep.mubr.msk.f32.mxu0 %vm95_vm0, %v104_v53 }
  0x1f   :  { %2881 = vmatprep.mubr.msk.f32.mxu1 %vm95_vm0, %v410_v54  ;;  %3128 = vmatpush3.bf16.msra.mxu1 %v3621_v55 }
  0x20   :  { %3123 = vmatprep.subr.bf16.mxu0 %v3379_v39  ;;  %3129 = vmatprep.subr.bf16.mxu1 %v3379_v39 }
  0x21   :  { %2842 = vmatmul.mubr.msk.f32.gmra.mrb[2].mxu0 %vm95_vm0, %v105_v60  ;;  %2882 = vmatmul.mubr.msk.f32.gmra.mrb[2].mxu1 %vm95_vm0, %v411_v61 }
  0x22   :  { %2844 = vmatprep.mubr.msk.f32.mxu0 %vm95_vm0, %v106_v62  ;;  %2884 = vmatprep.mubr.msk.f32.mxu1 %vm95_vm0, %v412_v0 }
  0x23   :  { %3125 = vmatpush3.bf16.msra.mxu0 %v3649_v63  ;;  %3131 = vmatpush3.bf16.msra.mxu1 %v3656_v1 }
  0x24   :  { %3132 = vmatprep.subr.bf16.mxu0 %v3379_v39  ;;  %3138 = vmatprep.subr.bf16.mxu1 %v3379_v39 }
  0x25   :  { %2845 = vmatmul.mubr.msk.f32.gmra.mrb[4].mxu0 %vm95_vm0, %v107_v2  ;;  %2885 = vmatmul.mubr.msk.f32.gmra.mrb[4].mxu1 %vm95_vm0, %v413_v4 }
  0x26   :  { %2847 = vmatprep.mubr.msk.f32.mxu0 %vm95_vm0, %v108_v5  ;;  %2887 = vmatprep.mubr.msk.f32.mxu1 %vm95_vm0, %v414_v6 }
  0x29   :  { %2848 = vmatmul.mubr.msk.f32.gmra.mrb[6].mxu0 %vm95_vm0, %v109_v7  ;;  %2888 = vmatmul.mubr.msk.f32.gmra.mrb[6].mxu1 %vm95_vm0, %v415_v8 }
  0x2a   :  { %2898 = vmatprep.mubr.msk.f32.mxu0 %vm3381_vm1, %v3378_v3  ;;  %2909 = vmatprep.mubr.msk.f32.mxu1 %vm3381_vm1, %v3378_v3 }
  0x2d   :  { %2899 = vmatmul.mubr.msk.f32.vlgmr.msra.gmra.mrb[8].mxu0 %vm95_vm0, %v721_v9  ;;  %2910 = vmatmul.mubr.msk.f32.vlgmr.msra.gmra.mrb[8].mxu1 %vm95_vm0, %v723_v10 }
  0x2e   :  { %3134 = vmatpush3.bf16.msra.mxu0 %v3608_v51  ;;  %3140 = vmatpush3.bf16.msra.mxu1 %v3621_v55 }
  0x2f   :  { %3135 = vmatprep.subr.bf16.mxu0 %v3379_v39  ;;  %2920 = vmatprep.mubr.msk.f32.mxu0 %vm3381_vm1, %v3378_v3 }
  0x30   :  { %3141 = vmatprep.subr.bf16.mxu1 %v3379_v39  ;;  %2931 = vmatprep.mubr.msk.f32.mxu1 %vm3381_vm1, %v3378_v3 }
  0x32   :  { %3137 = vmatpush3.bf16.msra.mxu0 %v3649_v63  ;;  %3143 = vmatpush3.bf16.msra.mxu1 %v3656_v1 }
  0x33   :  { %3144 = vmatprep.subr.bf16.mxu0 %v3379_v39  ;;  %3150 = vmatprep.subr.bf16.mxu1 %v3379_v39 }
  0x89   :  { %v811_v7 = vpop.permute.xlu1 %810 }
  0x8d   :  { %v915_v9 = vpop.permute.xlu1 %914 }
  0xf0   :  { %v2840_v13 = vpop.f32.mrb[0].mxu0  ;;  %v2880_v15 = vpop.f32.mrb[0].mxu1 }
  0xf1   :  { %v3715_v14 = vadd.f32 %v2840_v13, %v2615_v11  ;;  %v346_v16 = vpop.f32.mrb[1].mxu0  ;;  %v3717_v17 = vadd.f32 %v2880_v15, %v2632_v12  ;;  %v651_v18 = vpop.f32.mrb[1].mxu1 }
  0xf2   :  { %v3719_v19 = vadd.f32 %v2632_v12, %v651_v18  ;;  %v392_v43 = vadd.f32 %v2615_v11, %v346_v16 }
  0xf4   :  { %v2843_v20 = vpop.f32.mrb[2].mxu0  ;;  %v2883_v22 = vpop.f32.mrb[2].mxu1 }
  0xf5   :  { %v3721_v21 = vadd.f32 %v2843_v20, %v2615_v11  ;;  %v356_v23 = vpop.f32.mrb[3].mxu0  ;;  %v3723_v24 = vadd.f32 %v2883_v22, %v2632_v12  ;;  %v661_v26 = vpop.f32.mrb[3].mxu1 }
  0xf6   :  { %v3725_v25 = vadd.f32 %v2615_v11, %v356_v23  ;;  %v3727_v27 = vadd.f32 %v2632_v12, %v661_v26 }
  0xf8   :  { %v2846_v28 = vpop.f32.mrb[4].mxu0  ;;  %v2886_v30 = vpop.f32.mrb[4].mxu1 }
  0xf9   :  { %v3729_v29 = vadd.f32 %v2846_v28, %v2615_v11  ;;  %v366_v31 = vpop.f32.mrb[5].mxu0  ;;  %v3731_v32 = vadd.f32 %v2886_v30, %v2632_v12  ;;  %v671_v34 = vpop.f32.mrb[5].mxu1 }
  0xfa   :  { %v3733_v33 = vadd.f32 %v2615_v11, %v366_v31  ;;  %v3735_v35 = vadd.f32 %v2632_v12, %v671_v34 }
  0xfc   :  { %v2849_v36 = vpop.f32.mrb[6].mxu0  ;;  %v2889_v38 = vpop.f32.mrb[6].mxu1 }
  0xfd   :  { %v3737_v37 = vadd.f32 %v2849_v36, %v2615_v11  ;;  %v376_v40 = vpop.f32.mrb[7].mxu0  ;;  %v681_v42 = vpop.f32.mrb[7].mxu1  ;;  %v704_v45 = vadd.f32 %v2889_v38, %v2632_v12 }
  0xfe   :  { %v3739_v41 = vadd.f32 %v2615_v11, %v376_v40  ;;  %v3741_v44 = vadd.f32 %v2632_v12, %v681_v42 }
 0x100   :  { %v797_v46 = vpop.f32.mrb[8].mxu0  ;;  %v901_v48 = vpop.f32.mrb[8].mxu1 }
 0x101   :  { %v801_v47 = vadd.f32 %v797_v46, %v392_v43  ;;  %v2900_v49 = vpop.f32.mrb[9].mxu0  ;;  %v905_v50 = vadd.f32 %v901_v48, %v704_v45  ;;  %v2911_v52 = vpop.f32.mrb[9].mxu1 }
 0x103   :  { %3250 = vtanh.f32 %v801_v47  ;;  %v2634_v56 = vmul.f32 -1.442695, %v801_v47  ;;  %v2636_v57 = vmul.f32 -1.442695, %v905_v50 }
 0x104   :  { %3252 = vtanh.f32 %v905_v50 }
 0x105   :  { %3254 = vpow2.f32 %v2634_v56 }
 0x106   :  { %3256 = vpow2.f32 %v2636_v57 }
 0x10d   :  { %v3251_v53 = vpop.eup %3250 }
 0x10e   :  { %815 = vrot.lane.b32.xlu0 %v3251_v53, %s3382_s10  ;;  %v3253_v54 = vpop.eup %3252 }
 0x10f   :  { %v3255_v58 = vpop.eup %3254 }
 0x110   :  { %v805_v59 = vadd.f32 1.0, %v3255_v58  ;;  %v3257_v60 = vpop.eup %3256 }
 0x111   :  { %v909_v61 = vadd.f32 1.0, %v3257_v60 }
 0x112   :  { %919 = vrot.lane.b32.xlu0 %v3253_v54, %s3382_s10  ;;  %3258 = vrcp.f32 %v805_v59 }
 0x113   :  { %3260 = vrcp.f32 %v909_v61 }
 0x11c   :  { %v3259_v62 = vpop.eup %3258 }
 0x11d   :  { %v3261_v4 = vpop.eup %3260  ;;  %v813_v8 = vmul.f32 %v3259_v62, %v811_v7 }
 0x11e   :  { %v917_v12 = vmul.f32 %v3261_v4, %v915_v9 }
 0x180   :  { %v816_v0 = vpop.permute.xlu0 %815 }
 0x181   :  { %v818_v2 = vmul.f32 %v3259_v62, %v816_v0 }
 0x183   :  { %820 = vrot.lane.b32.xlu0 %v818_v2, %s3380_s25 }
 0x184   :  { %v920_v5 = vpop.permute.xlu0 %919 }
 0x185   :  { %v922_v6 = vmul.f32 %v3261_v4, %v920_v5 }
 0x187   :  { %924 = vrot.lane.b32.xlu1 %v922_v6, %s3380_s25 }
 0x1f5   :  { %v821_v10 = vpop.permute.xlu0 %820 }
 0x1f6   :  { %v823_v11 = vadd.f32 %v821_v10, %v813_v8 }
 0x1f8   :  { %3262 = vtanh.f32 %v823_v11 }
 0x1f9   :  { %v925_v13 = vpop.permute.xlu1 %924 }
 0x1fa   :  { %v927_v15 = vadd.f32 %v925_v13, %v917_v12 }
 0x1fc   :  { %3264 = vtanh.f32 %v927_v15 }
 0x202   :  { %v3263_v16 = vpop.eup %3262 }
 0x203   :  { %826 = vrot.lane.b32.xlu0 %v3263_v16, %s3382_s10 }
 0x206   :  { %v3265_v18 = vpop.eup %3264 }
 0x207   :  { %930 = vrot.lane.b32.xlu1 %v3265_v18, %s3382_s10 }
 0x275   :  { %v827_v20 = vpop.permute.xlu0 %826 }
 0x276   :  { %v829_v22 = vmul.f32 %v3259_v62, %v827_v20 }
 0x278   :  { %935 = vrot.lane.b32.xlu0 %v829_v22, %s3380_s25 }
 0x279   :  { %v931_v23 = vpop.permute.xlu1 %930 }
 0x27a   :  { %v933_v26 = vmul.f32 %v3261_v4, %v931_v23 }
 0x27c   :  { %940 = vrot.lane.b32.xlu1 %v933_v26, %s3380_s25 }
 0x2ea   :  { %v3751_v28 = vpop.permute.xlu0 %935 }
 0x2eb   :  { %2921 = vmatmul.mubr.msk.f32.vlgmr.msra.gmra.mrb[10].mxu0 %vm95_vm0, %v3751_v28 }
 0x2ec   :  { %3146 = vmatpush3.bf16.msra.mxu0 %v3608_v51  ;;  %2942 = vmatprep.mubr.msk.f32.mxu0 %vm3381_vm1, %v3378_v3 }
 0x2ed   :  { %3147 = vmatprep.subr.bf16.mxu0 %v3379_v39 }
 0x2ee   :  { %v3759_v30 = vpop.permute.xlu1 %940 }
 0x2ef   :  { %2932 = vmatmul.mubr.msk.f32.vlgmr.msra.gmra.mrb[10].mxu1 %vm95_vm0, %v3759_v30 }
 0x2f0   :  { %3149 = vmatpush3.bf16.msra.mxu0 %v3649_v63  ;;  %3152 = vmatpush3.bf16.msra.mxu1 %v3621_v55 }
 0x2f1   :  { %3153 = vmatprep.subr.bf16.mxu1 %v3379_v39  ;;  %2953 = vmatprep.mubr.msk.f32.mxu1 %vm3381_vm1, %v3378_v3 }
 0x2f2   :  { %3156 = vmatprep.subr.bf16.mxu0 %v3379_v39 }
 0x2f4   :  { %3155 = vmatpush3.bf16.msra.mxu1 %v3656_v1 }
 0x2f5   :  { %3162 = vmatprep.subr.bf16.mxu1 %v3379_v39 }
 0x3be   :  { %v1014_v31 = vpop.f32.mrb[10].mxu0 }
 0x3bf   :  { %v1018_v34 = vadd.f32 %v1014_v31, %v3715_v14  ;;  %v2922_v36 = vpop.f32.mrb[11].mxu0 }
 0x3c1   :  { %3266 = vtanh.f32 %v1018_v34  ;;  %v2638_v46 = vmul.f32 -1.442695, %v1018_v34 }
 0x3c2   :  { %v1113_v38 = vpop.f32.mrb[10].mxu1 }
 0x3c3   :  { %v1117_v40 = vadd.f32 %v1113_v38, %v3741_v44  ;;  %v2933_v42 = vpop.f32.mrb[11].mxu1 }
 0x3c5   :  { %3268 = vtanh.f32 %v1117_v40  ;;  %v2640_v47 = vmul.f32 -1.442695, %v1117_v40 }
 0x3c6   :  { %3270 = vpow2.f32 %v2638_v46 }
 0x3c7   :  { %3272 = vpow2.f32 %v2640_v47 }
 0x3cb   :  { %v3267_v43 = vpop.eup %3266 }
 0x3cc   :  { %1028 = vrot.lane.b32.xlu0 %v3267_v43, %s3382_s10 }
 0x3cf   :  { %v3269_v45 = vpop.eup %3268 }
 0x3d0   :  { %1127 = vrot.lane.b32.xlu1 %v3269_v45, %s3382_s10  ;;  %v3271_v48 = vpop.eup %3270 }
 0x3d1   :  { %v1022_v49 = vadd.f32 1.0, %v3271_v48  ;;  %v3273_v14 = vpop.eup %3272 }
 0x3d2   :  { %v1121_v50 = vadd.f32 1.0, %v3273_v14 }
 0x3d3   :  { %3274 = vrcp.f32 %v1022_v49 }
 0x3d4   :  { %3276 = vrcp.f32 %v1121_v50 }
 0x3dd   :  { %v3275_v52 = vpop.eup %3274 }
 0x3de   :  { %v3277_v54 = vpop.eup %3276  ;;  %v1026_v58 = vmul.f32 %v3275_v52, %v823_v11 }
 0x3df   :  { %v1125_v61 = vmul.f32 %v3277_v54, %v927_v15 }
 0x43e   :  { %v1029_v44 = vpop.permute.xlu0 %1028 }
 0x43f   :  { %v1031_v53 = vmul.f32 %v3275_v52, %v1029_v44 }
 0x441   :  { %1033 = vrot.lane.b32.xlu0 %v1031_v53, %s3380_s25 }
 0x442   :  { %v1128_v56 = vpop.permute.xlu1 %1127 }
 0x443   :  { %v1130_v57 = vmul.f32 %v3277_v54, %v1128_v56 }
 0x445   :  { %1132 = vrot.lane.b32.xlu1 %v1130_v57, %s3380_s25 }
 0x4b3   :  { %v1034_v59 = vpop.permute.xlu0 %1033 }
 0x4b4   :  { %v1036_v60 = vadd.f32 %v1034_v59, %v1026_v58 }
 0x4b6   :  { %3278 = vtanh.f32 %v1036_v60 }
 0x4b7   :  { %v1133_v62 = vpop.permute.xlu1 %1132 }
 0x4b8   :  { %v1135_v0 = vadd.f32 %v1133_v62, %v1125_v61 }
 0x4ba   :  { %3280 = vtanh.f32 %v1135_v0 }
 0x4c0   :  { %v3279_v2 = vpop.eup %3278 }
 0x4c1   :  { %1039 = vrot.lane.b32.xlu0 %v3279_v2, %s3382_s10 }
 0x4c4   :  { %v3281_v4 = vpop.eup %3280 }
 0x4c5   :  { %1138 = vrot.lane.b32.xlu1 %v3281_v4, %s3382_s10 }
 0x533   :  { %v1040_v5 = vpop.permute.xlu0 %1039 }
 0x534   :  { %v1042_v6 = vmul.f32 %v3275_v52, %v1040_v5 }
 0x536   :  { %1143 = vrot.lane.b32.xlu0 %v1042_v6, %s3380_s25 }
 0x537   :  { %v1139_v7 = vpop.permute.xlu1 %1138 }
 0x538   :  { %v1141_v8 = vmul.f32 %v3277_v54, %v1139_v7 }
 0x53a   :  { %1148 = vrot.lane.b32.xlu1 %v1141_v8, %s3380_s25 }
 0x5a8   :  { %v3781_v9 = vpop.permute.xlu0 %1143 }
 0x5a9   :  { %2943 = vmatmul.mubr.msk.f32.vlgmr.msra.gmra.mrb[12].mxu0 %vm95_vm0, %v3781_v9 }
 0x5aa   :  { %3158 = vmatpush3.bf16.msra.mxu0 %v3608_v51  ;;  %2964 = vmatprep.mubr.msk.f32.mxu0 %vm3381_vm1, %v3378_v3 }
 0x5ab   :  { %3159 = vmatprep.subr.bf16.mxu0 %v3379_v39 }
 0x5ac   :  { %v3789_v10 = vpop.permute.xlu1 %1148 }
 0x5ad   :  { %2954 = vmatmul.mubr.msk.f32.vlgmr.msra.gmra.mrb[12].mxu1 %vm95_vm0, %v3789_v10 }
 0x5ae   :  { %3161 = vmatpush3.bf16.msra.mxu0 %v3649_v63  ;;  %3164 = vmatpush3.bf16.msra.mxu1 %v3621_v55 }
 0x5af   :  { %3165 = vmatprep.subr.bf16.mxu1 %v3379_v39  ;;  %2975 = vmatprep.mubr.msk.f32.mxu1 %vm3381_vm1, %v3378_v3 }
 0x5b0   :  { %3168 = vmatprep.subr.bf16.mxu0 %v3379_v39 }
 0x5b2   :  { %3167 = vmatpush3.bf16.msra.mxu1 %v3656_v1 }
 0x5b3   :  { %3174 = vmatprep.subr.bf16.mxu1 %v3379_v39 }
 0x67c   :  { %v1222_v11 = vpop.f32.mrb[12].mxu0 }
 0x67d   :  { %v1226_v12 = vadd.f32 %v1222_v11, %v3725_v25  ;;  %v2944_v13 = vpop.f32.mrb[13].mxu0 }
 0x67f   :  { %3282 = vtanh.f32 %v1226_v12  ;;  %v2642_v23 = vmul.f32 -1.442695, %v1226_v12 }
 0x680   :  { %v1321_v15 = vpop.f32.mrb[12].mxu1 }
 0x681   :  { %v1325_v16 = vadd.f32 %v1321_v15, %v3731_v32  ;;  %v2955_v18 = vpop.f32.mrb[13].mxu1 }
 0x683   :  { %3284 = vtanh.f32 %v1325_v16  ;;  %v2644_v26 = vmul.f32 -1.442695, %v1325_v16 }
 0x684   :  { %3286 = vpow2.f32 %v2642_v23 }
 0x685   :  { %3288 = vpow2.f32 %v2644_v26 }
 0x689   :  { %v3283_v20 = vpop.eup %3282 }
 0x68a   :  { %1236 = vrot.lane.b32.xlu0 %v3283_v20, %s3382_s10 }
 0x68d   :  { %v3285_v22 = vpop.eup %3284 }
 0x68e   :  { %1335 = vrot.lane.b32.xlu1 %v3285_v22, %s3382_s10  ;;  %v3287_v31 = vpop.eup %3286 }
 0x68f   :  { %v1230_v34 = vadd.f32 1.0, %v3287_v31  ;;  %v3289_v25 = vpop.eup %3288 }
 0x690   :  { %v1329_v36 = vadd.f32 1.0, %v3289_v25 }
 0x691   :  { %3290 = vrcp.f32 %v1230_v34 }
 0x692   :  { %3292 = vrcp.f32 %v1329_v36 }
 0x69b   :  { %v3291_v38 = vpop.eup %3290 }
 0x69c   :  { %v3293_v42 = vpop.eup %3292  ;;  %v1234_v46 = vmul.f32 %v3291_v38, %v1036_v60 }
 0x69d   :  { %v1333_v49 = vmul.f32 %v3293_v42, %v1135_v0 }
 0x6fc   :  { %v1237_v32 = vpop.permute.xlu0 %1236 }
 0x6fd   :  { %v1239_v40 = vmul.f32 %v3291_v38, %v1237_v32 }
 0x6ff   :  { %1241 = vrot.lane.b32.xlu0 %v1239_v40, %s3380_s25 }
 0x700   :  { %v1336_v43 = vpop.permute.xlu1 %1335 }
 0x701   :  { %v1338_v45 = vmul.f32 %v3293_v42, %v1336_v43 }
 0x703   :  { %1340 = vrot.lane.b32.xlu1 %v1338_v45, %s3380_s25 }
 0x771   :  { %v1242_v47 = vpop.permute.xlu0 %1241 }
 0x772   :  { %v1244_v48 = vadd.f32 %v1242_v47, %v1234_v46 }
 0x774   :  { %3294 = vtanh.f32 %v1244_v48 }
 0x775   :  { %v1341_v14 = vpop.permute.xlu1 %1340 }
 0x776   :  { %v1343_v50 = vadd.f32 %v1341_v14, %v1333_v49 }
 0x778   :  { %3296 = vtanh.f32 %v1343_v50 }
 0x77e   :  { %v3295_v52 = vpop.eup %3294 }
 0x77f   :  { %1247 = vrot.lane.b32.xlu0 %v3295_v52, %s3382_s10 }
 0x782   :  { %v3297_v44 = vpop.eup %3296 }
 0x783   :  { %1346 = vrot.lane.b32.xlu1 %v3297_v44, %s3382_s10 }
 0x7f1   :  { %v1248_v53 = vpop.permute.xlu0 %1247 }
 0x7f2   :  { %v1250_v54 = vmul.f32 %v3291_v38, %v1248_v53 }
 0x7f4   :  { %1351 = vrot.lane.b32.xlu0 %v1250_v54, %s3380_s25 }
 0x7f5   :  { %v1347_v56 = vpop.permute.xlu1 %1346 }
 0x7f6   :  { %v1349_v57 = vmul.f32 %v3293_v42, %v1347_v56 }
 0x7f8   :  { %1356 = vrot.lane.b32.xlu1 %v1349_v57, %s3380_s25 }
 0x866   :  { %v3811_v58 = vpop.permute.xlu0 %1351 }
 0x867   :  { %2965 = vmatmul.mubr.msk.f32.vlgmr.msra.gmra.mrb[14].mxu0 %vm95_vm0, %v3811_v58 }
 0x868   :  { %3170 = vmatpush3.bf16.msra.mxu0 %v3608_v51  ;;  %2986 = vmatprep.mubr.msk.f32.mxu0 %vm3381_vm1, %v3378_v3 }
 0x869   :  { %3171 = vmatprep.subr.bf16.mxu0 %v3379_v39 }
 0x86a   :  { %v3819_v59 = vpop.permute.xlu1 %1356 }
 0x86b   :  { %2976 = vmatmul.mubr.msk.f32.vlgmr.msra.gmra.mrb[14].mxu1 %vm95_vm0, %v3819_v59 }
 0x86c   :  { %3173 = vmatpush3.bf16.msra.mxu0 %v3649_v63  ;;  %3176 = vmatpush3.bf16.msra.mxu1 %v3621_v55 }
 0x86d   :  { %3177 = vmatprep.subr.bf16.mxu1 %v3379_v39  ;;  %2997 = vmatprep.mubr.msk.f32.mxu1 %vm3381_vm1, %v3378_v3 }
 0x86e   :  { %3180 = vmatprep.subr.bf16.mxu0 %v3379_v39 }
 0x870   :  { %3179 = vmatpush3.bf16.msra.mxu1 %v3656_v1 }
 0x871   :  { %3186 = vmatprep.subr.bf16.mxu1 %v3379_v39 }
 0x93a   :  { %v1430_v60 = vpop.f32.mrb[14].mxu0 }
 0x93b   :  { %v1434_v61 = vadd.f32 %v1430_v60, %v3721_v21  ;;  %v2966_v62 = vpop.f32.mrb[15].mxu0 }
 0x93d   :  { %3298 = vtanh.f32 %v1434_v61  ;;  %v2646_v7 = vmul.f32 -1.442695, %v1434_v61 }
 0x93e   :  { %v1529_v0 = vpop.f32.mrb[14].mxu1 }
 0x93f   :  { %v1533_v2 = vadd.f32 %v1529_v0, %v3735_v35  ;;  %v2977_v4 = vpop.f32.mrb[15].mxu1 }
 0x941   :  { %3300 = vtanh.f32 %v1533_v2  ;;  %v2648_v8 = vmul.f32 -1.442695, %v1533_v2 }
 0x942   :  { %3302 = vpow2.f32 %v2646_v7 }
 0x943   :  { %3304 = vpow2.f32 %v2648_v8 }
 0x947   :  { %v3299_v5 = vpop.eup %3298 }
 0x948   :  { %1444 = vrot.lane.b32.xlu0 %v3299_v5, %s3382_s10 }
 0x94b   :  { %v3301_v6 = vpop.eup %3300 }
 0x94c   :  { %1543 = vrot.lane.b32.xlu1 %v3301_v6, %s3382_s10  ;;  %v3303_v11 = vpop.eup %3302 }
 0x94d   :  { %v1438_v12 = vadd.f32 1.0, %v3303_v11  ;;  %v3305_v21 = vpop.eup %3304 }
 0x94e   :  { %v1537_v13 = vadd.f32 1.0, %v3305_v21 }
 0x94f   :  { %3306 = vrcp.f32 %v1438_v12 }
 0x950   :  { %3308 = vrcp.f32 %v1537_v13 }
 0x959   :  { %v3307_v15 = vpop.eup %3306 }
 0x95a   :  { %v3309_v18 = vpop.eup %3308  ;;  %v1442_v23 = vmul.f32 %v3307_v15, %v1244_v48 }
 0x95b   :  { %v1541_v34 = vmul.f32 %v3309_v18, %v1343_v50 }
 0x9ba   :  { %v1445_v35 = vpop.permute.xlu0 %1444 }
 0x9bb   :  { %v1447_v16 = vmul.f32 %v3307_v15, %v1445_v35 }
 0x9bd   :  { %1449 = vrot.lane.b32.xlu0 %v1447_v16, %s3380_s25 }
 0x9be   :  { %v1544_v20 = vpop.permute.xlu1 %1543 }
 0x9bf   :  { %v1546_v22 = vmul.f32 %v3309_v18, %v1544_v20 }
 0x9c1   :  { %1548 = vrot.lane.b32.xlu1 %v1546_v22, %s3380_s25 }
 0xa2f   :  { %v1450_v26 = vpop.permute.xlu0 %1449 }
 0xa30   :  { %v1452_v31 = vadd.f32 %v1450_v26, %v1442_v23 }
 0xa32   :  { %3310 = vtanh.f32 %v1452_v31 }
 0xa33   :  { %v1549_v25 = vpop.permute.xlu1 %1548 }
 0xa34   :  { %v1551_v36 = vadd.f32 %v1549_v25, %v1541_v34 }
 0xa36   :  { %3312 = vtanh.f32 %v1551_v36 }
 0xa3c   :  { %v3311_v38 = vpop.eup %3310 }
 0xa3d   :  { %1455 = vrot.lane.b32.xlu0 %v3311_v38, %s3382_s10 }
 0xa40   :  { %v3313_v32 = vpop.eup %3312 }
 0xa41   :  { %1554 = vrot.lane.b32.xlu1 %v3313_v32, %s3382_s10 }
 0xaaf   :  { %v1456_v40 = vpop.permute.xlu0 %1455 }
 0xab0   :  { %v1458_v42 = vmul.f32 %v3307_v15, %v1456_v40 }
 0xab2   :  { %1559 = vrot.lane.b32.xlu0 %v1458_v42, %s3380_s25 }
 0xab3   :  { %v1555_v43 = vpop.permute.xlu1 %1554 }
 0xab4   :  { %v1557_v45 = vmul.f32 %v3309_v18, %v1555_v43 }
 0xab6   :  { %1564 = vrot.lane.b32.xlu1 %v1557_v45, %s3380_s25 }
 0xb24   :  { %v3841_v46 = vpop.permute.xlu0 %1559 }
 0xb25   :  { %2987 = vmatmul.mubr.msk.f32.vlgmr.msra.gmra.mrb[16].mxu0 %vm95_vm0, %v3841_v46 }
 0xb26   :  { %3182 = vmatpush3.bf16.msra.mxu0 %v3608_v51  ;;  %3008 = vmatprep.mubr.msk.f32.mxu0 %vm3381_vm1, %v3378_v3 }
 0xb27   :  { %3183 = vmatprep.subr.bf16.mxu0 %v3379_v39 }
 0xb28   :  { %v3849_v47 = vpop.permute.xlu1 %1564 }
 0xb29   :  { %2998 = vmatmul.mubr.msk.f32.vlgmr.msra.gmra.mrb[16].mxu1 %vm95_vm0, %v3849_v47 }
 0xb2a   :  { %3185 = vmatpush3.bf16.msra.mxu0 %v3649_v63  ;;  %3188 = vmatpush3.bf16.msra.mxu1 %v3621_v55 }
 0xb2b   :  { %3189 = vmatprep.subr.bf16.mxu1 %v3379_v39  ;;  %3019 = vmatprep.mubr.msk.f32.mxu1 %vm3381_vm1, %v3378_v3 }
 0xb2c   :  { %3192 = vmatprep.subr.bf16.mxu0 %v3379_v39 }
 0xb2e   :  { %3191 = vmatpush3.bf16.msra.mxu1 %v3656_v1 }
 0xb2f   :  { %3198 = vmatprep.subr.bf16.mxu1 %v3379_v39 }
 0xbf8   :  { %v1638_v48 = vpop.f32.mrb[16].mxu0 }
 0xbf9   :  { %v1642_v49 = vadd.f32 %v1638_v48, %v3733_v33  ;;  %v2988_v14 = vpop.f32.mrb[17].mxu0 }
 0xbfb   :  { %3314 = vtanh.f32 %v1642_v49  ;;  %v2650_v56 = vmul.f32 -1.442695, %v1642_v49 }
 0xbfc   :  { %v1737_v50 = vpop.f32.mrb[16].mxu1 }
 0xbfd   :  { %v1741_v52 = vadd.f32 %v1737_v50, %v3723_v24  ;;  %v2999_v44 = vpop.f32.mrb[17].mxu1 }
 0xbff   :  { %3316 = vtanh.f32 %v1741_v52  ;;  %v2652_v57 = vmul.f32 -1.442695, %v1741_v52 }
 0xc00   :  { %3318 = vpow2.f32 %v2650_v56 }
 0xc01   :  { %3320 = vpow2.f32 %v2652_v57 }
 0xc05   :  { %v3315_v53 = vpop.eup %3314 }
 0xc06   :  { %1652 = vrot.lane.b32.xlu0 %v3315_v53, %s3382_s10 }
 0xc09   :  { %v3317_v54 = vpop.eup %3316 }
 0xc0a   :  { %1751 = vrot.lane.b32.xlu1 %v3317_v54, %s3382_s10  ;;  %v3319_v60 = vpop.eup %3318 }
 0xc0b   :  { %v1646_v61 = vadd.f32 1.0, %v3319_v60  ;;  %v3321_v33 = vpop.eup %3320 }
 0xc0c   :  { %v1745_v62 = vadd.f32 1.0, %v3321_v33 }
 0xc0d   :  { %3322 = vrcp.f32 %v1646_v61 }
 0xc0e   :  { %3324 = vrcp.f32 %v1745_v62 }
 0xc17   :  { %v3323_v0 = vpop.eup %3322 }
 0xc18   :  { %v3325_v4 = vpop.eup %3324  ;;  %v1650_v7 = vmul.f32 %v3323_v0, %v1452_v31 }
 0xc19   :  { %v1749_v12 = vmul.f32 %v3325_v4, %v1551_v36 }
 0xc78   :  { %v1653_v24 = vpop.permute.xlu0 %1652 }
 0xc79   :  { %v1655_v2 = vmul.f32 %v3323_v0, %v1653_v24 }
 0xc7b   :  { %1657 = vrot.lane.b32.xlu0 %v1655_v2, %s3380_s25 }
 0xc7c   :  { %v1752_v5 = vpop.permute.xlu1 %1751 }
 0xc7d   :  { %v1754_v6 = vmul.f32 %v3325_v4, %v1752_v5 }
 0xc7f   :  { %1756 = vrot.lane.b32.xlu1 %v1754_v6, %s3380_s25 }
 0xced   :  { %v1658_v8 = vpop.permute.xlu0 %1657 }
 0xcee   :  { %v1660_v11 = vadd.f32 %v1658_v8, %v1650_v7 }
 0xcf0   :  { %3326 = vtanh.f32 %v1660_v11 }
 0xcf1   :  { %v1757_v21 = vpop.permute.xlu1 %1756 }
 0xcf2   :  { %v1759_v13 = vadd.f32 %v1757_v21, %v1749_v12 }
 0xcf4   :  { %3328 = vtanh.f32 %v1759_v13 }
 0xcfa   :  { %v3327_v15 = vpop.eup %3326 }
 0xcfb   :  { %1663 = vrot.lane.b32.xlu0 %v3327_v15, %s3382_s10 }
 0xcfe   :  { %v3329_v35 = vpop.eup %3328 }
 0xcff   :  { %1762 = vrot.lane.b32.xlu1 %v3329_v35, %s3382_s10 }
 0xd6d   :  { %v1664_v16 = vpop.permute.xlu0 %1663 }
 0xd6e   :  { %v1666_v18 = vmul.f32 %v3323_v0, %v1664_v16 }
 0xd70   :  { %1767 = vrot.lane.b32.xlu0 %v1666_v18, %s3380_s25 }
 0xd71   :  { %v1763_v20 = vpop.permute.xlu1 %1762 }
 0xd72   :  { %v1765_v22 = vmul.f32 %v3325_v4, %v1763_v20 }
 0xd74   :  { %1772 = vrot.lane.b32.xlu1 %v1765_v22, %s3380_s25 }
 0xde2   :  { %v3871_v23 = vpop.permute.xlu0 %1767 }
 0xde3   :  { %3009 = vmatmul.mubr.msk.f32.vlgmr.msra.gmra.mrb[18].mxu0 %vm95_vm0, %v3871_v23 }
 0xde4   :  { %3194 = vmatpush3.bf16.msra.mxu0 %v3608_v51  ;;  %3030 = vmatprep.mubr.msk.f32.mxu0 %vm3381_vm1, %v3378_v3 }
 0xde5   :  { %3195 = vmatprep.subr.bf16.mxu0 %v3379_v39 }
 0xde6   :  { %v3879_v26 = vpop.permute.xlu1 %1772 }
 0xde7   :  { %3020 = vmatmul.mubr.msk.f32.vlgmr.msra.gmra.mrb[18].mxu1 %vm95_vm0, %v3879_v26 }
 0xde8   :  { %3197 = vmatpush3.bf16.msra.mxu0 %v3649_v63  ;;  %3200 = vmatpush3.bf16.msra.mxu1 %v3621_v55 }
 0xde9   :  { %3201 = vmatprep.subr.bf16.mxu1 %v3379_v39  ;;  %3041 = vmatprep.mubr.msk.f32.mxu1 %vm3381_vm1, %v3378_v3 }
 0xdea   :  { %3204 = vmatprep.subr.bf16.mxu0 %v3379_v39 }
 0xdec   :  { %3203 = vmatpush3.bf16.msra.mxu1 %v3656_v1 }
 0xded   :  { %3210 = vmatprep.subr.bf16.mxu1 %v3379_v39 }
 0xeb6   :  { %v1846_v31 = vpop.f32.mrb[18].mxu0 }
 0xeb7   :  { %v1850_v34 = vadd.f32 %v1846_v31, %v3729_v29  ;;  %v3010_v25 = vpop.f32.mrb[19].mxu0 }
 0xeb9   :  { %3330 = vtanh.f32 %v1850_v34  ;;  %v2654_v43 = vmul.f32 -1.442695, %v1850_v34 }
 0xeba   :  { %v1945_v36 = vpop.f32.mrb[18].mxu1 }
 0xebb   :  { %v1949_v38 = vadd.f32 %v1945_v36, %v3727_v27  ;;  %v3021_v32 = vpop.f32.mrb[19].mxu1 }
 0xebd   :  { %3332 = vtanh.f32 %v1949_v38  ;;  %v2656_v45 = vmul.f32 -1.442695, %v1949_v38 }
 0xebe   :  { %3334 = vpow2.f32 %v2654_v43 }
 0xebf   :  { %3336 = vpow2.f32 %v2656_v45 }
 0xec3   :  { %v3331_v40 = vpop.eup %3330 }
 0xec4   :  { %1860 = vrot.lane.b32.xlu0 %v3331_v40, %s3382_s10 }
 0xec7   :  { %v3333_v42 = vpop.eup %3332 }
 0xec8   :  { %1959 = vrot.lane.b32.xlu1 %v3333_v42, %s3382_s10  ;;  %v3335_v48 = vpop.eup %3334 }
 0xec9   :  { %v1854_v49 = vadd.f32 1.0, %v3335_v48  ;;  %v3337_v29 = vpop.eup %3336 }
 0xeca   :  { %v1953_v14 = vadd.f32 1.0, %v3337_v29 }
 0xecb   :  { %3338 = vrcp.f32 %v1854_v49 }
 0xecc   :  { %3340 = vrcp.f32 %v1953_v14 }
 0xed5   :  { %v3339_v50 = vpop.eup %3338 }
 0xed6   :  { %v3341_v44 = vpop.eup %3340  ;;  %v1858_v56 = vmul.f32 %v3339_v50, %v1660_v11 }
 0xed7   :  { %v1957_v61 = vmul.f32 %v3341_v44, %v1759_v13 }
 0xf36   :  { %v1861_v27 = vpop.permute.xlu0 %1860 }
 0xf37   :  { %v1863_v52 = vmul.f32 %v3339_v50, %v1861_v27 }
 0xf39   :  { %1865 = vrot.lane.b32.xlu0 %v1863_v52, %s3380_s25 }
 0xf3a   :  { %v1960_v53 = vpop.permute.xlu1 %1959 }
 0xf3b   :  { %v1962_v54 = vmul.f32 %v3341_v44, %v1960_v53 }
 0xf3d   :  { %1964 = vrot.lane.b32.xlu1 %v1962_v54, %s3380_s25 }
 0xfab   :  { %v1866_v57 = vpop.permute.xlu0 %1865 }
 0xfac   :  { %v1868_v60 = vadd.f32 %v1866_v57, %v1858_v56 }
 0xfae   :  { %3342 = vtanh.f32 %v1868_v60 }
 0xfaf   :  { %v1965_v33 = vpop.permute.xlu1 %1964 }
 0xfb0   :  { %v1967_v62 = vadd.f32 %v1965_v33, %v1957_v61 }
 0xfb2   :  { %3344 = vtanh.f32 %v1967_v62 }
 0xfb8   :  { %v3343_v0 = vpop.eup %3342 }
 0xfb9   :  { %1871 = vrot.lane.b32.xlu0 %v3343_v0, %s3382_s10 }
 0xfbc   :  { %v3345_v24 = vpop.eup %3344 }
 0xfbd   :  { %1970 = vrot.lane.b32.xlu1 %v3345_v24, %s3382_s10 }
0x102b   :  { %v1872_v2 = vpop.permute.xlu0 %1871 }
0x102c   :  { %v1874_v4 = vmul.f32 %v3339_v50, %v1872_v2 }
0x102e   :  { %1975 = vrot.lane.b32.xlu0 %v1874_v4, %s3380_s25 }
0x102f   :  { %v1971_v5 = vpop.permute.xlu1 %1970 }
0x1030   :  { %v1973_v6 = vmul.f32 %v3341_v44, %v1971_v5 }
0x1032   :  { %1980 = vrot.lane.b32.xlu1 %v1973_v6, %s3380_s25 }
0x10a0   :  { %v3901_v7 = vpop.permute.xlu0 %1975 }
0x10a1   :  { %3031 = vmatmul.mubr.msk.f32.vlgmr.msra.gmra.mrb[20].mxu0 %vm95_vm0, %v3901_v7 }
0x10a2   :  { %3206 = vmatpush3.bf16.msra.mxu0 %v3608_v51  ;;  %3052 = vmatprep.mubr.msk.f32.mxu0 %vm3381_vm1, %v3378_v3 }
0x10a3   :  { %3207 = vmatprep.subr.bf16.mxu0 %v3379_v39 }
0x10a4   :  { %v3909_v8 = vpop.permute.xlu1 %1980 }
0x10a5   :  { %3042 = vmatmul.mubr.msk.f32.vlgmr.msra.gmra.mrb[20].mxu1 %vm95_vm0, %v3909_v8 }
0x10a6   :  { %3209 = vmatpush3.bf16.msra.mxu0 %v3649_v63  ;;  %3212 = vmatpush3.bf16.msra.mxu1 %v3621_v55 }
0x10a7   :  { %3213 = vmatprep.subr.bf16.mxu1 %v3379_v39  ;;  %3063 = vmatprep.mubr.msk.f32.mxu1 %vm3381_vm1, %v3378_v3 }
0x10a8   :  { %3216 = vmatprep.subr.bf16.mxu0 %v3379_v39 }
0x10aa   :  { %3215 = vmatpush3.bf16.msra.mxu1 %v3656_v1 }
0x10ab   :  { %3222 = vmatprep.subr.bf16.mxu1 %v3379_v39 }
0x1174   :  { %v2054_v51 = vpop.f32.mrb[20].mxu0 }
0x1175   :  { %v2058_v11 = vadd.f32 %v2054_v51, %v3739_v41  ;;  %v3032_v12 = vpop.f32.mrb[21].mxu0 }
0x1177   :  { %3346 = vtanh.f32 %v2058_v11  ;;  %v2658_v35 = vmul.f32 -1.442695, %v2058_v11 }
0x1178   :  { %v2153_v21 = vpop.f32.mrb[20].mxu1 }
0x1179   :  { %v2157_v63 = vadd.f32 %v2153_v21, %v3717_v17  ;;  %v3043_v55 = vpop.f32.mrb[21].mxu1 }
0x117b   :  { %3348 = vtanh.f32 %v2157_v63  ;;  %v2660_v1 = vmul.f32 -1.442695, %v2157_v63 }
0x117c   :  { %3350 = vpow2.f32 %v2658_v35 }
0x117d   :  { %3352 = vpow2.f32 %v2660_v1  ;;  %v2418_v1 = vld [vmem:[%s4019_s12] sm:$0xff] }
0x1181   :  { %v3347_v13 = vpop.eup %3346 }
0x1182   :  { %2068 = vrot.lane.b32.xlu0 %v3347_v13, %s3382_s10 }
0x1185   :  { %v3349_v15 = vpop.eup %3348 }
0x1186   :  { %2167 = vrot.lane.b32.xlu1 %v3349_v15, %s3382_s10  ;;  %v3351_v16 = vpop.eup %3350 }
0x1187   :  { %v2062_v18 = vadd.f32 1.0, %v3351_v16  ;;  %v3353_v41 = vpop.eup %3352  ;;  %v2419_v16 = vld [vmem:[%s4019_s12 + $0x8] sm:$0xff] }
0x1188   :  { %v2161_v20 = vadd.f32 1.0, %v3353_v41  ;;  %v3223_v41 = vpack.c.bf16 %v2419_v16, %v2418_v1 }
0x1189   :  { %3354 = vrcp.f32 %v2062_v18 }
0x118a   :  { %3356 = vrcp.f32 %v2161_v20 }
0x1193   :  { %v3355_v22 = vpop.eup %3354 }
0x1194   :  { %v3357_v34 = vpop.eup %3356  ;;  %v2066_v38 = vmul.f32 %v3355_v22, %v1868_v60 }
0x1195   :  { %v2165_v42 = vmul.f32 %v3357_v34, %v1967_v62 }
0x11f4   :  { %v2069_v17 = vpop.permute.xlu0 %2068 }
0x11f5   :  { %v2071_v31 = vmul.f32 %v3355_v22, %v2069_v17  ;;  %v2666_v17 = vld [vmem:[%s4019_s12 + $0x28] sm:$0xff] }
0x11f7   :  { %2073 = vrot.lane.b32.xlu0 %v2071_v31, %s3380_s25  ;;  %v2420_v31 = vld [vmem:[%s4019_s12 + $0x10] sm:$0xff] }
0x11f8   :  { %v2168_v25 = vpop.permute.xlu1 %2167 }
0x11f9   :  { %v2170_v36 = vmul.f32 %v3357_v34, %v2168_v25  ;;  %v2421_v25 = vld [vmem:[%s4019_s12 + $0x18] sm:$0xff] }
0x11fb   :  { %2172 = vrot.lane.b32.xlu1 %v2170_v36, %s3380_s25  ;;  %v3226_v36 = vpack.c.bf16 %v2421_v25, %v2420_v31 }
0x1269   :  { %v2074_v32 = vpop.permute.xlu0 %2073 }
0x126a   :  { %v2076_v40 = vadd.f32 %v2074_v32, %v2066_v38  ;;  %v2667_v38 = vld [vmem:[%s4019_s12 + $0x30] sm:$0xff]  ;;  %v2668_v32 = vld [vmem:[%s4019_s12 + $0x38] sm:$0xff] }
0x126c   :  { %3358 = vtanh.f32 %v2076_v40 }
0x126d   :  { %v2173_v43 = vpop.permute.xlu1 %2172 }
0x126e   :  { %v2175_v45 = vadd.f32 %v2173_v43, %v2165_v42 }
0x1270   :  { %3360 = vtanh.f32 %v2175_v45 }
0x1276   :  { %v3359_v48 = vpop.eup %3358 }
0x1277   :  { %2079 = vrot.lane.b32.xlu0 %v3359_v48, %s3382_s10 }
0x127a   :  { %v3361_v49 = vpop.eup %3360 }
0x127b   :  { %2178 = vrot.lane.b32.xlu1 %v3361_v49, %s3382_s10 }
0x12e9   :  { %v2080_v29 = vpop.permute.xlu0 %2079 }
0x12ea   :  { %v2082_v14 = vmul.f32 %v3355_v22, %v2080_v29  ;;  %v2665_v22 = vld [vmem:[%s4019_s12 + $0x20] sm:$0xff]  ;;  %v726_v29 = vld [vmem:[#allocation9] sm:$0xff] }
0x12ec   :  { %2183 = vrot.lane.b32.xlu0 %v2082_v14, %s3380_s25 }
0x12ed   :  { %v2179_v50 = vpop.permute.xlu1 %2178 }
0x12ee   :  { %v2181_v27 = vmul.f32 %v3357_v34, %v2179_v50  ;;  %v3217_v34 = vpack.c.bf16 %v2666_v17, %v2665_v22  ;;  %v943_v50 = vadd.f32 %v3759_v30, %v726_v29 }
0x12f0   :  { %2188 = vrot.lane.b32.xlu1 %v2181_v27, %s3380_s25 }
0x135e   :  { %v3931_v52 = vpop.permute.xlu0 %2183 }
0x135f   :  { %3053 = vmatmul.mubr.msk.f32.vlgmr.msra.gmra.mrb[22].mxu0 %vm95_vm0, %v3931_v52 }
0x1360   :  { %3074 = vmatprep.mubr.msk.f32.mxu0 %vm3381_vm1, %v3378_v3  ;;  %3218 = vmatpush3.bf16.msra.mxu0 %v3217_v34 }
0x1361   :  { %3219 = vmatprep.subr.bf16.mxu0 %v3379_v39 }
0x1362   :  { %v3937_v44 = vpop.permute.xlu1 %2188 }
0x1363   :  { %3064 = vmatmul.mubr.msk.f32.vlgmr.msra.gmra.mrb[22].mxu1 %vm95_vm0, %v3937_v44 }
0x1364   :  { %3085 = vmatprep.mubr.msk.f32.mxu1 %vm3381_vm1, %v3378_v3  ;;  %3224 = vmatpush3.bf16.msra.mxu1 %v3223_v41 }
0x1365   :  { %3225 = vmatprep.subr.bf16.mxu1 %v3379_v39  ;;  %v725_v39 = vld [vmem:[#allocation8] sm:$0xff] }
0x1366   :  { %v938_v49 = vadd.f32 %v3751_v28, %v725_v39 }
0x1368   :  { %3227 = vmatpush3.bf16.msra.mxu1 %v3226_v36  ;;  %v1146_v14 = vadd.f32 %v3781_v9, %v938_v49 }
0x136a   :  { %v1354_v27 = vadd.f32 %v3811_v58, %v1146_v14 }
0x1432   :  { %v2262_v53 = vpop.f32.mrb[22].mxu0 }
0x1433   :  { %v2266_v54 = vadd.f32 %v2262_v53, %v3737_v37  ;;  %v3054_v56 = vpop.f32.mrb[23].mxu0  ;;  %v1151_v53 = vadd.f32 %v3789_v10, %v943_v50 }
0x1435   :  { %3362 = vtanh.f32 %v2266_v54  ;;  %v2662_v0 = vmul.f32 -1.442695, %v2266_v54  ;;  %v1562_v54 = vadd.f32 %v3841_v46, %v1354_v27  ;;  %v1359_v56 = vadd.f32 %v3819_v59, %v1151_v53 }
0x1436   :  { %v2360_v57 = vpop.f32.mrb[22].mxu1 }
0x1437   :  { %v2364_v60 = vadd.f32 %v2360_v57, %v3719_v19  ;;  %v3065_v61 = vpop.f32.mrb[23].mxu1  ;;  %v1770_v57 = vadd.f32 %v3871_v23, %v1562_v54 }
0x1439   :  { %3364 = vtanh.f32 %v2364_v60  ;;  %v2664_v24 = vmul.f32 -1.442695, %v2364_v60  ;;  %v1567_v60 = vadd.f32 %v3849_v47, %v1359_v56  ;;  %v1978_v61 = vadd.f32 %v3901_v7, %v1770_v57 }
0x143a   :  { %3366 = vpow2.f32 %v2662_v0 }
0x143b   :  { %3368 = vpow2.f32 %v2664_v24  ;;  %v1775_v28 = vadd.f32 %v3879_v26, %v1567_v60  ;;  %v2186_v9 = vadd.f32 %v3931_v52, %v1978_v61 }
0x143d   :  { %v1983_v30 = vadd.f32 %v3909_v8, %v1775_v28 }
0x143f   :  { %v3363_v33 = vpop.eup %3362  ;;  %v2191_v10 = vadd.f32 %v3937_v44, %v1983_v30 }
0x1440   :  { %2276 = vrot.lane.b32.xlu0 %v3363_v33, %s3382_s10 }
0x1443   :  { %v3365_v62 = vpop.eup %3364 }
0x1444   :  { %2374 = vrot.lane.b32.xlu1 %v3365_v62, %s3382_s10  ;;  %v3367_v3 = vpop.eup %3366  ;;  %v2671_v62 = vld [vmem:[%s4020_s13] ss:$0 sm:$0xff] }
0x1445   :  { %v2270_v2 = vadd.f32 1.0, %v3367_v3  ;;  %v3369_v37 = vpop.eup %3368 }
0x1446   :  { %v2368_v4 = vadd.f32 1.0, %v3369_v37 }
0x1447   :  { %3370 = vrcp.f32 %v2270_v2 }
0x1448   :  { %3372 = vrcp.f32 %v2368_v4 }
0x1451   :  { %v3371_v5 = vpop.eup %3370 }
0x1452   :  { %v3373_v51 = vpop.eup %3372  ;;  %v2274_v21 = vmul.f32 %v3371_v5, %v2076_v40  ;;  %v3220_v40 = vpack.c.bf16 %v2668_v32, %v2667_v38 }
0x1453   :  { %v2372_v13 = vmul.f32 %v3373_v51, %v2175_v45 }
0x1454   :  { %3221 = vmatpush3.bf16.msra.mxu0 %v3220_v40 }
0x14b2   :  { %v2277_v19 = vpop.permute.xlu0 %2276 }
0x14b3   :  { %v2279_v6 = vmul.f32 %v3371_v5, %v2277_v19 }
0x14b5   :  { %2281 = vrot.lane.b32.xlu0 %v2279_v6, %s3380_s25 }
0x14b6   :  { %v2375_v11 = vpop.permute.xlu1 %2374 }
0x14b7   :  { %v2377_v12 = vmul.f32 %v3373_v51, %v2375_v11 }
0x14b9   :  { %2379 = vrot.lane.b32.xlu1 %v2377_v12, %s3380_s25 }
0x1527   :  { %v2282_v63 = vpop.permute.xlu0 %2281 }
0x1528   :  { %v2284_v55 = vadd.f32 %v2282_v63, %v2274_v21 }
0x152a   :  { %3374 = vtanh.f32 %v2284_v55 }
0x152b   :  { %v2380_v15 = vpop.permute.xlu1 %2379 }
0x152c   :  { %v2382_v35 = vadd.f32 %v2380_v15, %v2372_v13 }
0x152e   :  { %3376 = vtanh.f32 %v2382_v35 }
0x1534   :  { %v3375_v18 = vpop.eup %3374 }
0x1535   :  { %2287 = vrot.lane.b32.xlu0 %v3375_v18, %s3382_s10 }
0x1538   :  { %v3377_v20 = vpop.eup %3376 }
0x1539   :  { %2385 = vrot.lane.b32.xlu1 %v3377_v20, %s3382_s10 }
0x15a7   :  { %v2288_v42 = vpop.permute.xlu0 %2287 }
0x15a8   :  { %v2290_v43 = vmul.f32 %v3371_v5, %v2288_v42 }
0x15aa   :  { %2390 = vrot.lane.b32.xlu0 %v2290_v43, %s3380_s25 }
0x15ab   :  { %v2386_v45 = vpop.permute.xlu1 %2385 }
0x15ac   :  { %v2388_v48 = vmul.f32 %v3373_v51, %v2386_v45 }
0x15ae   :  { %2395 = vrot.lane.b32.xlu1 %v2388_v48, %s3380_s25  ;;  %2401 = vrot.lane.b32.xlu0 %v2284_v55, %s3383_s4 }
0x15b2   :  { %2407 = vrot.lane.b32.xlu1 %v2382_v35, %s3383_s4 }
0x161c   :  { %v2391_v33 = vpop.permute.xlu0 %2390 }
0x161d   :  { %v2393_v58 = vadd.f32 %v2391_v33, %v2186_v9  ;;  %2399 = vst.msk [vmem:[#allocation2] sm:$0xff] %vm95_vm0, %v2391_v33 }
0x161f   :  { %2411 = vst.msk [vmem:[#allocation8] sm:$0xff] %vm95_vm0, %v2393_v58  ;;  %v2416_v59 = vmul.f32 0.125, %v2393_v58 }
0x1620   :  { %v2396_v46 = vpop.permute.xlu1 %2395  ;;  %v2402_v23 = vpop.permute.xlu0 %2401 }
0x1621   :  { %v2398_v47 = vadd.f32 %v2396_v46, %v2191_v10  ;;  %2405 = vst.msk [vmem:[#allocation4] sm:$0xff] %vm95_vm0, %v2396_v46  ;;  %2404 = vst.msk [vmem:[#allocation3] sm:$0xff] %vm95_vm0, %v2402_v23  ;;  %3086 = vmatmul.mubr.msk.f32.vlgmr.msra.gmra.mrb[24].mxu1 %vm95_vm0, %v2416_v59 }
0x1623   :  { %2412 = vst.msk [vmem:[#allocation9] sm:$0xff] %vm95_vm0, %v2398_v47  ;;  %v2417_v26 = vmul.f32 0.125, %v2398_v47 }
0x1624   :  { %v2408_v7 = vpop.permute.xlu1 %2407 }
0x1625   :  { %2410 = vst.msk [vmem:[#allocation5] sm:$0xff] %vm95_vm0, %v2408_v7  ;;  %3075 = vmatmul.mubr.msk.f32.vlgmr.msra.gmra.mrb[24].mxu0 %vm95_vm0, %v2417_v26 }
0x16f4   :  { %v2569_v8 = vpop.f32.mrb[24].mxu1 }
0x16f5   :  { %v3087_v52 = vpop.f32.mrb[25].mxu1 }
0x16f8   :  { %v2496_v44 = vpop.f32.mrb[24].mxu0 }
0x16f9   :  { %v2570_v0 = vadd.f32 %v2569_v8, %v2496_v44  ;;  %v3076_v24 = vpop.f32.mrb[25].mxu0 }
0x16fb   :  { %v2580_v3 = vadd.f32 %v2671_v62, %v2570_v0 }
0x16fd   :  { %2582 = vst.msk [vmem:[%s4021_s14] sm:$0xff] %vm2581_vm2, %v2580_v3 }

</bundles_post_ra>
